<compile_context>
chip_gen: v6e
topology: v6e:2x2x1
jax: 0.10.0
libtpu: 0.0.40
codegen_flags: <defaults>
</compile_context>

<pallas_src>
import functools

import numpy as np

import jax
import jax.numpy as jnp
from jax.experimental import pallas as pl
from jax.experimental.pallas import tpu as pltpu

NEG_SLOPE = 0.01   # nn.LeakyReLU default negative_slope
K = 4              # conv kernel size ('same' padding: 1 before, 2 after)


def _leaky(v):
    return jnp.where(v >= 0.0, v, NEG_SLOPE * v)


# ---------------------------------------------------------------------------
# The single fused kernel.
#   inputs : x, per layer [m1, b1row, m2even, m2odd, rmat, pool_bias],
#            then wd, bd, wih_t, whh_t, blstm, lin1_w, lin1_b, lin2_w, lin2_b
#   scratch: pad, mx, av, pool, gx, xl, hs   (all VMEM)
# Activations live as (H, W*C) values, channels minor on the lane axis.
# ---------------------------------------------------------------------------
def _seed_deep_kernel(*refs, geoms):
    n_layers = len(geoms)
    n_in = 1 + 6 * n_layers + 9
    x_ref = refs[0]
    layer_refs = [refs[1 + 6 * i: 1 + 6 * (i + 1)] for i in range(n_layers)]
    (wd_ref, bd_ref, wih_ref, whh_ref, blstm_ref,
     l1w_ref, l1b_ref, l2w_ref, l2b_ref) = refs[1 + 6 * n_layers: n_in]
    out_ref = refs[n_in]
    (pad_ref, mx_ref, av_ref, pool_ref, gx_ref, xl_ref, hs_ref) = refs[n_in + 1:]

    B = x_ref.shape[0]
    ll1 = bd_ref.shape[1]
    HL, WL, _, CL = geoms[-1]
    HhL, WC_L = HL // 2, (WL // 2) * CL

    for b in range(B):
        a = x_ref[b]                                        # (H0, W0*C0)
        for (m1_ref, b1_ref, m2e_ref, m2o_ref, rmat_ref, pb_ref), (H, W, Cin, Cout) in zip(
                layer_refs, geoms):
            Hh, Wh = H // 2, W // 2
            half = Wh * Cout

            def shifted_matmul(inp, m_refs, WC):
                # zero-padded row buffer + 4 row-shifted matmuls against the
                # banded per-kh weight matrices == k=4 'same' conv as matmuls
                pad_ref[...] = jnp.zeros(pad_ref.shape, jnp.float32)
                pad_ref[1:1 + H, 0:WC] = inp
                rows = [pad_ref[kh:kh + H, 0:WC] for kh in range(K)]
                outs = []
                for m_ref in m_refs:
                    acc = jnp.dot(rows[0], m_ref[0], preferred_element_type=jnp.float32)
                    for kh in range(1, K):
                        acc = acc + jnp.dot(rows[kh], m_ref[kh],
                                            preferred_element_type=jnp.float32)
                    outs.append(acc)
                return outs

            # conv1 + folded BN + LeakyReLU
            (o1,) = shifted_matmul(a, (m1_ref,), W * Cin)
            o1 = _leaky(o1 + b1_ref[...])                   # (H, W*Cout)
            # conv2 + folded BN; even/odd output-column split == W-direction max pool
            o2e, o2o = shifted_matmul(o1, (m2e_ref, m2o_ref), W * Cout)
            mx_ref[0:H, 0:half] = jnp.maximum(o2e, o2o)
            # residual path: 1x1 resample (+BN) fused with W-direction avg pool (x0.25)
            av_ref[0:H, 0:half] = jnp.dot(a, rmat_ref[...],
                                          preferred_element_type=jnp.float32)
            pb = pb_ref[...]
            # H-direction pooling + residual add + LeakyReLU
            for i2 in range(Hh):
                r = (jnp.maximum(mx_ref[2 * i2:2 * i2 + 1, 0:half],
                                 mx_ref[2 * i2 + 1:2 * i2 + 2, 0:half])
                     + av_ref[2 * i2:2 * i2 + 1, 0:half]
                     + av_ref[2 * i2 + 1:2 * i2 + 2, 0:half]
                     + pb)
                pool_ref[i2:i2 + 1, 0:half] = _leaky(r)
            a = pool_ref[0:Hh, 0:half]                      # next layer input

        # NCHW flatten is folded into the pre-permuted ldown weight rows; ldown Linear
        acc = bd_ref[...]                                   # (1, ll1)
        for h in range(HhL):
            acc = acc + jnp.dot(pool_ref[h:h + 1, 0:WC_L],
                                wd_ref[h * WC_L:(h + 1) * WC_L, :],
                                preferred_element_type=jnp.float32)
        xl_ref[b:b + 1, :] = acc

    # LSTM over the batch axis as an unbatched sequence (PyTorch 2-D LSTM input),
    # zero initial state, gate order (i, f, g, o).  Input matmul hoisted.
    gx_ref[...] = (jnp.dot(xl_ref[...], wih_ref[...], preferred_element_type=jnp.float32)
                   + blstm_ref[...])
    h = jnp.zeros((1, ll1), jnp.float32)
    c = jnp.zeros((1, ll1), jnp.float32)
    for t in range(B):                                      # fully unrolled recurrence
        g = gx_ref[t:t + 1, :] + jnp.dot(h, whh_ref[...],
                                         preferred_element_type=jnp.float32)
        i_g = jax.nn.sigmoid(g[:, 0:ll1])
        f_g = jax.nn.sigmoid(g[:, ll1:2 * ll1])
        g_g = jnp.tanh(g[:, 2 * ll1:3 * ll1])
        o_g = jax.nn.sigmoid(g[:, 3 * ll1:4 * ll1])
        c = f_g * c + i_g * g_g
        h = o_g * jnp.tanh(c)
        hs_ref[t:t + 1, :] = h + xl_ref[t:t + 1, :]         # fused residual add

    # lin1 + ReLU, lin2
    y = jnp.maximum(jnp.dot(hs_ref[...], l1w_ref[...],
                            preferred_element_type=jnp.float32) + l1b_ref[...], 0.0)
    out_ref[...] = jnp.dot(y, l2w_ref[...],
                           preferred_element_type=jnp.float32) + l2b_ref[...]


def _zero_index_map(ndim):
    return lambda i: (0,) * ndim


def make_seed_deep_forward(geoms, num_classes):
    geoms = tuple(tuple(int(v) for v in g) for g in geoms)
    n_layers = len(geoms)
    kernel = functools.partial(_seed_deep_kernel, geoms=geoms)

    max_h = max(g[0] for g in geoms)
    pad_rows = max_h + K - 1
    pad_cols = max(g[1] * max(g[2], g[3]) for g in geoms)
    half_cols = max((g[1] // 2) * g[3] for g in geoms)
    pool_rows = max(g[0] // 2 for g in geoms)

    def forward(x, params_flat):
        # x: (B, T, F); torch does permute(0,2,1)+unsqueeze(1) -> NCHW (B,1,F,T);
        # the kernel's layout is (B, H=F, W*C=T).
        x_hw = jnp.transpose(x, (0, 2, 1))
        B = x.shape[0]
        ll1 = params_flat[6 * n_layers + 1].shape[1]
        inputs = [x_hw] + list(params_flat)
        grid_spec = pltpu.PrefetchScalarGridSpec(
            num_scalar_prefetch=0,
            grid=(1,),
            in_specs=[pl.BlockSpec(a.shape, _zero_index_map(a.ndim)) for a in inputs],
            out_specs=pl.BlockSpec((B, num_classes), _zero_index_map(2)),
            scratch_shapes=[
                pltpu.VMEM((pad_rows, pad_cols), jnp.float32),    # padded conv rows
                pltpu.VMEM((max_h, half_cols), jnp.float32),      # W-maxpooled conv2
                pltpu.VMEM((max_h, half_cols), jnp.float32),      # W-avgpooled residual
                pltpu.VMEM((pool_rows, half_cols), jnp.float32),  # pooled layer output
                pltpu.VMEM((B, 4 * ll1), jnp.float32),            # hoisted LSTM gates
                pltpu.VMEM((B, ll1), jnp.float32),                # ldown outputs
                pltpu.VMEM((B, ll1), jnp.float32),                # LSTM outputs + residual
            ],
        )
        return pl.pallas_call(
            kernel,
            out_shape=jax.ShapeDtypeStruct((B, num_classes), jnp.float32),
            grid_spec=grid_spec,
            compiler_params=pltpu.CompilerParams(dimension_semantics=("arbitrary",)),
        )(*inputs)

    return forward


# ---------------------------------------------------------------------------
# Wrapper-side (one-time) parameter preprocessing: BN folding, banded conv
# matrices, pooling folding, layout permutations.
# ---------------------------------------------------------------------------
def _bn_scale_bias(bn, conv_b, eps=1e-5):
    scale = bn["gamma"] / jnp.sqrt(bn["var"] + eps)
    bias = (conv_b - bn["mean"]) * scale + bn["beta"]
    return scale, bias


def _band_selector(W):
    # S[wj, kw, j] = 1  iff  wj == j + kw - 1  ('same' pad for k=4: 1 before, 2 after)
    S = np.zeros((W, K, W), np.float32)
    for j in range(W):
        for kw in range(K):
            wj = j + kw - 1
            if 0 <= wj < W:
                S[wj, kw, j] = 1.0
    return jnp.asarray(S)


def _band_mats(w_kkio, W, cols=None):
    # w_kkio: (K, K, Cin, Cout) -> per-kh banded matrices (K, W*Cin, ncols*Cout)
    Cin, Cout = w_kkio.shape[2], w_kkio.shape[3]
    m = jnp.einsum("xkj,hkio->hxijo", _band_selector(W), w_kkio)  # (K, W, Cin, W, Cout)
    if cols is not None:
        m = m[:, :, :, cols, :]
    return m.reshape(K, W * Cin, m.shape[3] * Cout)


def _avgpoolw_mat(R, W):
    # R: (Cin, Cout) channel map; fold 1x1 resample + W-half of AvgPool2d((2,2)).
    Wh = W // 2
    P = np.zeros((W, Wh), np.float32)
    for j2 in range(Wh):
        P[2 * j2, j2] = 0.25
        P[2 * j2 + 1, j2] = 0.25
    m = jnp.einsum("wj,io->wijo", jnp.asarray(P), R)              # (W, Cin, Wh, Cout)
    return m.reshape(W * R.shape[0], Wh * R.shape[1])


def preprocess_params(params, *, H0, W0, C0):
    """Fold eval-mode BatchNorm into weights, build banded conv matrices,
    fold pooling patterns, permute ldown rows.  Returns (flat arrays, geoms)."""
    flat, geoms = [], []
    H, W, Cin = H0, W0, C0
    for lay in params["layers"]:
        Cout = int(lay["conv1_b"].shape[0])
        Wh = W // 2
        s1, b1 = _bn_scale_bias(lay["bn1"], lay["conv1_b"])
        s2, b2 = _bn_scale_bias(lay["bn2"], lay["conv2_b"])
        w1 = jnp.transpose(lay["conv1_w"] * s1[:, None, None, None], (2, 3, 1, 0))
        w2 = jnp.transpose(lay["conv2_w"] * s2[:, None, None, None], (2, 3, 1, 0))
        m1 = _band_mats(w1, W)
        m2e = _band_mats(w2, W, cols=np.arange(0, 2 * Wh, 2))
        m2o = _band_mats(w2, W, cols=np.arange(1, 2 * Wh, 2))
        if "res_w" in lay:
            sr, br = _bn_scale_bias(lay["bnr"], lay["res_b"])
            Rmap = (lay["res_w"][:, :, 0, 0] * sr[:, None]).T     # (Cin, Cout)
            pool_bias = b2 + br
        else:
            Rmap = jnp.eye(Cout, dtype=jnp.float32)
            pool_bias = b2
        rmat = _avgpoolw_mat(Rmap, W)
        flat += [m1, jnp.tile(b1, W).reshape(1, W * Cout),
                 m2e, m2o, rmat,
                 jnp.tile(pool_bias, Wh).reshape(1, Wh * Cout)]
        geoms.append((H, W, Cin, Cout))
        H, W, Cin = H // 2, W // 2, Cout

    # Head: permute ldown rows from the PyTorch NCHW flatten order (c, h, w)
    # to this kernel's (h, w, c) activation layout.
    HhL, WhL, CL = H, W, Cin
    ll1 = int(params["ldown_b"].shape[0])
    wd = params["ldown_w"].T.reshape(CL, HhL, WhL, ll1)
    wd = jnp.transpose(wd, (1, 2, 0, 3)).reshape(HhL * WhL * CL, ll1)
    flat += [
        wd, params["ldown_b"].reshape(1, ll1),
        params["lstm_w_ih"].T, params["lstm_w_hh"].T,
        (params["lstm_b_ih"] + params["lstm_b_hh"]).reshape(1, 4 * ll1),
        params["lin1_w"].T, params["lin1_b"].reshape(1, -1),
        params["lin2_w"].T, params["lin2_b"].reshape(1, -1),
    ]
    return flat, geoms


# ---------------------------------------------------------------------------
# Deterministic synthetic parameters (PyTorch-style raw layout, no checkpoints)
# ---------------------------------------------------------------------------
def _bn_init(key, c):
    k1, k2, k3, k4 = jax.random.split(key, 4)
    return {
        "gamma": 1.0 + 0.1 * jax.random.normal(k1, (c,), jnp.float32),
        "beta": 0.1 * jax.random.normal(k2, (c,), jnp.float32),
        "mean": 0.1 * jax.random.normal(k3, (c,), jnp.float32),
        "var": 1.0 + 0.5 * jax.random.uniform(k4, (c,), jnp.float32),
    }


def init_params(key, *, in_channels, out_channels, num_res_layers, flat_dim,
                ll1, ll2, num_classes, k=4):
    p = {"layers": []}
    c_in = in_channels
    for _ in range(num_res_layers):
        key, *ks = jax.random.split(key, 15)
        lay = {
            "conv1_w": 0.1 * jax.random.normal(ks[0], (out_channels, c_in, k, k), jnp.float32),
            "conv1_b": 0.05 * jax.random.normal(ks[1], (out_channels,), jnp.float32),
            "bn1": _bn_init(ks[2], out_channels),
            "conv2_w": 0.1 * jax.random.normal(ks[3], (out_channels, out_channels, k, k), jnp.float32),
            "conv2_b": 0.05 * jax.random.normal(ks[4], (out_channels,), jnp.float32),
            "bn2": _bn_init(ks[5], out_channels),
        }
        if c_in != out_channels:
            lay["res_w"] = 0.1 * jax.random.normal(ks[6], (out_channels, c_in, 1, 1), jnp.float32)
            lay["res_b"] = 0.05 * jax.random.normal(ks[7], (out_channels,), jnp.float32)
            lay["bnr"] = _bn_init(ks[8], out_channels)
        p["layers"].append(lay)
        c_in = out_channels

    key, *ks = jax.random.split(key, 12)
    # TODO(synk): the reference __init__ hard-codes nn.Linear(300, ll1) for its
    # dataset geometry when do_pool=True; here in_features is the actual
    # flattened size so the forward is well-defined at this input shape.
    p["ldown_w"] = 0.1 * jax.random.normal(ks[0], (ll1, flat_dim), jnp.float32)
    p["ldown_b"] = 0.05 * jax.random.normal(ks[1], (ll1,), jnp.float32)
    s = 1.0 / float(ll1) ** 0.5
    p["lstm_w_ih"] = s * jax.random.normal(ks[2], (4 * ll1, ll1), jnp.float32)
    p["lstm_w_hh"] = s * jax.random.normal(ks[3], (4 * ll1, ll1), jnp.float32)
    p["lstm_b_ih"] = s * jax.random.normal(ks[4], (4 * ll1,), jnp.float32)
    p["lstm_b_hh"] = s * jax.random.normal(ks[5], (4 * ll1,), jnp.float32)
    p["lin1_w"] = 0.1 * jax.random.normal(ks[6], (ll2, ll1), jnp.float32)
    p["lin1_b"] = 0.05 * jax.random.normal(ks[7], (ll2,), jnp.float32)
    p["lin2_w"] = 0.1 * jax.random.normal(ks[8], (num_classes, ll2), jnp.float32)
    p["lin2_b"] = 0.05 * jax.random.normal(ks[9], (num_classes,), jnp.float32)
    return p


if __name__ == "__main__":
    # Small config consistent with the module:
    #   is_grid=False, do_pool=True, in_channels=1, k=4,
    #   num_res_layers=2, out_channels=8, ll1=128, ll2=64, num_classes=3
    B, T_seq, F_feat = 2, 8, 8
    C_in, C_out, num_res_layers = 1, 8, 2
    ll1, ll2, num_classes = 128, 64, 3
    H_last = F_feat // (2 ** num_res_layers)
    W_last = T_seq // (2 ** num_res_layers)
    flat_dim = C_out * H_last * W_last

    x = jax.random.normal(jax.random.PRNGKey(0), (B, T_seq, F_feat), jnp.float32)
    params = init_params(jax.random.PRNGKey(1), in_channels=C_in, out_channels=C_out,
                         num_res_layers=num_res_layers, flat_dim=flat_dim,
                         ll1=ll1, ll2=ll2, num_classes=num_classes)
    flat_params, geoms = preprocess_params(params, H0=F_feat, W0=T_seq, C0=C_in)

    fwd = jax.jit(make_seed_deep_forward(geoms, num_classes))
    out = jax.block_until_ready(fwd(x, flat_params))
    assert out.shape == (B, num_classes)
    assert bool(jnp.all(jnp.isfinite(out)))
    print("KERNEL_OK")
</pallas_src>

<mosaic_0001>
module attributes {stable_mosaic.version = 11 : i64} {
  func.func @_seed_deep_kernel(%arg0: i32, %arg1: memref<2x8x8xf32, #tpu.memory_space<vmem>>, %arg2: memref<4x8x64xf32, #tpu.memory_space<vmem>>, %arg3: memref<1x64xf32, #tpu.memory_space<vmem>>, %arg4: memref<4x64x32xf32, #tpu.memory_space<vmem>>, %arg5: memref<4x64x32xf32, #tpu.memory_space<vmem>>, %arg6: memref<8x32xf32, #tpu.memory_space<vmem>>, %arg7: memref<1x32xf32, #tpu.memory_space<vmem>>, %arg8: memref<4x32x32xf32, #tpu.memory_space<vmem>>, %arg9: memref<1x32xf32, #tpu.memory_space<vmem>>, %arg10: memref<4x32x16xf32, #tpu.memory_space<vmem>>, %arg11: memref<4x32x16xf32, #tpu.memory_space<vmem>>, %arg12: memref<32x16xf32, #tpu.memory_space<vmem>>, %arg13: memref<1x16xf32, #tpu.memory_space<vmem>>, %arg14: memref<32x128xf32, #tpu.memory_space<vmem>>, %arg15: memref<1x128xf32, #tpu.memory_space<vmem>>, %arg16: memref<128x512xf32, #tpu.memory_space<vmem>>, %arg17: memref<128x512xf32, #tpu.memory_space<vmem>>, %arg18: memref<1x512xf32, #tpu.memory_space<vmem>>, %arg19: memref<128x64xf32, #tpu.memory_space<vmem>>, %arg20: memref<1x64xf32, #tpu.memory_space<vmem>>, %arg21: memref<64x3xf32, #tpu.memory_space<vmem>>, %arg22: memref<1x3xf32, #tpu.memory_space<vmem>>, %arg23: memref<2x3xf32, #tpu.memory_space<vmem>>, %arg24: memref<11x64xf32, #tpu.memory_space<vmem>>, %arg25: memref<8x32xf32, #tpu.memory_space<vmem>>, %arg26: memref<8x32xf32, #tpu.memory_space<vmem>>, %arg27: memref<4x32xf32, #tpu.memory_space<vmem>>, %arg28: memref<2x512xf32, #tpu.memory_space<vmem>>, %arg29: memref<2x128xf32, #tpu.memory_space<vmem>>, %arg30: memref<2x128xf32, #tpu.memory_space<vmem>>) attributes {dimension_semantics = [#tpu.dimension_semantics<arbitrary>], iteration_bounds = array<i64: 1>, scalar_prefetch = 0 : i64, scratch_operands = 7 : i64, tpu.core_type = #tpu.core_type<tc>, window_params = [{pipeline_mode = #tpu.pipeline_mode<synchronous>, transform_indices = @transform_0, window_bounds = array<i64: 2, 8, 8>}, {pipeline_mode = #tpu.pipeline_mode<synchronous>, transform_indices = @transform_1, window_bounds = array<i64: 4, 8, 64>}, {pipeline_mode = #tpu.pipeline_mode<synchronous>, transform_indices = @transform_2, window_bounds = array<i64: 1, 64>}, {pipeline_mode = #tpu.pipeline_mode<synchronous>, transform_indices = @transform_3, window_bounds = array<i64: 4, 64, 32>}, {pipeline_mode = #tpu.pipeline_mode<synchronous>, transform_indices = @transform_4, window_bounds = array<i64: 4, 64, 32>}, {pipeline_mode = #tpu.pipeline_mode<synchronous>, transform_indices = @transform_5, window_bounds = array<i64: 8, 32>}, {pipeline_mode = #tpu.pipeline_mode<synchronous>, transform_indices = @transform_6, window_bounds = array<i64: 1, 32>}, {pipeline_mode = #tpu.pipeline_mode<synchronous>, transform_indices = @transform_7, window_bounds = array<i64: 4, 32, 32>}, {pipeline_mode = #tpu.pipeline_mode<synchronous>, transform_indices = @transform_8, window_bounds = array<i64: 1, 32>}, {pipeline_mode = #tpu.pipeline_mode<synchronous>, transform_indices = @transform_9, window_bounds = array<i64: 4, 32, 16>}, {pipeline_mode = #tpu.pipeline_mode<synchronous>, transform_indices = @transform_10, window_bounds = array<i64: 4, 32, 16>}, {pipeline_mode = #tpu.pipeline_mode<synchronous>, transform_indices = @transform_11, window_bounds = array<i64: 32, 16>}, {pipeline_mode = #tpu.pipeline_mode<synchronous>, transform_indices = @transform_12, window_bounds = array<i64: 1, 16>}, {pipeline_mode = #tpu.pipeline_mode<synchronous>, transform_indices = @transform_13, window_bounds = array<i64: 32, 128>}, {pipeline_mode = #tpu.pipeline_mode<synchronous>, transform_indices = @transform_14, window_bounds = array<i64: 1, 128>}, {pipeline_mode = #tpu.pipeline_mode<synchronous>, transform_indices = @transform_15, window_bounds = array<i64: 128, 512>}, {pipeline_mode = #tpu.pipeline_mode<synchronous>, transform_indices = @transform_16, window_bounds = array<i64: 128, 512>}, {pipeline_mode = #tpu.pipeline_mode<synchronous>, transform_indices = @transform_17, window_bounds = array<i64: 1, 512>}, {pipeline_mode = #tpu.pipeline_mode<synchronous>, transform_indices = @transform_18, window_bounds = array<i64: 128, 64>}, {pipeline_mode = #tpu.pipeline_mode<synchronous>, transform_indices = @transform_19, window_bounds = array<i64: 1, 64>}, {pipeline_mode = #tpu.pipeline_mode<synchronous>, transform_indices = @transform_20, window_bounds = array<i64: 64, 3>}, {pipeline_mode = #tpu.pipeline_mode<synchronous>, transform_indices = @transform_21, window_bounds = array<i64: 1, 3>}, {pipeline_mode = #tpu.pipeline_mode<synchronous>, transform_indices = @transform_22, window_bounds = array<i64: 2, 3>}]} {
    %c0 = arith.constant 0 : index
    %c0_0 = arith.constant 0 : index
    %c0_1 = arith.constant 0 : index
    %0 = vector.load %arg1[%c0, %c0_0, %c0_1] : memref<2x8x8xf32, #tpu.memory_space<vmem>>, vector<1x8x8xf32>
    %1 = vector.shape_cast %0 : vector<1x8x8xf32> to vector<8x8xf32>
    %cst = arith.constant 0.000000e+00 : f32
    %2 = vector.broadcast %cst : f32 to vector<11x64xf32>
    %c0_2 = arith.constant 0 : index
    %c0_3 = arith.constant 0 : index
    %3 = vector.load %arg24[%c0_2, %c0_3] : memref<11x64xf32, #tpu.memory_space<vmem>>, vector<11x64xf32>
    tpu.vector_store %arg24[%c0_2, %c0_3], %2 {strides = array<i32>} : memref<11x64xf32, #tpu.memory_space<vmem>>, vector<11x64xf32>,
    %c1 = arith.constant 1 : index
    %c0_4 = arith.constant 0 : index
    %4 = vector.load %arg24[%c1, %c0_4] : memref<11x64xf32, #tpu.memory_space<vmem>>, vector<8x8xf32>
    tpu.vector_store %arg24[%c1, %c0_4], %1 {strides = array<i32>} : memref<11x64xf32, #tpu.memory_space<vmem>>, vector<8x8xf32>,
    %c0_5 = arith.constant 0 : index
    %c0_6 = arith.constant 0 : index
    %5 = vector.load %arg24[%c0_5, %c0_6] : memref<11x64xf32, #tpu.memory_space<vmem>>, vector<8x8xf32>
    %c1_7 = arith.constant 1 : index
    %c0_8 = arith.constant 0 : index
    %6 = vector.load %arg24[%c1_7, %c0_8] : memref<11x64xf32, #tpu.memory_space<vmem>>, vector<8x8xf32>
    %c2 = arith.constant 2 : index
    %c0_9 = arith.constant 0 : index
    %7 = vector.load %arg24[%c2, %c0_9] : memref<11x64xf32, #tpu.memory_space<vmem>>, vector<8x8xf32>
    %c3 = arith.constant 3 : index
    %c0_10 = arith.constant 0 : index
    %8 = vector.load %arg24[%c3, %c0_10] : memref<11x64xf32, #tpu.memory_space<vmem>>, vector<8x8xf32>
    %c0_11 = arith.constant 0 : index
    %c0_12 = arith.constant 0 : index
    %c0_13 = arith.constant 0 : index
    %9 = vector.load %arg2[%c0_11, %c0_12, %c0_13] : memref<4x8x64xf32, #tpu.memory_space<vmem>>, vector<1x8x64xf32>
    %10 = vector.shape_cast %9 : vector<1x8x64xf32> to vector<8x64xf32>
    %cst_14 = arith.constant dense<0.000000e+00> : vector<8x64xf32>
    %11 = tpu.matmul %5, %10, %cst_14 {dimension_numbers = #tpu.dot_dimension_numbers<[1], [0], [0], [1], [0, 0, 1, 1], [], []>} : vector<8x8xf32>, vector<8x64xf32>, vector<8x64xf32> -> vector<8x64xf32>
    %c1_15 = arith.constant 1 : index
    %c0_16 = arith.constant 0 : index
    %c0_17 = arith.constant 0 : index
    %12 = vector.load %arg2[%c1_15, %c0_16, %c0_17] : memref<4x8x64xf32, #tpu.memory_space<vmem>>, vector<1x8x64xf32>
    %13 = vector.shape_cast %12 : vector<1x8x64xf32> to vector<8x64xf32>
    %cst_18 = arith.constant dense<0.000000e+00> : vector<8x64xf32>
    %14 = tpu.matmul %6, %13, %cst_18 {dimension_numbers = #tpu.dot_dimension_numbers<[1], [0], [0], [1], [0, 0, 1, 1], [], []>} : vector<8x8xf32>, vector<8x64xf32>, vector<8x64xf32> -> vector<8x64xf32>
    %15 = arith.addf %11, %14 : vector<8x64xf32>
    %c2_19 = arith.constant 2 : index
    %c0_20 = arith.constant 0 : index
    %c0_21 = arith.constant 0 : index
    %16 = vector.load %arg2[%c2_19, %c0_20, %c0_21] : memref<4x8x64xf32, #tpu.memory_space<vmem>>, vector<1x8x64xf32>
    %17 = vector.shape_cast %16 : vector<1x8x64xf32> to vector<8x64xf32>
    %cst_22 = arith.constant dense<0.000000e+00> : vector<8x64xf32>
    %18 = tpu.matmul %7, %17, %cst_22 {dimension_numbers = #tpu.dot_dimension_numbers<[1], [0], [0], [1], [0, 0, 1, 1], [], []>} : vector<8x8xf32>, vector<8x64xf32>, vector<8x64xf32> -> vector<8x64xf32>
    %19 = arith.addf %15, %18 : vector<8x64xf32>
    %c3_23 = arith.constant 3 : index
    %c0_24 = arith.constant 0 : index
    %c0_25 = arith.constant 0 : index
    %20 = vector.load %arg2[%c3_23, %c0_24, %c0_25] : memref<4x8x64xf32, #tpu.memory_space<vmem>>, vector<1x8x64xf32>
    %21 = vector.shape_cast %20 : vector<1x8x64xf32> to vector<8x64xf32>
    %cst_26 = arith.constant dense<0.000000e+00> : vector<8x64xf32>
    %22 = tpu.matmul %8, %21, %cst_26 {dimension_numbers = #tpu.dot_dimension_numbers<[1], [0], [0], [1], [0, 0, 1, 1], [], []>} : vector<8x8xf32>, vector<8x64xf32>, vector<8x64xf32> -> vector<8x64xf32>
    %23 = arith.addf %19, %22 : vector<8x64xf32>
    %c0_27 = arith.constant 0 : index
    %c0_28 = arith.constant 0 : index
    %24 = vector.load %arg3[%c0_27, %c0_28] : memref<1x64xf32, #tpu.memory_space<vmem>>, vector<1x64xf32>
    %25 = vector.broadcast %24 : vector<1x64xf32> to vector<8x64xf32>
    %26 = arith.addf %23, %25 : vector<8x64xf32>
    %cst_29 = arith.constant 0.000000e+00 : f32
    %27 = vector.broadcast %cst_29 : f32 to vector<8x64xf32>
    %28 = arith.cmpf oge, %26, %27 : vector<8x64xf32>
    %cst_30 = arith.constant 0.00999999977 : f32
    %29 = vector.broadcast %cst_30 : f32 to vector<8x64xf32>
    %30 = arith.mulf %29, %26 : vector<8x64xf32>
    %31 = arith.select %28, %26, %30 : vector<8x64xi1>, vector<8x64xf32>
    %cst_31 = arith.constant 0.000000e+00 : f32
    %32 = vector.broadcast %cst_31 : f32 to vector<11x64xf32>
    %c0_32 = arith.constant 0 : index
    %c0_33 = arith.constant 0 : index
    %33 = vector.load %arg24[%c0_32, %c0_33] : memref<11x64xf32, #tpu.memory_space<vmem>>, vector<11x64xf32>
    tpu.vector_store %arg24[%c0_32, %c0_33], %32 {strides = array<i32>} : memref<11x64xf32, #tpu.memory_space<vmem>>, vector<11x64xf32>,
    %c1_34 = arith.constant 1 : index
    %c0_35 = arith.constant 0 : index
    %34 = vector.load %arg24[%c1_34, %c0_35] : memref<11x64xf32, #tpu.memory_space<vmem>>, vector<8x64xf32>
    tpu.vector_store %arg24[%c1_34, %c0_35], %31 {strides = array<i32>} : memref<11x64xf32, #tpu.memory_space<vmem>>, vector<8x64xf32>,
    %c0_36 = arith.constant 0 : index
    %c0_37 = arith.constant 0 : index
    %35 = vector.load %arg24[%c0_36, %c0_37] : memref<11x64xf32, #tpu.memory_space<vmem>>, vector<8x64xf32>
    %c1_38 = arith.constant 1 : index
    %c0_39 = arith.constant 0 : index
    %36 = vector.load %arg24[%c1_38, %c0_39] : memref<11x64xf32, #tpu.memory_space<vmem>>, vector<8x64xf32>
    %c2_40 = arith.constant 2 : index
    %c0_41 = arith.constant 0 : index
    %37 = vector.load %arg24[%c2_40, %c0_41] : memref<11x64xf32, #tpu.memory_space<vmem>>, vector<8x64xf32>
    %c3_42 = arith.constant 3 : index
    %c0_43 = arith.constant 0 : index
    %38 = vector.load %arg24[%c3_42, %c0_43] : memref<11x64xf32, #tpu.memory_space<vmem>>, vector<8x64xf32>
    %c0_44 = arith.constant 0 : index
    %c0_45 = arith.constant 0 : index
    %c0_46 = arith.constant 0 : index
    %39 = vector.load %arg4[%c0_44, %c0_45, %c0_46] : memref<4x64x32xf32, #tpu.memory_space<vmem>>, vector<1x64x32xf32>
    %40 = vector.shape_cast %39 : vector<1x64x32xf32> to vector<64x32xf32>
    %cst_47 = arith.constant dense<0.000000e+00> : vector<8x32xf32>
    %41 = tpu.matmul %35, %40, %cst_47 {dimension_numbers = #tpu.dot_dimension_numbers<[1], [0], [0], [1], [0, 0, 1, 1], [], []>} : vector<8x64xf32>, vector<64x32xf32>, vector<8x32xf32> -> vector<8x32xf32>
    %c1_48 = arith.constant 1 : index
    %c0_49 = arith.constant 0 : index
    %c0_50 = arith.constant 0 : index
    %42 = vector.load %arg4[%c1_48, %c0_49, %c0_50] : memref<4x64x32xf32, #tpu.memory_space<vmem>>, vector<1x64x32xf32>
    %43 = vector.shape_cast %42 : vector<1x64x32xf32> to vector<64x32xf32>
    %cst_51 = arith.constant dense<0.000000e+00> : vector<8x32xf32>
    %44 = tpu.matmul %36, %43, %cst_51 {dimension_numbers = #tpu.dot_dimension_numbers<[1], [0], [0], [1], [0, 0, 1, 1], [], []>} : vector<8x64xf32>, vector<64x32xf32>, vector<8x32xf32> -> vector<8x32xf32>
    %45 = arith.addf %41, %44 : vector<8x32xf32>
    %c2_52 = arith.constant 2 : index
    %c0_53 = arith.constant 0 : index
    %c0_54 = arith.constant 0 : index
    %46 = vector.load %arg4[%c2_52, %c0_53, %c0_54] : memref<4x64x32xf32, #tpu.memory_space<vmem>>, vector<1x64x32xf32>
    %47 = vector.shape_cast %46 : vector<1x64x32xf32> to vector<64x32xf32>
    %cst_55 = arith.constant dense<0.000000e+00> : vector<8x32xf32>
    %48 = tpu.matmul %37, %47, %cst_55 {dimension_numbers = #tpu.dot_dimension_numbers<[1], [0], [0], [1], [0, 0, 1, 1], [], []>} : vector<8x64xf32>, vector<64x32xf32>, vector<8x32xf32> -> vector<8x32xf32>
    %49 = arith.addf %45, %48 : vector<8x32xf32>
    %c3_56 = arith.constant 3 : index
    %c0_57 = arith.constant 0 : index
    %c0_58 = arith.constant 0 : index
    %50 = vector.load %arg4[%c3_56, %c0_57, %c0_58] : memref<4x64x32xf32, #tpu.memory_space<vmem>>, vector<1x64x32xf32>
    %51 = vector.shape_cast %50 : vector<1x64x32xf32> to vector<64x32xf32>
    %cst_59 = arith.constant dense<0.000000e+00> : vector<8x32xf32>
    %52 = tpu.matmul %38, %51, %cst_59 {dimension_numbers = #tpu.dot_dimension_numbers<[1], [0], [0], [1], [0, 0, 1, 1], [], []>} : vector<8x64xf32>, vector<64x32xf32>, vector<8x32xf32> -> vector<8x32xf32>
    %53 = arith.addf %49, %52 : vector<8x32xf32>
    %c0_60 = arith.constant 0 : index
    %c0_61 = arith.constant 0 : index
    %c0_62 = arith.constant 0 : index
    %54 = vector.load %arg5[%c0_60, %c0_61, %c0_62] : memref<4x64x32xf32, #tpu.memory_space<vmem>>, vector<1x64x32xf32>
    %55 = vector.shape_cast %54 : vector<1x64x32xf32> to vector<64x32xf32>
    %cst_63 = arith.constant dense<0.000000e+00> : vector<8x32xf32>
    %56 = tpu.matmul %35, %55, %cst_63 {dimension_numbers = #tpu.dot_dimension_numbers<[1], [0], [0], [1], [0, 0, 1, 1], [], []>} : vector<8x64xf32>, vector<64x32xf32>, vector<8x32xf32> -> vector<8x32xf32>
    %c1_64 = arith.constant 1 : index
    %c0_65 = arith.constant 0 : index
    %c0_66 = arith.constant 0 : index
    %57 = vector.load %arg5[%c1_64, %c0_65, %c0_66] : memref<4x64x32xf32, #tpu.memory_space<vmem>>, vector<1x64x32xf32>
    %58 = vector.shape_cast %57 : vector<1x64x32xf32> to vector<64x32xf32>
    %cst_67 = arith.constant dense<0.000000e+00> : vector<8x32xf32>
    %59 = tpu.matmul %36, %58, %cst_67 {dimension_numbers = #tpu.dot_dimension_numbers<[1], [0], [0], [1], [0, 0, 1, 1], [], []>} : vector<8x64xf32>, vector<64x32xf32>, vector<8x32xf32> -> vector<8x32xf32>
    %60 = arith.addf %56, %59 : vector<8x32xf32>
    %c2_68 = arith.constant 2 : index
    %c0_69 = arith.constant 0 : index
    %c0_70 = arith.constant 0 : index
    %61 = vector.load %arg5[%c2_68, %c0_69, %c0_70] : memref<4x64x32xf32, #tpu.memory_space<vmem>>, vector<1x64x32xf32>
    %62 = vector.shape_cast %61 : vector<1x64x32xf32> to vector<64x32xf32>
    %cst_71 = arith.constant dense<0.000000e+00> : vector<8x32xf32>
    %63 = tpu.matmul %37, %62, %cst_71 {dimension_numbers = #tpu.dot_dimension_numbers<[1], [0], [0], [1], [0, 0, 1, 1], [], []>} : vector<8x64xf32>, vector<64x32xf32>, vector<8x32xf32> -> vector<8x32xf32>
    %64 = arith.addf %60, %63 : vector<8x32xf32>
    %c3_72 = arith.constant 3 : index
    %c0_73 = arith.constant 0 : index
    %c0_74 = arith.constant 0 : index
    %65 = vector.load %arg5[%c3_72, %c0_73, %c0_74] : memref<4x64x32xf32, #tpu.memory_space<vmem>>, vector<1x64x32xf32>
    %66 = vector.shape_cast %65 : vector<1x64x32xf32> to vector<64x32xf32>
    %cst_75 = arith.constant dense<0.000000e+00> : vector<8x32xf32>
    %67 = tpu.matmul %38, %66, %cst_75 {dimension_numbers = #tpu.dot_dimension_numbers<[1], [0], [0], [1], [0, 0, 1, 1], [], []>} : vector<8x64xf32>, vector<64x32xf32>, vector<8x32xf32> -> vector<8x32xf32>
    %68 = arith.addf %64, %67 : vector<8x32xf32>
    %69 = arith.maximumf %53, %68 : vector<8x32xf32>
    %c0_76 = arith.constant 0 : index
    %c0_77 = arith.constant 0 : index
    %70 = vector.load %arg25[%c0_76, %c0_77] : memref<8x32xf32, #tpu.memory_space<vmem>>, vector<8x32xf32>
    tpu.vector_store %arg25[%c0_76, %c0_77], %69 {strides = array<i32>} : memref<8x32xf32, #tpu.memory_space<vmem>>, vector<8x32xf32>,
    %c0_78 = arith.constant 0 : index
    %c0_79 = arith.constant 0 : index
    %71 = vector.load %arg6[%c0_78, %c0_79] : memref<8x32xf32, #tpu.memory_space<vmem>>, vector<8x32xf32>
    %cst_80 = arith.constant dense<0.000000e+00> : vector<8x32xf32>
    %72 = tpu.matmul %1, %71, %cst_80 {dimension_numbers = #tpu.dot_dimension_numbers<[1], [0], [0], [1], [0, 0, 1, 1], [], []>} : vector<8x8xf32>, vector<8x32xf32>, vector<8x32xf32> -> vector<8x32xf32>
    %c0_81 = arith.constant 0 : index
    %c0_82 = arith.constant 0 : index
    %73 = vector.load %arg26[%c0_81, %c0_82] : memref<8x32xf32, #tpu.memory_space<vmem>>, vector<8x32xf32>
    tpu.vector_store %arg26[%c0_81, %c0_82], %72 {strides = array<i32>} : memref<8x32xf32, #tpu.memory_space<vmem>>, vector<8x32xf32>,
    %c0_83 = arith.constant 0 : index
    %c0_84 = arith.constant 0 : index
    %74 = vector.load %arg7[%c0_83, %c0_84] : memref<1x32xf32, #tpu.memory_space<vmem>>, vector<1x32xf32>
    %c0_85 = arith.constant 0 : index
    %c0_86 = arith.constant 0 : index
    %75 = vector.load %arg25[%c0_85, %c0_86] : memref<8x32xf32, #tpu.memory_space<vmem>>, vector<1x32xf32>
    %c1_87 = arith.constant 1 : index
    %c0_88 = arith.constant 0 : index
    %76 = vector.load %arg25[%c1_87, %c0_88] : memref<8x32xf32, #tpu.memory_space<vmem>>, vector<1x32xf32>
    %77 = arith.maximumf %75, %76 : vector<1x32xf32>
    %c0_89 = arith.constant 0 : index
    %c0_90 = arith.constant 0 : index
    %78 = vector.load %arg26[%c0_89, %c0_90] : memref<8x32xf32, #tpu.memory_space<vmem>>, vector<1x32xf32>
    %79 = arith.addf %77, %78 : vector<1x32xf32>
    %c1_91 = arith.constant 1 : index
    %c0_92 = arith.constant 0 : index
    %80 = vector.load %arg26[%c1_91, %c0_92] : memref<8x32xf32, #tpu.memory_space<vmem>>, vector<1x32xf32>
    %81 = arith.addf %79, %80 : vector<1x32xf32>
    %82 = arith.addf %81, %74 : vector<1x32xf32>
    %cst_93 = arith.constant 0.000000e+00 : f32
    %83 = vector.broadcast %cst_93 : f32 to vector<1x32xf32>
    %84 = arith.cmpf oge, %82, %83 : vector<1x32xf32>
    %cst_94 = arith.constant 0.00999999977 : f32
    %85 = vector.broadcast %cst_94 : f32 to vector<1x32xf32>
    %86 = arith.mulf %85, %82 : vector<1x32xf32>
    %87 = arith.select %84, %82, %86 : vector<1x32xi1>, vector<1x32xf32>
    %c0_95 = arith.constant 0 : index
    %c0_96 = arith.constant 0 : index
    %88 = vector.load %arg27[%c0_95, %c0_96] : memref<4x32xf32, #tpu.memory_space<vmem>>, vector<1x32xf32>
    tpu.vector_store %arg27[%c0_95, %c0_96], %87 {strides = array<i32>} : memref<4x32xf32, #tpu.memory_space<vmem>>, vector<1x32xf32>,
    %c2_97 = arith.constant 2 : index
    %c0_98 = arith.constant 0 : index
    %89 = vector.load %arg25[%c2_97, %c0_98] : memref<8x32xf32, #tpu.memory_space<vmem>>, vector<1x32xf32>
    %c3_99 = arith.constant 3 : index
    %c0_100 = arith.constant 0 : index
    %90 = vector.load %arg25[%c3_99, %c0_100] : memref<8x32xf32, #tpu.memory_space<vmem>>, vector<1x32xf32>
    %91 = arith.maximumf %89, %90 : vector<1x32xf32>
    %c2_101 = arith.constant 2 : index
    %c0_102 = arith.constant 0 : index
    %92 = vector.load %arg26[%c2_101, %c0_102] : memref<8x32xf32, #tpu.memory_space<vmem>>, vector<1x32xf32>
    %93 = arith.addf %91, %92 : vector<1x32xf32>
    %c3_103 = arith.constant 3 : index
    %c0_104 = arith.constant 0 : index
    %94 = vector.load %arg26[%c3_103, %c0_104] : memref<8x32xf32, #tpu.memory_space<vmem>>, vector<1x32xf32>
    %95 = arith.addf %93, %94 : vector<1x32xf32>
    %96 = arith.addf %95, %74 : vector<1x32xf32>
    %cst_105 = arith.constant 0.000000e+00 : f32
    %97 = vector.broadcast %cst_105 : f32 to vector<1x32xf32>
    %98 = arith.cmpf oge, %96, %97 : vector<1x32xf32>
    %cst_106 = arith.constant 0.00999999977 : f32
    %99 = vector.broadcast %cst_106 : f32 to vector<1x32xf32>
    %100 = arith.mulf %99, %96 : vector<1x32xf32>
    %101 = arith.select %98, %96, %100 : vector<1x32xi1>, vector<1x32xf32>
    %c1_107 = arith.constant 1 : index
    %c0_108 = arith.constant 0 : index
    %102 = vector.load %arg27[%c1_107, %c0_108] : memref<4x32xf32, #tpu.memory_space<vmem>>, vector<1x32xf32>
    tpu.vector_store %arg27[%c1_107, %c0_108], %101 {strides = array<i32>} : memref<4x32xf32, #tpu.memory_space<vmem>>, vector<1x32xf32>,
    %c4 = arith.constant 4 : index
    %c0_109 = arith.constant 0 : index
    %103 = vector.load %arg25[%c4, %c0_109] : memref<8x32xf32, #tpu.memory_space<vmem>>, vector<1x32xf32>
    %c5 = arith.constant 5 : index
    %c0_110 = arith.constant 0 : index
    %104 = vector.load %arg25[%c5, %c0_110] : memref<8x32xf32, #tpu.memory_space<vmem>>, vector<1x32xf32>
    %105 = arith.maximumf %103, %104 : vector<1x32xf32>
    %c4_111 = arith.constant 4 : index
    %c0_112 = arith.constant 0 : index
    %106 = vector.load %arg26[%c4_111, %c0_112] : memref<8x32xf32, #tpu.memory_space<vmem>>, vector<1x32xf32>
    %107 = arith.addf %105, %106 : vector<1x32xf32>
    %c5_113 = arith.constant 5 : index
    %c0_114 = arith.constant 0 : index
    %108 = vector.load %arg26[%c5_113, %c0_114] : memref<8x32xf32, #tpu.memory_space<vmem>>, vector<1x32xf32>
    %109 = arith.addf %107, %108 : vector<1x32xf32>
    %110 = arith.addf %109, %74 : vector<1x32xf32>
    %cst_115 = arith.constant 0.000000e+00 : f32
    %111 = vector.broadcast %cst_115 : f32 to vector<1x32xf32>
    %112 = arith.cmpf oge, %110, %111 : vector<1x32xf32>
    %cst_116 = arith.constant 0.00999999977 : f32
    %113 = vector.broadcast %cst_116 : f32 to vector<1x32xf32>
    %114 = arith.mulf %113, %110 : vector<1x32xf32>
    %115 = arith.select %112, %110, %114 : vector<1x32xi1>, vector<1x32xf32>
    %c2_117 = arith.constant 2 : index
    %c0_118 = arith.constant 0 : index
    %116 = vector.load %arg27[%c2_117, %c0_118] : memref<4x32xf32, #tpu.memory_space<vmem>>, vector<1x32xf32>
    tpu.vector_store %arg27[%c2_117, %c0_118], %115 {strides = array<i32>} : memref<4x32xf32, #tpu.memory_space<vmem>>, vector<1x32xf32>,
    %c6 = arith.constant 6 : index
    %c0_119 = arith.constant 0 : index
    %117 = vector.load %arg25[%c6, %c0_119] : memref<8x32xf32, #tpu.memory_space<vmem>>, vector<1x32xf32>
    %c7 = arith.constant 7 : index
    %c0_120 = arith.constant 0 : index
    %118 = vector.load %arg25[%c7, %c0_120] : memref<8x32xf32, #tpu.memory_space<vmem>>, vector<1x32xf32>
    %119 = arith.maximumf %117, %118 : vector<1x32xf32>
    %c6_121 = arith.constant 6 : index
    %c0_122 = arith.constant 0 : index
    %120 = vector.load %arg26[%c6_121, %c0_122] : memref<8x32xf32, #tpu.memory_space<vmem>>, vector<1x32xf32>
    %121 = arith.addf %119, %120 : vector<1x32xf32>
    %c7_123 = arith.constant 7 : index
    %c0_124 = arith.constant 0 : index
    %122 = vector.load %arg26[%c7_123, %c0_124] : memref<8x32xf32, #tpu.memory_space<vmem>>, vector<1x32xf32>
    %123 = arith.addf %121, %122 : vector<1x32xf32>
    %124 = arith.addf %123, %74 : vector<1x32xf32>
    %cst_125 = arith.constant 0.000000e+00 : f32
    %125 = vector.broadcast %cst_125 : f32 to vector<1x32xf32>
    %126 = arith.cmpf oge, %124, %125 : vector<1x32xf32>
    %cst_126 = arith.constant 0.00999999977 : f32
    %127 = vector.broadcast %cst_126 : f32 to vector<1x32xf32>
    %128 = arith.mulf %127, %124 : vector<1x32xf32>
    %129 = arith.select %126, %124, %128 : vector<1x32xi1>, vector<1x32xf32>
    %c3_127 = arith.constant 3 : index
    %c0_128 = arith.constant 0 : index
    %130 = vector.load %arg27[%c3_127, %c0_128] : memref<4x32xf32, #tpu.memory_space<vmem>>, vector<1x32xf32>
    tpu.vector_store %arg27[%c3_127, %c0_128], %129 {strides = array<i32>} : memref<4x32xf32, #tpu.memory_space<vmem>>, vector<1x32xf32>,
    %c0_129 = arith.constant 0 : index
    %c0_130 = arith.constant 0 : index
    %131 = vector.load %arg27[%c0_129, %c0_130] : memref<4x32xf32, #tpu.memory_space<vmem>>, vector<4x32xf32>
    %cst_131 = arith.constant 0.000000e+00 : f32
    %132 = vector.broadcast %cst_131 : f32 to vector<11x64xf32>
    %c0_132 = arith.constant 0 : index
    %c0_133 = arith.constant 0 : index
    %133 = vector.load %arg24[%c0_132, %c0_133] : memref<11x64xf32, #tpu.memory_space<vmem>>, vector<11x64xf32>
    tpu.vector_store %arg24[%c0_132, %c0_133], %132 {strides = array<i32>} : memref<11x64xf32, #tpu.memory_space<vmem>>, vector<11x64xf32>,
    %c1_134 = arith.constant 1 : index
    %c0_135 = arith.constant 0 : index
    %134 = vector.load %arg24[%c1_134, %c0_135] : memref<11x64xf32, #tpu.memory_space<vmem>>, vector<4x32xf32>
    tpu.vector_store %arg24[%c1_134, %c0_135], %131 {strides = array<i32>} : memref<11x64xf32, #tpu.memory_space<vmem>>, vector<4x32xf32>,
    %c0_136 = arith.constant 0 : index
    %c0_137 = arith.constant 0 : index
    %135 = vector.load %arg24[%c0_136, %c0_137] : memref<11x64xf32, #tpu.memory_space<vmem>>, vector<4x32xf32>
    %c1_138 = arith.constant 1 : index
    %c0_139 = arith.constant 0 : index
    %136 = vector.load %arg24[%c1_138, %c0_139] : memref<11x64xf32, #tpu.memory_space<vmem>>, vector<4x32xf32>
    %c2_140 = arith.constant 2 : index
    %c0_141 = arith.constant 0 : index
    %137 = vector.load %arg24[%c2_140, %c0_141] : memref<11x64xf32, #tpu.memory_space<vmem>>, vector<4x32xf32>
    %c3_142 = arith.constant 3 : index
    %c0_143 = arith.constant 0 : index
    %138 = vector.load %arg24[%c3_142, %c0_143] : memref<11x64xf32, #tpu.memory_space<vmem>>, vector<4x32xf32>
    %c0_144 = arith.constant 0 : index
    %c0_145 = arith.constant 0 : index
    %c0_146 = arith.constant 0 : index
    %139 = vector.load %arg8[%c0_144, %c0_145, %c0_146] : memref<4x32x32xf32, #tpu.memory_space<vmem>>, vector<1x32x32xf32>
    %140 = vector.shape_cast %139 : vector<1x32x32xf32> to vector<32x32xf32>
    %cst_147 = arith.constant dense<0.000000e+00> : vector<4x32xf32>
    %141 = tpu.matmul %135, %140, %cst_147 {dimension_numbers = #tpu.dot_dimension_numbers<[1], [0], [0], [1], [0, 0, 1, 1], [], []>} : vector<4x32xf32>, vector<32x32xf32>, vector<4x32xf32> -> vector<4x32xf32>
    %c1_148 = arith.constant 1 : index
    %c0_149 = arith.constant 0 : index
    %c0_150 = arith.constant 0 : index
    %142 = vector.load %arg8[%c1_148, %c0_149, %c0_150] : memref<4x32x32xf32, #tpu.memory_space<vmem>>, vector<1x32x32xf32>
    %143 = vector.shape_cast %142 : vector<1x32x32xf32> to vector<32x32xf32>
    %cst_151 = arith.constant dense<0.000000e+00> : vector<4x32xf32>
    %144 = tpu.matmul %136, %143, %cst_151 {dimension_numbers = #tpu.dot_dimension_numbers<[1], [0], [0], [1], [0, 0, 1, 1], [], []>} : vector<4x32xf32>, vector<32x32xf32>, vector<4x32xf32> -> vector<4x32xf32>
    %145 = arith.addf %141, %144 : vector<4x32xf32>
    %c2_152 = arith.constant 2 : index
    %c0_153 = arith.constant 0 : index
    %c0_154 = arith.constant 0 : index
    %146 = vector.load %arg8[%c2_152, %c0_153, %c0_154] : memref<4x32x32xf32, #tpu.memory_space<vmem>>, vector<1x32x32xf32>
    %147 = vector.shape_cast %146 : vector<1x32x32xf32> to vector<32x32xf32>
    %cst_155 = arith.constant dense<0.000000e+00> : vector<4x32xf32>
    %148 = tpu.matmul %137, %147, %cst_155 {dimension_numbers = #tpu.dot_dimension_numbers<[1], [0], [0], [1], [0, 0, 1, 1], [], []>} : vector<4x32xf32>, vector<32x32xf32>, vector<4x32xf32> -> vector<4x32xf32>
    %149 = arith.addf %145, %148 : vector<4x32xf32>
    %c3_156 = arith.constant 3 : index
    %c0_157 = arith.constant 0 : index
    %c0_158 = arith.constant 0 : index
    %150 = vector.load %arg8[%c3_156, %c0_157, %c0_158] : memref<4x32x32xf32, #tpu.memory_space<vmem>>, vector<1x32x32xf32>
    %151 = vector.shape_cast %150 : vector<1x32x32xf32> to vector<32x32xf32>
    %cst_159 = arith.constant dense<0.000000e+00> : vector<4x32xf32>
    %152 = tpu.matmul %138, %151, %cst_159 {dimension_numbers = #tpu.dot_dimension_numbers<[1], [0], [0], [1], [0, 0, 1, 1], [], []>} : vector<4x32xf32>, vector<32x32xf32>, vector<4x32xf32> -> vector<4x32xf32>
    %153 = arith.addf %149, %152 : vector<4x32xf32>
    %c0_160 = arith.constant 0 : index
    %c0_161 = arith.constant 0 : index
    %154 = vector.load %arg9[%c0_160, %c0_161] : memref<1x32xf32, #tpu.memory_space<vmem>>, vector<1x32xf32>
    %155 = vector.broadcast %154 : vector<1x32xf32> to vector<4x32xf32>
    %156 = arith.addf %153, %155 : vector<4x32xf32>
    %cst_162 = arith.constant 0.000000e+00 : f32
    %157 = vector.broadcast %cst_162 : f32 to vector<4x32xf32>
    %158 = arith.cmpf oge, %156, %157 : vector<4x32xf32>
    %cst_163 = arith.constant 0.00999999977 : f32
    %159 = vector.broadcast %cst_163 : f32 to vector<4x32xf32>
    %160 = arith.mulf %159, %156 : vector<4x32xf32>
    %161 = arith.select %158, %156, %160 : vector<4x32xi1>, vector<4x32xf32>
    %cst_164 = arith.constant 0.000000e+00 : f32
    %162 = vector.broadcast %cst_164 : f32 to vector<11x64xf32>
    %c0_165 = arith.constant 0 : index
    %c0_166 = arith.constant 0 : index
    %163 = vector.load %arg24[%c0_165, %c0_166] : memref<11x64xf32, #tpu.memory_space<vmem>>, vector<11x64xf32>
    tpu.vector_store %arg24[%c0_165, %c0_166], %162 {strides = array<i32>} : memref<11x64xf32, #tpu.memory_space<vmem>>, vector<11x64xf32>,
    %c1_167 = arith.constant 1 : index
    %c0_168 = arith.constant 0 : index
    %164 = vector.load %arg24[%c1_167, %c0_168] : memref<11x64xf32, #tpu.memory_space<vmem>>, vector<4x32xf32>
    tpu.vector_store %arg24[%c1_167, %c0_168], %161 {strides = array<i32>} : memref<11x64xf32, #tpu.memory_space<vmem>>, vector<4x32xf32>,
    %c0_169 = arith.constant 0 : index
    %c0_170 = arith.constant 0 : index
    %165 = vector.load %arg24[%c0_169, %c0_170] : memref<11x64xf32, #tpu.memory_space<vmem>>, vector<4x32xf32>
    %c1_171 = arith.constant 1 : index
    %c0_172 = arith.constant 0 : index
    %166 = vector.load %arg24[%c1_171, %c0_172] : memref<11x64xf32, #tpu.memory_space<vmem>>, vector<4x32xf32>
    %c2_173 = arith.constant 2 : index
    %c0_174 = arith.constant 0 : index
    %167 = vector.load %arg24[%c2_173, %c0_174] : memref<11x64xf32, #tpu.memory_space<vmem>>, vector<4x32xf32>
    %c3_175 = arith.constant 3 : index
    %c0_176 = arith.constant 0 : index
    %168 = vector.load %arg24[%c3_175, %c0_176] : memref<11x64xf32, #tpu.memory_space<vmem>>, vector<4x32xf32>
    %c0_177 = arith.constant 0 : index
    %c0_178 = arith.constant 0 : index
    %c0_179 = arith.constant 0 : index
    %169 = vector.load %arg10[%c0_177, %c0_178, %c0_179] : memref<4x32x16xf32, #tpu.memory_space<vmem>>, vector<1x32x16xf32>
    %170 = vector.shape_cast %169 : vector<1x32x16xf32> to vector<32x16xf32>
    %cst_180 = arith.constant dense<0.000000e+00> : vector<4x16xf32>
    %171 = tpu.matmul %165, %170, %cst_180 {dimension_numbers = #tpu.dot_dimension_numbers<[1], [0], [0], [1], [0, 0, 1, 1], [], []>} : vector<4x32xf32>, vector<32x16xf32>, vector<4x16xf32> -> vector<4x16xf32>
    %c1_181 = arith.constant 1 : index
    %c0_182 = arith.constant 0 : index
    %c0_183 = arith.constant 0 : index
    %172 = vector.load %arg10[%c1_181, %c0_182, %c0_183] : memref<4x32x16xf32, #tpu.memory_space<vmem>>, vector<1x32x16xf32>
    %173 = vector.shape_cast %172 : vector<1x32x16xf32> to vector<32x16xf32>
    %cst_184 = arith.constant dense<0.000000e+00> : vector<4x16xf32>
    %174 = tpu.matmul %166, %173, %cst_184 {dimension_numbers = #tpu.dot_dimension_numbers<[1], [0], [0], [1], [0, 0, 1, 1], [], []>} : vector<4x32xf32>, vector<32x16xf32>, vector<4x16xf32> -> vector<4x16xf32>
    %175 = arith.addf %171, %174 : vector<4x16xf32>
    %c2_185 = arith.constant 2 : index
    %c0_186 = arith.constant 0 : index
    %c0_187 = arith.constant 0 : index
    %176 = vector.load %arg10[%c2_185, %c0_186, %c0_187] : memref<4x32x16xf32, #tpu.memory_space<vmem>>, vector<1x32x16xf32>
    %177 = vector.shape_cast %176 : vector<1x32x16xf32> to vector<32x16xf32>
    %cst_188 = arith.constant dense<0.000000e+00> : vector<4x16xf32>
    %178 = tpu.matmul %167, %177, %cst_188 {dimension_numbers = #tpu.dot_dimension_numbers<[1], [0], [0], [1], [0, 0, 1, 1], [], []>} : vector<4x32xf32>, vector<32x16xf32>, vector<4x16xf32> -> vector<4x16xf32>
    %179 = arith.addf %175, %178 : vector<4x16xf32>
    %c3_189 = arith.constant 3 : index
    %c0_190 = arith.constant 0 : index
    %c0_191 = arith.constant 0 : index
    %180 = vector.load %arg10[%c3_189, %c0_190, %c0_191] : memref<4x32x16xf32, #tpu.memory_space<vmem>>, vector<1x32x16xf32>
    %181 = vector.shape_cast %180 : vector<1x32x16xf32> to vector<32x16xf32>
    %cst_192 = arith.constant dense<0.000000e+00> : vector<4x16xf32>
    %182 = tpu.matmul %168, %181, %cst_192 {dimension_numbers = #tpu.dot_dimension_numbers<[1], [0], [0], [1], [0, 0, 1, 1], [], []>} : vector<4x32xf32>, vector<32x16xf32>, vector<4x16xf32> -> vector<4x16xf32>
    %183 = arith.addf %179, %182 : vector<4x16xf32>
    %c0_193 = arith.constant 0 : index
    %c0_194 = arith.constant 0 : index
    %c0_195 = arith.constant 0 : index
    %184 = vector.load %arg11[%c0_193, %c0_194, %c0_195] : memref<4x32x16xf32, #tpu.memory_space<vmem>>, vector<1x32x16xf32>
    %185 = vector.shape_cast %184 : vector<1x32x16xf32> to vector<32x16xf32>
    %cst_196 = arith.constant dense<0.000000e+00> : vector<4x16xf32>
    %186 = tpu.matmul %165, %185, %cst_196 {dimension_numbers = #tpu.dot_dimension_numbers<[1], [0], [0], [1], [0, 0, 1, 1], [], []>} : vector<4x32xf32>, vector<32x16xf32>, vector<4x16xf32> -> vector<4x16xf32>
    %c1_197 = arith.constant 1 : index
    %c0_198 = arith.constant 0 : index
    %c0_199 = arith.constant 0 : index
    %187 = vector.load %arg11[%c1_197, %c0_198, %c0_199] : memref<4x32x16xf32, #tpu.memory_space<vmem>>, vector<1x32x16xf32>
    %188 = vector.shape_cast %187 : vector<1x32x16xf32> to vector<32x16xf32>
    %cst_200 = arith.constant dense<0.000000e+00> : vector<4x16xf32>
    %189 = tpu.matmul %166, %188, %cst_200 {dimension_numbers = #tpu.dot_dimension_numbers<[1], [0], [0], [1], [0, 0, 1, 1], [], []>} : vector<4x32xf32>, vector<32x16xf32>, vector<4x16xf32> -> vector<4x16xf32>
    %190 = arith.addf %186, %189 : vector<4x16xf32>
    %c2_201 = arith.constant 2 : index
    %c0_202 = arith.constant 0 : index
    %c0_203 = arith.constant 0 : index
    %191 = vector.load %arg11[%c2_201, %c0_202, %c0_203] : memref<4x32x16xf32, #tpu.memory_space<vmem>>, vector<1x32x16xf32>
    %192 = vector.shape_cast %191 : vector<1x32x16xf32> to vector<32x16xf32>
    %cst_204 = arith.constant dense<0.000000e+00> : vector<4x16xf32>
    %193 = tpu.matmul %167, %192, %cst_204 {dimension_numbers = #tpu.dot_dimension_numbers<[1], [0], [0], [1], [0, 0, 1, 1], [], []>} : vector<4x32xf32>, vector<32x16xf32>, vector<4x16xf32> -> vector<4x16xf32>
    %194 = arith.addf %190, %193 : vector<4x16xf32>
    %c3_205 = arith.constant 3 : index
    %c0_206 = arith.constant 0 : index
    %c0_207 = arith.constant 0 : index
    %195 = vector.load %arg11[%c3_205, %c0_206, %c0_207] : memref<4x32x16xf32, #tpu.memory_space<vmem>>, vector<1x32x16xf32>
    %196 = vector.shape_cast %195 : vector<1x32x16xf32> to vector<32x16xf32>
    %cst_208 = arith.constant dense<0.000000e+00> : vector<4x16xf32>
    %197 = tpu.matmul %168, %196, %cst_208 {dimension_numbers = #tpu.dot_dimension_numbers<[1], [0], [0], [1], [0, 0, 1, 1], [], []>} : vector<4x32xf32>, vector<32x16xf32>, vector<4x16xf32> -> vector<4x16xf32>
    %198 = arith.addf %194, %197 : vector<4x16xf32>
    %199 = arith.maximumf %183, %198 : vector<4x16xf32>
    %c0_209 = arith.constant 0 : index
    %c0_210 = arith.constant 0 : index
    %200 = vector.load %arg25[%c0_209, %c0_210] : memref<8x32xf32, #tpu.memory_space<vmem>>, vector<4x16xf32>
    tpu.vector_store %arg25[%c0_209, %c0_210], %199 {strides = array<i32>} : memref<8x32xf32, #tpu.memory_space<vmem>>, vector<4x16xf32>,
    %c0_211 = arith.constant 0 : index
    %c0_212 = arith.constant 0 : index
    %201 = vector.load %arg12[%c0_211, %c0_212] : memref<32x16xf32, #tpu.memory_space<vmem>>, vector<32x16xf32>
    %cst_213 = arith.constant dense<0.000000e+00> : vector<4x16xf32>
    %202 = tpu.matmul %131, %201, %cst_213 {dimension_numbers = #tpu.dot_dimension_numbers<[1], [0], [0], [1], [0, 0, 1, 1], [], []>} : vector<4x32xf32>, vector<32x16xf32>, vector<4x16xf32> -> vector<4x16xf32>
    %c0_214 = arith.constant 0 : index
    %c0_215 = arith.constant 0 : index
    %203 = vector.load %arg26[%c0_214, %c0_215] : memref<8x32xf32, #tpu.memory_space<vmem>>, vector<4x16xf32>
    tpu.vector_store %arg26[%c0_214, %c0_215], %202 {strides = array<i32>} : memref<8x32xf32, #tpu.memory_space<vmem>>, vector<4x16xf32>,
    %c0_216 = arith.constant 0 : index
    %c0_217 = arith.constant 0 : index
    %204 = vector.load %arg13[%c0_216, %c0_217] : memref<1x16xf32, #tpu.memory_space<vmem>>, vector<1x16xf32>
    %c0_218 = arith.constant 0 : index
    %c0_219 = arith.constant 0 : index
    %205 = vector.load %arg25[%c0_218, %c0_219] : memref<8x32xf32, #tpu.memory_space<vmem>>, vector<1x16xf32>
    %c1_220 = arith.constant 1 : index
    %c0_221 = arith.constant 0 : index
    %206 = vector.load %arg25[%c1_220, %c0_221] : memref<8x32xf32, #tpu.memory_space<vmem>>, vector<1x16xf32>
    %207 = arith.maximumf %205, %206 : vector<1x16xf32>
    %c0_222 = arith.constant 0 : index
    %c0_223 = arith.constant 0 : index
    %208 = vector.load %arg26[%c0_222, %c0_223] : memref<8x32xf32, #tpu.memory_space<vmem>>, vector<1x16xf32>
    %209 = arith.addf %207, %208 : vector<1x16xf32>
    %c1_224 = arith.constant 1 : index
    %c0_225 = arith.constant 0 : index
    %210 = vector.load %arg26[%c1_224, %c0_225] : memref<8x32xf32, #tpu.memory_space<vmem>>, vector<1x16xf32>
    %211 = arith.addf %209, %210 : vector<1x16xf32>
    %212 = arith.addf %211, %204 : vector<1x16xf32>
    %cst_226 = arith.constant 0.000000e+00 : f32
    %213 = vector.broadcast %cst_226 : f32 to vector<1x16xf32>
    %214 = arith.cmpf oge, %212, %213 : vector<1x16xf32>
    %cst_227 = arith.constant 0.00999999977 : f32
    %215 = vector.broadcast %cst_227 : f32 to vector<1x16xf32>
    %216 = arith.mulf %215, %212 : vector<1x16xf32>
    %217 = arith.select %214, %212, %216 : vector<1x16xi1>, vector<1x16xf32>
    %c0_228 = arith.constant 0 : index
    %c0_229 = arith.constant 0 : index
    %218 = vector.load %arg27[%c0_228, %c0_229] : memref<4x32xf32, #tpu.memory_space<vmem>>, vector<1x16xf32>
    tpu.vector_store %arg27[%c0_228, %c0_229], %217 {strides = array<i32>} : memref<4x32xf32, #tpu.memory_space<vmem>>, vector<1x16xf32>,
    %c2_230 = arith.constant 2 : index
    %c0_231 = arith.constant 0 : index
    %219 = vector.load %arg25[%c2_230, %c0_231] : memref<8x32xf32, #tpu.memory_space<vmem>>, vector<1x16xf32>
    %c3_232 = arith.constant 3 : index
    %c0_233 = arith.constant 0 : index
    %220 = vector.load %arg25[%c3_232, %c0_233] : memref<8x32xf32, #tpu.memory_space<vmem>>, vector<1x16xf32>
    %221 = arith.maximumf %219, %220 : vector<1x16xf32>
    %c2_234 = arith.constant 2 : index
    %c0_235 = arith.constant 0 : index
    %222 = vector.load %arg26[%c2_234, %c0_235] : memref<8x32xf32, #tpu.memory_space<vmem>>, vector<1x16xf32>
    %223 = arith.addf %221, %222 : vector<1x16xf32>
    %c3_236 = arith.constant 3 : index
    %c0_237 = arith.constant 0 : index
    %224 = vector.load %arg26[%c3_236, %c0_237] : memref<8x32xf32, #tpu.memory_space<vmem>>, vector<1x16xf32>
    %225 = arith.addf %223, %224 : vector<1x16xf32>
    %226 = arith.addf %225, %204 : vector<1x16xf32>
    %cst_238 = arith.constant 0.000000e+00 : f32
    %227 = vector.broadcast %cst_238 : f32 to vector<1x16xf32>
    %228 = arith.cmpf oge, %226, %227 : vector<1x16xf32>
    %cst_239 = arith.constant 0.00999999977 : f32
    %229 = vector.broadcast %cst_239 : f32 to vector<1x16xf32>
    %230 = arith.mulf %229, %226 : vector<1x16xf32>
    %231 = arith.select %228, %226, %230 : vector<1x16xi1>, vector<1x16xf32>
    %c1_240 = arith.constant 1 : index
    %c0_241 = arith.constant 0 : index
    %232 = vector.load %arg27[%c1_240, %c0_241] : memref<4x32xf32, #tpu.memory_space<vmem>>, vector<1x16xf32>
    tpu.vector_store %arg27[%c1_240, %c0_241], %231 {strides = array<i32>} : memref<4x32xf32, #tpu.memory_space<vmem>>, vector<1x16xf32>,
    %c0_242 = arith.constant 0 : index
    %c0_243 = arith.constant 0 : index
    %233 = vector.load %arg15[%c0_242, %c0_243] : memref<1x128xf32, #tpu.memory_space<vmem>>, vector<1x128xf32>
    %c0_244 = arith.constant 0 : index
    %c0_245 = arith.constant 0 : index
    %234 = vector.load %arg27[%c0_244, %c0_245] : memref<4x32xf32, #tpu.memory_space<vmem>>, vector<1x16xf32>
    %c0_246 = arith.constant 0 : index
    %c0_247 = arith.constant 0 : index
    %235 = vector.load %arg14[%c0_246, %c0_247] : memref<32x128xf32, #tpu.memory_space<vmem>>, vector<16x128xf32>
    %cst_248 = arith.constant dense<0.000000e+00> : vector<1x128xf32>
    %236 = tpu.matmul %234, %235, %cst_248 {dimension_numbers = #tpu.dot_dimension_numbers<[1], [0], [0], [1], [0, 0, 1, 1], [], []>} : vector<1x16xf32>, vector<16x128xf32>, vector<1x128xf32> -> vector<1x128xf32>
    %237 = arith.addf %233, %236 : vector<1x128xf32>
    %c1_249 = arith.constant 1 : index
    %c0_250 = arith.constant 0 : index
    %238 = vector.load %arg27[%c1_249, %c0_250] : memref<4x32xf32, #tpu.memory_space<vmem>>, vector<1x16xf32>
    %c16 = arith.constant 16 : index
    %c0_251 = arith.constant 0 : index
    %239 = vector.load %arg14[%c16, %c0_251] : memref<32x128xf32, #tpu.memory_space<vmem>>, vector<16x128xf32>
    %cst_252 = arith.constant dense<0.000000e+00> : vector<1x128xf32>
    %240 = tpu.matmul %238, %239, %cst_252 {dimension_numbers = #tpu.dot_dimension_numbers<[1], [0], [0], [1], [0, 0, 1, 1], [], []>} : vector<1x16xf32>, vector<16x128xf32>, vector<1x128xf32> -> vector<1x128xf32>
    %241 = arith.addf %237, %240 : vector<1x128xf32>
    %c0_253 = arith.constant 0 : index
    %c0_254 = arith.constant 0 : index
    %242 = vector.load %arg29[%c0_253, %c0_254] : memref<2x128xf32, #tpu.memory_space<vmem>>, vector<1x128xf32>
    tpu.vector_store %arg29[%c0_253, %c0_254], %241 {strides = array<i32>} : memref<2x128xf32, #tpu.memory_space<vmem>>, vector<1x128xf32>,
    %c1_255 = arith.constant 1 : index
    %c0_256 = arith.constant 0 : index
    %c0_257 = arith.constant 0 : index
    %243 = vector.load %arg1[%c1_255, %c0_256, %c0_257] : memref<2x8x8xf32, #tpu.memory_space<vmem>>, vector<1x8x8xf32>
    %244 = vector.shape_cast %243 : vector<1x8x8xf32> to vector<8x8xf32>
    %cst_258 = arith.constant 0.000000e+00 : f32
    %245 = vector.broadcast %cst_258 : f32 to vector<11x64xf32>
    %c0_259 = arith.constant 0 : index
    %c0_260 = arith.constant 0 : index
    %246 = vector.load %arg24[%c0_259, %c0_260] : memref<11x64xf32, #tpu.memory_space<vmem>>, vector<11x64xf32>
    tpu.vector_store %arg24[%c0_259, %c0_260], %245 {strides = array<i32>} : memref<11x64xf32, #tpu.memory_space<vmem>>, vector<11x64xf32>,
    %c1_261 = arith.constant 1 : index
    %c0_262 = arith.constant 0 : index
    %247 = vector.load %arg24[%c1_261, %c0_262] : memref<11x64xf32, #tpu.memory_space<vmem>>, vector<8x8xf32>
    tpu.vector_store %arg24[%c1_261, %c0_262], %244 {strides = array<i32>} : memref<11x64xf32, #tpu.memory_space<vmem>>, vector<8x8xf32>,
    %c0_263 = arith.constant 0 : index
    %c0_264 = arith.constant 0 : index
    %248 = vector.load %arg24[%c0_263, %c0_264] : memref<11x64xf32, #tpu.memory_space<vmem>>, vector<8x8xf32>
    %c1_265 = arith.constant 1 : index
    %c0_266 = arith.constant 0 : index
    %249 = vector.load %arg24[%c1_265, %c0_266] : memref<11x64xf32, #tpu.memory_space<vmem>>, vector<8x8xf32>
    %c2_267 = arith.constant 2 : index
    %c0_268 = arith.constant 0 : index
    %250 = vector.load %arg24[%c2_267, %c0_268] : memref<11x64xf32, #tpu.memory_space<vmem>>, vector<8x8xf32>
    %c3_269 = arith.constant 3 : index
    %c0_270 = arith.constant 0 : index
    %251 = vector.load %arg24[%c3_269, %c0_270] : memref<11x64xf32, #tpu.memory_space<vmem>>, vector<8x8xf32>
    %c0_271 = arith.constant 0 : index
    %c0_272 = arith.constant 0 : index
    %c0_273 = arith.constant 0 : index
    %252 = vector.load %arg2[%c0_271, %c0_272, %c0_273] : memref<4x8x64xf32, #tpu.memory_space<vmem>>, vector<1x8x64xf32>
    %253 = vector.shape_cast %252 : vector<1x8x64xf32> to vector<8x64xf32>
    %cst_274 = arith.constant dense<0.000000e+00> : vector<8x64xf32>
    %254 = tpu.matmul %248, %253, %cst_274 {dimension_numbers = #tpu.dot_dimension_numbers<[1], [0], [0], [1], [0, 0, 1, 1], [], []>} : vector<8x8xf32>, vector<8x64xf32>, vector<8x64xf32> -> vector<8x64xf32>
    %c1_275 = arith.constant 1 : index
    %c0_276 = arith.constant 0 : index
    %c0_277 = arith.constant 0 : index
    %255 = vector.load %arg2[%c1_275, %c0_276, %c0_277] : memref<4x8x64xf32, #tpu.memory_space<vmem>>, vector<1x8x64xf32>
    %256 = vector.shape_cast %255 : vector<1x8x64xf32> to vector<8x64xf32>
    %cst_278 = arith.constant dense<0.000000e+00> : vector<8x64xf32>
    %257 = tpu.matmul %249, %256, %cst_278 {dimension_numbers = #tpu.dot_dimension_numbers<[1], [0], [0], [1], [0, 0, 1, 1], [], []>} : vector<8x8xf32>, vector<8x64xf32>, vector<8x64xf32> -> vector<8x64xf32>
    %258 = arith.addf %254, %257 : vector<8x64xf32>
    %c2_279 = arith.constant 2 : index
    %c0_280 = arith.constant 0 : index
    %c0_281 = arith.constant 0 : index
    %259 = vector.load %arg2[%c2_279, %c0_280, %c0_281] : memref<4x8x64xf32, #tpu.memory_space<vmem>>, vector<1x8x64xf32>
    %260 = vector.shape_cast %259 : vector<1x8x64xf32> to vector<8x64xf32>
    %cst_282 = arith.constant dense<0.000000e+00> : vector<8x64xf32>
    %261 = tpu.matmul %250, %260, %cst_282 {dimension_numbers = #tpu.dot_dimension_numbers<[1], [0], [0], [1], [0, 0, 1, 1], [], []>} : vector<8x8xf32>, vector<8x64xf32>, vector<8x64xf32> -> vector<8x64xf32>
    %262 = arith.addf %258, %261 : vector<8x64xf32>
    %c3_283 = arith.constant 3 : index
    %c0_284 = arith.constant 0 : index
    %c0_285 = arith.constant 0 : index
    %263 = vector.load %arg2[%c3_283, %c0_284, %c0_285] : memref<4x8x64xf32, #tpu.memory_space<vmem>>, vector<1x8x64xf32>
    %264 = vector.shape_cast %263 : vector<1x8x64xf32> to vector<8x64xf32>
    %cst_286 = arith.constant dense<0.000000e+00> : vector<8x64xf32>
    %265 = tpu.matmul %251, %264, %cst_286 {dimension_numbers = #tpu.dot_dimension_numbers<[1], [0], [0], [1], [0, 0, 1, 1], [], []>} : vector<8x8xf32>, vector<8x64xf32>, vector<8x64xf32> -> vector<8x64xf32>
    %266 = arith.addf %262, %265 : vector<8x64xf32>
    %c0_287 = arith.constant 0 : index
    %c0_288 = arith.constant 0 : index
    %267 = vector.load %arg3[%c0_287, %c0_288] : memref<1x64xf32, #tpu.memory_space<vmem>>, vector<1x64xf32>
    %268 = vector.broadcast %267 : vector<1x64xf32> to vector<8x64xf32>
    %269 = arith.addf %266, %268 : vector<8x64xf32>
    %cst_289 = arith.constant 0.000000e+00 : f32
    %270 = vector.broadcast %cst_289 : f32 to vector<8x64xf32>
    %271 = arith.cmpf oge, %269, %270 : vector<8x64xf32>
    %cst_290 = arith.constant 0.00999999977 : f32
    %272 = vector.broadcast %cst_290 : f32 to vector<8x64xf32>
    %273 = arith.mulf %272, %269 : vector<8x64xf32>
    %274 = arith.select %271, %269, %273 : vector<8x64xi1>, vector<8x64xf32>
    %cst_291 = arith.constant 0.000000e+00 : f32
    %275 = vector.broadcast %cst_291 : f32 to vector<11x64xf32>
    %c0_292 = arith.constant 0 : index
    %c0_293 = arith.constant 0 : index
    %276 = vector.load %arg24[%c0_292, %c0_293] : memref<11x64xf32, #tpu.memory_space<vmem>>, vector<11x64xf32>
    tpu.vector_store %arg24[%c0_292, %c0_293], %275 {strides = array<i32>} : memref<11x64xf32, #tpu.memory_space<vmem>>, vector<11x64xf32>,
    %c1_294 = arith.constant 1 : index
    %c0_295 = arith.constant 0 : index
    %277 = vector.load %arg24[%c1_294, %c0_295] : memref<11x64xf32, #tpu.memory_space<vmem>>, vector<8x64xf32>
    tpu.vector_store %arg24[%c1_294, %c0_295], %274 {strides = array<i32>} : memref<11x64xf32, #tpu.memory_space<vmem>>, vector<8x64xf32>,
    %c0_296 = arith.constant 0 : index
    %c0_297 = arith.constant 0 : index
    %278 = vector.load %arg24[%c0_296, %c0_297] : memref<11x64xf32, #tpu.memory_space<vmem>>, vector<8x64xf32>
    %c1_298 = arith.constant 1 : index
    %c0_299 = arith.constant 0 : index
    %279 = vector.load %arg24[%c1_298, %c0_299] : memref<11x64xf32, #tpu.memory_space<vmem>>, vector<8x64xf32>
    %c2_300 = arith.constant 2 : index
    %c0_301 = arith.constant 0 : index
    %280 = vector.load %arg24[%c2_300, %c0_301] : memref<11x64xf32, #tpu.memory_space<vmem>>, vector<8x64xf32>
    %c3_302 = arith.constant 3 : index
    %c0_303 = arith.constant 0 : index
    %281 = vector.load %arg24[%c3_302, %c0_303] : memref<11x64xf32, #tpu.memory_space<vmem>>, vector<8x64xf32>
    %c0_304 = arith.constant 0 : index
    %c0_305 = arith.constant 0 : index
    %c0_306 = arith.constant 0 : index
    %282 = vector.load %arg4[%c0_304, %c0_305, %c0_306] : memref<4x64x32xf32, #tpu.memory_space<vmem>>, vector<1x64x32xf32>
    %283 = vector.shape_cast %282 : vector<1x64x32xf32> to vector<64x32xf32>
    %cst_307 = arith.constant dense<0.000000e+00> : vector<8x32xf32>
    %284 = tpu.matmul %278, %283, %cst_307 {dimension_numbers = #tpu.dot_dimension_numbers<[1], [0], [0], [1], [0, 0, 1, 1], [], []>} : vector<8x64xf32>, vector<64x32xf32>, vector<8x32xf32> -> vector<8x32xf32>
    %c1_308 = arith.constant 1 : index
    %c0_309 = arith.constant 0 : index
    %c0_310 = arith.constant 0 : index
    %285 = vector.load %arg4[%c1_308, %c0_309, %c0_310] : memref<4x64x32xf32, #tpu.memory_space<vmem>>, vector<1x64x32xf32>
    %286 = vector.shape_cast %285 : vector<1x64x32xf32> to vector<64x32xf32>
    %cst_311 = arith.constant dense<0.000000e+00> : vector<8x32xf32>
    %287 = tpu.matmul %279, %286, %cst_311 {dimension_numbers = #tpu.dot_dimension_numbers<[1], [0], [0], [1], [0, 0, 1, 1], [], []>} : vector<8x64xf32>, vector<64x32xf32>, vector<8x32xf32> -> vector<8x32xf32>
    %288 = arith.addf %284, %287 : vector<8x32xf32>
    %c2_312 = arith.constant 2 : index
    %c0_313 = arith.constant 0 : index
    %c0_314 = arith.constant 0 : index
    %289 = vector.load %arg4[%c2_312, %c0_313, %c0_314] : memref<4x64x32xf32, #tpu.memory_space<vmem>>, vector<1x64x32xf32>
    %290 = vector.shape_cast %289 : vector<1x64x32xf32> to vector<64x32xf32>
    %cst_315 = arith.constant dense<0.000000e+00> : vector<8x32xf32>
    %291 = tpu.matmul %280, %290, %cst_315 {dimension_numbers = #tpu.dot_dimension_numbers<[1], [0], [0], [1], [0, 0, 1, 1], [], []>} : vector<8x64xf32>, vector<64x32xf32>, vector<8x32xf32> -> vector<8x32xf32>
    %292 = arith.addf %288, %291 : vector<8x32xf32>
    %c3_316 = arith.constant 3 : index
    %c0_317 = arith.constant 0 : index
    %c0_318 = arith.constant 0 : index
    %293 = vector.load %arg4[%c3_316, %c0_317, %c0_318] : memref<4x64x32xf32, #tpu.memory_space<vmem>>, vector<1x64x32xf32>
    %294 = vector.shape_cast %293 : vector<1x64x32xf32> to vector<64x32xf32>
    %cst_319 = arith.constant dense<0.000000e+00> : vector<8x32xf32>
    %295 = tpu.matmul %281, %294, %cst_319 {dimension_numbers = #tpu.dot_dimension_numbers<[1], [0], [0], [1], [0, 0, 1, 1], [], []>} : vector<8x64xf32>, vector<64x32xf32>, vector<8x32xf32> -> vector<8x32xf32>
    %296 = arith.addf %292, %295 : vector<8x32xf32>
    %c0_320 = arith.constant 0 : index
    %c0_321 = arith.constant 0 : index
    %c0_322 = arith.constant 0 : index
    %297 = vector.load %arg5[%c0_320, %c0_321, %c0_322] : memref<4x64x32xf32, #tpu.memory_space<vmem>>, vector<1x64x32xf32>
    %298 = vector.shape_cast %297 : vector<1x64x32xf32> to vector<64x32xf32>
    %cst_323 = arith.constant dense<0.000000e+00> : vector<8x32xf32>
    %299 = tpu.matmul %278, %298, %cst_323 {dimension_numbers = #tpu.dot_dimension_numbers<[1], [0], [0], [1], [0, 0, 1, 1], [], []>} : vector<8x64xf32>, vector<64x32xf32>, vector<8x32xf32> -> vector<8x32xf32>
    %c1_324 = arith.constant 1 : index
    %c0_325 = arith.constant 0 : index
    %c0_326 = arith.constant 0 : index
    %300 = vector.load %arg5[%c1_324, %c0_325, %c0_326] : memref<4x64x32xf32, #tpu.memory_space<vmem>>, vector<1x64x32xf32>
    %301 = vector.shape_cast %300 : vector<1x64x32xf32> to vector<64x32xf32>
    %cst_327 = arith.constant dense<0.000000e+00> : vector<8x32xf32>
    %302 = tpu.matmul %279, %301, %cst_327 {dimension_numbers = #tpu.dot_dimension_numbers<[1], [0], [0], [1], [0, 0, 1, 1], [], []>} : vector<8x64xf32>, vector<64x32xf32>, vector<8x32xf32> -> vector<8x32xf32>
    %303 = arith.addf %299, %302 : vector<8x32xf32>
    %c2_328 = arith.constant 2 : index
    %c0_329 = arith.constant 0 : index
    %c0_330 = arith.constant 0 : index
    %304 = vector.load %arg5[%c2_328, %c0_329, %c0_330] : memref<4x64x32xf32, #tpu.memory_space<vmem>>, vector<1x64x32xf32>
    %305 = vector.shape_cast %304 : vector<1x64x32xf32> to vector<64x32xf32>
    %cst_331 = arith.constant dense<0.000000e+00> : vector<8x32xf32>
    %306 = tpu.matmul %280, %305, %cst_331 {dimension_numbers = #tpu.dot_dimension_numbers<[1], [0], [0], [1], [0, 0, 1, 1], [], []>} : vector<8x64xf32>, vector<64x32xf32>, vector<8x32xf32> -> vector<8x32xf32>
    %307 = arith.addf %303, %306 : vector<8x32xf32>
    %c3_332 = arith.constant 3 : index
    %c0_333 = arith.constant 0 : index
    %c0_334 = arith.constant 0 : index
    %308 = vector.load %arg5[%c3_332, %c0_333, %c0_334] : memref<4x64x32xf32, #tpu.memory_space<vmem>>, vector<1x64x32xf32>
    %309 = vector.shape_cast %308 : vector<1x64x32xf32> to vector<64x32xf32>
    %cst_335 = arith.constant dense<0.000000e+00> : vector<8x32xf32>
    %310 = tpu.matmul %281, %309, %cst_335 {dimension_numbers = #tpu.dot_dimension_numbers<[1], [0], [0], [1], [0, 0, 1, 1], [], []>} : vector<8x64xf32>, vector<64x32xf32>, vector<8x32xf32> -> vector<8x32xf32>
    %311 = arith.addf %307, %310 : vector<8x32xf32>
    %312 = arith.maximumf %296, %311 : vector<8x32xf32>
    %c0_336 = arith.constant 0 : index
    %c0_337 = arith.constant 0 : index
    %313 = vector.load %arg25[%c0_336, %c0_337] : memref<8x32xf32, #tpu.memory_space<vmem>>, vector<8x32xf32>
    tpu.vector_store %arg25[%c0_336, %c0_337], %312 {strides = array<i32>} : memref<8x32xf32, #tpu.memory_space<vmem>>, vector<8x32xf32>,
    %c0_338 = arith.constant 0 : index
    %c0_339 = arith.constant 0 : index
    %314 = vector.load %arg6[%c0_338, %c0_339] : memref<8x32xf32, #tpu.memory_space<vmem>>, vector<8x32xf32>
    %cst_340 = arith.constant dense<0.000000e+00> : vector<8x32xf32>
    %315 = tpu.matmul %244, %314, %cst_340 {dimension_numbers = #tpu.dot_dimension_numbers<[1], [0], [0], [1], [0, 0, 1, 1], [], []>} : vector<8x8xf32>, vector<8x32xf32>, vector<8x32xf32> -> vector<8x32xf32>
    %c0_341 = arith.constant 0 : index
    %c0_342 = arith.constant 0 : index
    %316 = vector.load %arg26[%c0_341, %c0_342] : memref<8x32xf32, #tpu.memory_space<vmem>>, vector<8x32xf32>
    tpu.vector_store %arg26[%c0_341, %c0_342], %315 {strides = array<i32>} : memref<8x32xf32, #tpu.memory_space<vmem>>, vector<8x32xf32>,
    %c0_343 = arith.constant 0 : index
    %c0_344 = arith.constant 0 : index
    %317 = vector.load %arg7[%c0_343, %c0_344] : memref<1x32xf32, #tpu.memory_space<vmem>>, vector<1x32xf32>
    %c0_345 = arith.constant 0 : index
    %c0_346 = arith.constant 0 : index
    %318 = vector.load %arg25[%c0_345, %c0_346] : memref<8x32xf32, #tpu.memory_space<vmem>>, vector<1x32xf32>
    %c1_347 = arith.constant 1 : index
    %c0_348 = arith.constant 0 : index
    %319 = vector.load %arg25[%c1_347, %c0_348] : memref<8x32xf32, #tpu.memory_space<vmem>>, vector<1x32xf32>
    %320 = arith.maximumf %318, %319 : vector<1x32xf32>
    %c0_349 = arith.constant 0 : index
    %c0_350 = arith.constant 0 : index
    %321 = vector.load %arg26[%c0_349, %c0_350] : memref<8x32xf32, #tpu.memory_space<vmem>>, vector<1x32xf32>
    %322 = arith.addf %320, %321 : vector<1x32xf32>
    %c1_351 = arith.constant 1 : index
    %c0_352 = arith.constant 0 : index
    %323 = vector.load %arg26[%c1_351, %c0_352] : memref<8x32xf32, #tpu.memory_space<vmem>>, vector<1x32xf32>
    %324 = arith.addf %322, %323 : vector<1x32xf32>
    %325 = arith.addf %324, %317 : vector<1x32xf32>
    %cst_353 = arith.constant 0.000000e+00 : f32
    %326 = vector.broadcast %cst_353 : f32 to vector<1x32xf32>
    %327 = arith.cmpf oge, %325, %326 : vector<1x32xf32>
    %cst_354 = arith.constant 0.00999999977 : f32
    %328 = vector.broadcast %cst_354 : f32 to vector<1x32xf32>
    %329 = arith.mulf %328, %325 : vector<1x32xf32>
    %330 = arith.select %327, %325, %329 : vector<1x32xi1>, vector<1x32xf32>
    %c0_355 = arith.constant 0 : index
    %c0_356 = arith.constant 0 : index
    %331 = vector.load %arg27[%c0_355, %c0_356] : memref<4x32xf32, #tpu.memory_space<vmem>>, vector<1x32xf32>
    tpu.vector_store %arg27[%c0_355, %c0_356], %330 {strides = array<i32>} : memref<4x32xf32, #tpu.memory_space<vmem>>, vector<1x32xf32>,
    %c2_357 = arith.constant 2 : index
    %c0_358 = arith.constant 0 : index
    %332 = vector.load %arg25[%c2_357, %c0_358] : memref<8x32xf32, #tpu.memory_space<vmem>>, vector<1x32xf32>
    %c3_359 = arith.constant 3 : index
    %c0_360 = arith.constant 0 : index
    %333 = vector.load %arg25[%c3_359, %c0_360] : memref<8x32xf32, #tpu.memory_space<vmem>>, vector<1x32xf32>
    %334 = arith.maximumf %332, %333 : vector<1x32xf32>
    %c2_361 = arith.constant 2 : index
    %c0_362 = arith.constant 0 : index
    %335 = vector.load %arg26[%c2_361, %c0_362] : memref<8x32xf32, #tpu.memory_space<vmem>>, vector<1x32xf32>
    %336 = arith.addf %334, %335 : vector<1x32xf32>
    %c3_363 = arith.constant 3 : index
    %c0_364 = arith.constant 0 : index
    %337 = vector.load %arg26[%c3_363, %c0_364] : memref<8x32xf32, #tpu.memory_space<vmem>>, vector<1x32xf32>
    %338 = arith.addf %336, %337 : vector<1x32xf32>
    %339 = arith.addf %338, %317 : vector<1x32xf32>
    %cst_365 = arith.constant 0.000000e+00 : f32
    %340 = vector.broadcast %cst_365 : f32 to vector<1x32xf32>
    %341 = arith.cmpf oge, %339, %340 : vector<1x32xf32>
    %cst_366 = arith.constant 0.00999999977 : f32
    %342 = vector.broadcast %cst_366 : f32 to vector<1x32xf32>
    %343 = arith.mulf %342, %339 : vector<1x32xf32>
    %344 = arith.select %341, %339, %343 : vector<1x32xi1>, vector<1x32xf32>
    %c1_367 = arith.constant 1 : index
    %c0_368 = arith.constant 0 : index
    %345 = vector.load %arg27[%c1_367, %c0_368] : memref<4x32xf32, #tpu.memory_space<vmem>>, vector<1x32xf32>
    tpu.vector_store %arg27[%c1_367, %c0_368], %344 {strides = array<i32>} : memref<4x32xf32, #tpu.memory_space<vmem>>, vector<1x32xf32>,
    %c4_369 = arith.constant 4 : index
    %c0_370 = arith.constant 0 : index
    %346 = vector.load %arg25[%c4_369, %c0_370] : memref<8x32xf32, #tpu.memory_space<vmem>>, vector<1x32xf32>
    %c5_371 = arith.constant 5 : index
    %c0_372 = arith.constant 0 : index
    %347 = vector.load %arg25[%c5_371, %c0_372] : memref<8x32xf32, #tpu.memory_space<vmem>>, vector<1x32xf32>
    %348 = arith.maximumf %346, %347 : vector<1x32xf32>
    %c4_373 = arith.constant 4 : index
    %c0_374 = arith.constant 0 : index
    %349 = vector.load %arg26[%c4_373, %c0_374] : memref<8x32xf32, #tpu.memory_space<vmem>>, vector<1x32xf32>
    %350 = arith.addf %348, %349 : vector<1x32xf32>
    %c5_375 = arith.constant 5 : index
    %c0_376 = arith.constant 0 : index
    %351 = vector.load %arg26[%c5_375, %c0_376] : memref<8x32xf32, #tpu.memory_space<vmem>>, vector<1x32xf32>
    %352 = arith.addf %350, %351 : vector<1x32xf32>
    %353 = arith.addf %352, %317 : vector<1x32xf32>
    %cst_377 = arith.constant 0.000000e+00 : f32
    %354 = vector.broadcast %cst_377 : f32 to vector<1x32xf32>
    %355 = arith.cmpf oge, %353, %354 : vector<1x32xf32>
    %cst_378 = arith.constant 0.00999999977 : f32
    %356 = vector.broadcast %cst_378 : f32 to vector<1x32xf32>
    %357 = arith.mulf %356, %353 : vector<1x32xf32>
    %358 = arith.select %355, %353, %357 : vector<1x32xi1>, vector<1x32xf32>
    %c2_379 = arith.constant 2 : index
    %c0_380 = arith.constant 0 : index
    %359 = vector.load %arg27[%c2_379, %c0_380] : memref<4x32xf32, #tpu.memory_space<vmem>>, vector<1x32xf32>
    tpu.vector_store %arg27[%c2_379, %c0_380], %358 {strides = array<i32>} : memref<4x32xf32, #tpu.memory_space<vmem>>, vector<1x32xf32>,
    %c6_381 = arith.constant 6 : index
    %c0_382 = arith.constant 0 : index
    %360 = vector.load %arg25[%c6_381, %c0_382] : memref<8x32xf32, #tpu.memory_space<vmem>>, vector<1x32xf32>
    %c7_383 = arith.constant 7 : index
    %c0_384 = arith.constant 0 : index
    %361 = vector.load %arg25[%c7_383, %c0_384] : memref<8x32xf32, #tpu.memory_space<vmem>>, vector<1x32xf32>
    %362 = arith.maximumf %360, %361 : vector<1x32xf32>
    %c6_385 = arith.constant 6 : index
    %c0_386 = arith.constant 0 : index
    %363 = vector.load %arg26[%c6_385, %c0_386] : memref<8x32xf32, #tpu.memory_space<vmem>>, vector<1x32xf32>
    %364 = arith.addf %362, %363 : vector<1x32xf32>
    %c7_387 = arith.constant 7 : index
    %c0_388 = arith.constant 0 : index
    %365 = vector.load %arg26[%c7_387, %c0_388] : memref<8x32xf32, #tpu.memory_space<vmem>>, vector<1x32xf32>
    %366 = arith.addf %364, %365 : vector<1x32xf32>
    %367 = arith.addf %366, %317 : vector<1x32xf32>
    %cst_389 = arith.constant 0.000000e+00 : f32
    %368 = vector.broadcast %cst_389 : f32 to vector<1x32xf32>
    %369 = arith.cmpf oge, %367, %368 : vector<1x32xf32>
    %cst_390 = arith.constant 0.00999999977 : f32
    %370 = vector.broadcast %cst_390 : f32 to vector<1x32xf32>
    %371 = arith.mulf %370, %367 : vector<1x32xf32>
    %372 = arith.select %369, %367, %371 : vector<1x32xi1>, vector<1x32xf32>
    %c3_391 = arith.constant 3 : index
    %c0_392 = arith.constant 0 : index
    %373 = vector.load %arg27[%c3_391, %c0_392] : memref<4x32xf32, #tpu.memory_space<vmem>>, vector<1x32xf32>
    tpu.vector_store %arg27[%c3_391, %c0_392], %372 {strides = array<i32>} : memref<4x32xf32, #tpu.memory_space<vmem>>, vector<1x32xf32>,
    %c0_393 = arith.constant 0 : index
    %c0_394 = arith.constant 0 : index
    %374 = vector.load %arg27[%c0_393, %c0_394] : memref<4x32xf32, #tpu.memory_space<vmem>>, vector<4x32xf32>
    %cst_395 = arith.constant 0.000000e+00 : f32
    %375 = vector.broadcast %cst_395 : f32 to vector<11x64xf32>
    %c0_396 = arith.constant 0 : index
    %c0_397 = arith.constant 0 : index
    %376 = vector.load %arg24[%c0_396, %c0_397] : memref<11x64xf32, #tpu.memory_space<vmem>>, vector<11x64xf32>
    tpu.vector_store %arg24[%c0_396, %c0_397], %375 {strides = array<i32>} : memref<11x64xf32, #tpu.memory_space<vmem>>, vector<11x64xf32>,
    %c1_398 = arith.constant 1 : index
    %c0_399 = arith.constant 0 : index
    %377 = vector.load %arg24[%c1_398, %c0_399] : memref<11x64xf32, #tpu.memory_space<vmem>>, vector<4x32xf32>
    tpu.vector_store %arg24[%c1_398, %c0_399], %374 {strides = array<i32>} : memref<11x64xf32, #tpu.memory_space<vmem>>, vector<4x32xf32>,
    %c0_400 = arith.constant 0 : index
    %c0_401 = arith.constant 0 : index
    %378 = vector.load %arg24[%c0_400, %c0_401] : memref<11x64xf32, #tpu.memory_space<vmem>>, vector<4x32xf32>
    %c1_402 = arith.constant 1 : index
    %c0_403 = arith.constant 0 : index
    %379 = vector.load %arg24[%c1_402, %c0_403] : memref<11x64xf32, #tpu.memory_space<vmem>>, vector<4x32xf32>
    %c2_404 = arith.constant 2 : index
    %c0_405 = arith.constant 0 : index
    %380 = vector.load %arg24[%c2_404, %c0_405] : memref<11x64xf32, #tpu.memory_space<vmem>>, vector<4x32xf32>
    %c3_406 = arith.constant 3 : index
    %c0_407 = arith.constant 0 : index
    %381 = vector.load %arg24[%c3_406, %c0_407] : memref<11x64xf32, #tpu.memory_space<vmem>>, vector<4x32xf32>
    %c0_408 = arith.constant 0 : index
    %c0_409 = arith.constant 0 : index
    %c0_410 = arith.constant 0 : index
    %382 = vector.load %arg8[%c0_408, %c0_409, %c0_410] : memref<4x32x32xf32, #tpu.memory_space<vmem>>, vector<1x32x32xf32>
    %383 = vector.shape_cast %382 : vector<1x32x32xf32> to vector<32x32xf32>
    %cst_411 = arith.constant dense<0.000000e+00> : vector<4x32xf32>
    %384 = tpu.matmul %378, %383, %cst_411 {dimension_numbers = #tpu.dot_dimension_numbers<[1], [0], [0], [1], [0, 0, 1, 1], [], []>} : vector<4x32xf32>, vector<32x32xf32>, vector<4x32xf32> -> vector<4x32xf32>
    %c1_412 = arith.constant 1 : index
    %c0_413 = arith.constant 0 : index
    %c0_414 = arith.constant 0 : index
    %385 = vector.load %arg8[%c1_412, %c0_413, %c0_414] : memref<4x32x32xf32, #tpu.memory_space<vmem>>, vector<1x32x32xf32>
    %386 = vector.shape_cast %385 : vector<1x32x32xf32> to vector<32x32xf32>
    %cst_415 = arith.constant dense<0.000000e+00> : vector<4x32xf32>
    %387 = tpu.matmul %379, %386, %cst_415 {dimension_numbers = #tpu.dot_dimension_numbers<[1], [0], [0], [1], [0, 0, 1, 1], [], []>} : vector<4x32xf32>, vector<32x32xf32>, vector<4x32xf32> -> vector<4x32xf32>
    %388 = arith.addf %384, %387 : vector<4x32xf32>
    %c2_416 = arith.constant 2 : index
    %c0_417 = arith.constant 0 : index
    %c0_418 = arith.constant 0 : index
    %389 = vector.load %arg8[%c2_416, %c0_417, %c0_418] : memref<4x32x32xf32, #tpu.memory_space<vmem>>, vector<1x32x32xf32>
    %390 = vector.shape_cast %389 : vector<1x32x32xf32> to vector<32x32xf32>
    %cst_419 = arith.constant dense<0.000000e+00> : vector<4x32xf32>
    %391 = tpu.matmul %380, %390, %cst_419 {dimension_numbers = #tpu.dot_dimension_numbers<[1], [0], [0], [1], [0, 0, 1, 1], [], []>} : vector<4x32xf32>, vector<32x32xf32>, vector<4x32xf32> -> vector<4x32xf32>
    %392 = arith.addf %388, %391 : vector<4x32xf32>
    %c3_420 = arith.constant 3 : index
    %c0_421 = arith.constant 0 : index
    %c0_422 = arith.constant 0 : index
    %393 = vector.load %arg8[%c3_420, %c0_421, %c0_422] : memref<4x32x32xf32, #tpu.memory_space<vmem>>, vector<1x32x32xf32>
    %394 = vector.shape_cast %393 : vector<1x32x32xf32> to vector<32x32xf32>
    %cst_423 = arith.constant dense<0.000000e+00> : vector<4x32xf32>
    %395 = tpu.matmul %381, %394, %cst_423 {dimension_numbers = #tpu.dot_dimension_numbers<[1], [0], [0], [1], [0, 0, 1, 1], [], []>} : vector<4x32xf32>, vector<32x32xf32>, vector<4x32xf32> -> vector<4x32xf32>
    %396 = arith.addf %392, %395 : vector<4x32xf32>
    %c0_424 = arith.constant 0 : index
    %c0_425 = arith.constant 0 : index
    %397 = vector.load %arg9[%c0_424, %c0_425] : memref<1x32xf32, #tpu.memory_space<vmem>>, vector<1x32xf32>
    %398 = vector.broadcast %397 : vector<1x32xf32> to vector<4x32xf32>
    %399 = arith.addf %396, %398 : vector<4x32xf32>
    %cst_426 = arith.constant 0.000000e+00 : f32
    %400 = vector.broadcast %cst_426 : f32 to vector<4x32xf32>
    %401 = arith.cmpf oge, %399, %400 : vector<4x32xf32>
    %cst_427 = arith.constant 0.00999999977 : f32
    %402 = vector.broadcast %cst_427 : f32 to vector<4x32xf32>
    %403 = arith.mulf %402, %399 : vector<4x32xf32>
    %404 = arith.select %401, %399, %403 : vector<4x32xi1>, vector<4x32xf32>
    %cst_428 = arith.constant 0.000000e+00 : f32
    %405 = vector.broadcast %cst_428 : f32 to vector<11x64xf32>
    %c0_429 = arith.constant 0 : index
    %c0_430 = arith.constant 0 : index
    %406 = vector.load %arg24[%c0_429, %c0_430] : memref<11x64xf32, #tpu.memory_space<vmem>>, vector<11x64xf32>
    tpu.vector_store %arg24[%c0_429, %c0_430], %405 {strides = array<i32>} : memref<11x64xf32, #tpu.memory_space<vmem>>, vector<11x64xf32>,
    %c1_431 = arith.constant 1 : index
    %c0_432 = arith.constant 0 : index
    %407 = vector.load %arg24[%c1_431, %c0_432] : memref<11x64xf32, #tpu.memory_space<vmem>>, vector<4x32xf32>
    tpu.vector_store %arg24[%c1_431, %c0_432], %404 {strides = array<i32>} : memref<11x64xf32, #tpu.memory_space<vmem>>, vector<4x32xf32>,
    %c0_433 = arith.constant 0 : index
    %c0_434 = arith.constant 0 : index
    %408 = vector.load %arg24[%c0_433, %c0_434] : memref<11x64xf32, #tpu.memory_space<vmem>>, vector<4x32xf32>
    %c1_435 = arith.constant 1 : index
    %c0_436 = arith.constant 0 : index
    %409 = vector.load %arg24[%c1_435, %c0_436] : memref<11x64xf32, #tpu.memory_space<vmem>>, vector<4x32xf32>
    %c2_437 = arith.constant 2 : index
    %c0_438 = arith.constant 0 : index
    %410 = vector.load %arg24[%c2_437, %c0_438] : memref<11x64xf32, #tpu.memory_space<vmem>>, vector<4x32xf32>
    %c3_439 = arith.constant 3 : index
    %c0_440 = arith.constant 0 : index
    %411 = vector.load %arg24[%c3_439, %c0_440] : memref<11x64xf32, #tpu.memory_space<vmem>>, vector<4x32xf32>
    %c0_441 = arith.constant 0 : index
    %c0_442 = arith.constant 0 : index
    %c0_443 = arith.constant 0 : index
    %412 = vector.load %arg10[%c0_441, %c0_442, %c0_443] : memref<4x32x16xf32, #tpu.memory_space<vmem>>, vector<1x32x16xf32>
    %413 = vector.shape_cast %412 : vector<1x32x16xf32> to vector<32x16xf32>
    %cst_444 = arith.constant dense<0.000000e+00> : vector<4x16xf32>
    %414 = tpu.matmul %408, %413, %cst_444 {dimension_numbers = #tpu.dot_dimension_numbers<[1], [0], [0], [1], [0, 0, 1, 1], [], []>} : vector<4x32xf32>, vector<32x16xf32>, vector<4x16xf32> -> vector<4x16xf32>
    %c1_445 = arith.constant 1 : index
    %c0_446 = arith.constant 0 : index
    %c0_447 = arith.constant 0 : index
    %415 = vector.load %arg10[%c1_445, %c0_446, %c0_447] : memref<4x32x16xf32, #tpu.memory_space<vmem>>, vector<1x32x16xf32>
    %416 = vector.shape_cast %415 : vector<1x32x16xf32> to vector<32x16xf32>
    %cst_448 = arith.constant dense<0.000000e+00> : vector<4x16xf32>
    %417 = tpu.matmul %409, %416, %cst_448 {dimension_numbers = #tpu.dot_dimension_numbers<[1], [0], [0], [1], [0, 0, 1, 1], [], []>} : vector<4x32xf32>, vector<32x16xf32>, vector<4x16xf32> -> vector<4x16xf32>
    %418 = arith.addf %414, %417 : vector<4x16xf32>
    %c2_449 = arith.constant 2 : index
    %c0_450 = arith.constant 0 : index
    %c0_451 = arith.constant 0 : index
    %419 = vector.load %arg10[%c2_449, %c0_450, %c0_451] : memref<4x32x16xf32, #tpu.memory_space<vmem>>, vector<1x32x16xf32>
    %420 = vector.shape_cast %419 : vector<1x32x16xf32> to vector<32x16xf32>
    %cst_452 = arith.constant dense<0.000000e+00> : vector<4x16xf32>
    %421 = tpu.matmul %410, %420, %cst_452 {dimension_numbers = #tpu.dot_dimension_numbers<[1], [0], [0], [1], [0, 0, 1, 1], [], []>} : vector<4x32xf32>, vector<32x16xf32>, vector<4x16xf32> -> vector<4x16xf32>
    %422 = arith.addf %418, %421 : vector<4x16xf32>
    %c3_453 = arith.constant 3 : index
    %c0_454 = arith.constant 0 : index
    %c0_455 = arith.constant 0 : index
    %423 = vector.load %arg10[%c3_453, %c0_454, %c0_455] : memref<4x32x16xf32, #tpu.memory_space<vmem>>, vector<1x32x16xf32>
    %424 = vector.shape_cast %423 : vector<1x32x16xf32> to vector<32x16xf32>
    %cst_456 = arith.constant dense<0.000000e+00> : vector<4x16xf32>
    %425 = tpu.matmul %411, %424, %cst_456 {dimension_numbers = #tpu.dot_dimension_numbers<[1], [0], [0], [1], [0, 0, 1, 1], [], []>} : vector<4x32xf32>, vector<32x16xf32>, vector<4x16xf32> -> vector<4x16xf32>
    %426 = arith.addf %422, %425 : vector<4x16xf32>
    %c0_457 = arith.constant 0 : index
    %c0_458 = arith.constant 0 : index
    %c0_459 = arith.constant 0 : index
    %427 = vector.load %arg11[%c0_457, %c0_458, %c0_459] : memref<4x32x16xf32, #tpu.memory_space<vmem>>, vector<1x32x16xf32>
    %428 = vector.shape_cast %427 : vector<1x32x16xf32> to vector<32x16xf32>
    %cst_460 = arith.constant dense<0.000000e+00> : vector<4x16xf32>
    %429 = tpu.matmul %408, %428, %cst_460 {dimension_numbers = #tpu.dot_dimension_numbers<[1], [0], [0], [1], [0, 0, 1, 1], [], []>} : vector<4x32xf32>, vector<32x16xf32>, vector<4x16xf32> -> vector<4x16xf32>
    %c1_461 = arith.constant 1 : index
    %c0_462 = arith.constant 0 : index
    %c0_463 = arith.constant 0 : index
    %430 = vector.load %arg11[%c1_461, %c0_462, %c0_463] : memref<4x32x16xf32, #tpu.memory_space<vmem>>, vector<1x32x16xf32>
    %431 = vector.shape_cast %430 : vector<1x32x16xf32> to vector<32x16xf32>
    %cst_464 = arith.constant dense<0.000000e+00> : vector<4x16xf32>
    %432 = tpu.matmul %409, %431, %cst_464 {dimension_numbers = #tpu.dot_dimension_numbers<[1], [0], [0], [1], [0, 0, 1, 1], [], []>} : vector<4x32xf32>, vector<32x16xf32>, vector<4x16xf32> -> vector<4x16xf32>
    %433 = arith.addf %429, %432 : vector<4x16xf32>
    %c2_465 = arith.constant 2 : index
    %c0_466 = arith.constant 0 : index
    %c0_467 = arith.constant 0 : index
    %434 = vector.load %arg11[%c2_465, %c0_466, %c0_467] : memref<4x32x16xf32, #tpu.memory_space<vmem>>, vector<1x32x16xf32>
    %435 = vector.shape_cast %434 : vector<1x32x16xf32> to vector<32x16xf32>
    %cst_468 = arith.constant dense<0.000000e+00> : vector<4x16xf32>
    %436 = tpu.matmul %410, %435, %cst_468 {dimension_numbers = #tpu.dot_dimension_numbers<[1], [0], [0], [1], [0, 0, 1, 1], [], []>} : vector<4x32xf32>, vector<32x16xf32>, vector<4x16xf32> -> vector<4x16xf32>
    %437 = arith.addf %433, %436 : vector<4x16xf32>
    %c3_469 = arith.constant 3 : index
    %c0_470 = arith.constant 0 : index
    %c0_471 = arith.constant 0 : index
    %438 = vector.load %arg11[%c3_469, %c0_470, %c0_471] : memref<4x32x16xf32, #tpu.memory_space<vmem>>, vector<1x32x16xf32>
    %439 = vector.shape_cast %438 : vector<1x32x16xf32> to vector<32x16xf32>
    %cst_472 = arith.constant dense<0.000000e+00> : vector<4x16xf32>
    %440 = tpu.matmul %411, %439, %cst_472 {dimension_numbers = #tpu.dot_dimension_numbers<[1], [0], [0], [1], [0, 0, 1, 1], [], []>} : vector<4x32xf32>, vector<32x16xf32>, vector<4x16xf32> -> vector<4x16xf32>
    %441 = arith.addf %437, %440 : vector<4x16xf32>
    %442 = arith.maximumf %426, %441 : vector<4x16xf32>
    %c0_473 = arith.constant 0 : index
    %c0_474 = arith.constant 0 : index
    %443 = vector.load %arg25[%c0_473, %c0_474] : memref<8x32xf32, #tpu.memory_space<vmem>>, vector<4x16xf32>
    tpu.vector_store %arg25[%c0_473, %c0_474], %442 {strides = array<i32>} : memref<8x32xf32, #tpu.memory_space<vmem>>, vector<4x16xf32>,
    %c0_475 = arith.constant 0 : index
    %c0_476 = arith.constant 0 : index
    %444 = vector.load %arg12[%c0_475, %c0_476] : memref<32x16xf32, #tpu.memory_space<vmem>>, vector<32x16xf32>
    %cst_477 = arith.constant dense<0.000000e+00> : vector<4x16xf32>
    %445 = tpu.matmul %374, %444, %cst_477 {dimension_numbers = #tpu.dot_dimension_numbers<[1], [0], [0], [1], [0, 0, 1, 1], [], []>} : vector<4x32xf32>, vector<32x16xf32>, vector<4x16xf32> -> vector<4x16xf32>
    %c0_478 = arith.constant 0 : index
    %c0_479 = arith.constant 0 : index
    %446 = vector.load %arg26[%c0_478, %c0_479] : memref<8x32xf32, #tpu.memory_space<vmem>>, vector<4x16xf32>
    tpu.vector_store %arg26[%c0_478, %c0_479], %445 {strides = array<i32>} : memref<8x32xf32, #tpu.memory_space<vmem>>, vector<4x16xf32>,
    %c0_480 = arith.constant 0 : index
    %c0_481 = arith.constant 0 : index
    %447 = vector.load %arg13[%c0_480, %c0_481] : memref<1x16xf32, #tpu.memory_space<vmem>>, vector<1x16xf32>
    %c0_482 = arith.constant 0 : index
    %c0_483 = arith.constant 0 : index
    %448 = vector.load %arg25[%c0_482, %c0_483] : memref<8x32xf32, #tpu.memory_space<vmem>>, vector<1x16xf32>
    %c1_484 = arith.constant 1 : index
    %c0_485 = arith.constant 0 : index
    %449 = vector.load %arg25[%c1_484, %c0_485] : memref<8x32xf32, #tpu.memory_space<vmem>>, vector<1x16xf32>
    %450 = arith.maximumf %448, %449 : vector<1x16xf32>
    %c0_486 = arith.constant 0 : index
    %c0_487 = arith.constant 0 : index
    %451 = vector.load %arg26[%c0_486, %c0_487] : memref<8x32xf32, #tpu.memory_space<vmem>>, vector<1x16xf32>
    %452 = arith.addf %450, %451 : vector<1x16xf32>
    %c1_488 = arith.constant 1 : index
    %c0_489 = arith.constant 0 : index
    %453 = vector.load %arg26[%c1_488, %c0_489] : memref<8x32xf32, #tpu.memory_space<vmem>>, vector<1x16xf32>
    %454 = arith.addf %452, %453 : vector<1x16xf32>
    %455 = arith.addf %454, %447 : vector<1x16xf32>
    %cst_490 = arith.constant 0.000000e+00 : f32
    %456 = vector.broadcast %cst_490 : f32 to vector<1x16xf32>
    %457 = arith.cmpf oge, %455, %456 : vector<1x16xf32>
    %cst_491 = arith.constant 0.00999999977 : f32
    %458 = vector.broadcast %cst_491 : f32 to vector<1x16xf32>
    %459 = arith.mulf %458, %455 : vector<1x16xf32>
    %460 = arith.select %457, %455, %459 : vector<1x16xi1>, vector<1x16xf32>
    %c0_492 = arith.constant 0 : index
    %c0_493 = arith.constant 0 : index
    %461 = vector.load %arg27[%c0_492, %c0_493] : memref<4x32xf32, #tpu.memory_space<vmem>>, vector<1x16xf32>
    tpu.vector_store %arg27[%c0_492, %c0_493], %460 {strides = array<i32>} : memref<4x32xf32, #tpu.memory_space<vmem>>, vector<1x16xf32>,
    %c2_494 = arith.constant 2 : index
    %c0_495 = arith.constant 0 : index
    %462 = vector.load %arg25[%c2_494, %c0_495] : memref<8x32xf32, #tpu.memory_space<vmem>>, vector<1x16xf32>
    %c3_496 = arith.constant 3 : index
    %c0_497 = arith.constant 0 : index
    %463 = vector.load %arg25[%c3_496, %c0_497] : memref<8x32xf32, #tpu.memory_space<vmem>>, vector<1x16xf32>
    %464 = arith.maximumf %462, %463 : vector<1x16xf32>
    %c2_498 = arith.constant 2 : index
    %c0_499 = arith.constant 0 : index
    %465 = vector.load %arg26[%c2_498, %c0_499] : memref<8x32xf32, #tpu.memory_space<vmem>>, vector<1x16xf32>
    %466 = arith.addf %464, %465 : vector<1x16xf32>
    %c3_500 = arith.constant 3 : index
    %c0_501 = arith.constant 0 : index
    %467 = vector.load %arg26[%c3_500, %c0_501] : memref<8x32xf32, #tpu.memory_space<vmem>>, vector<1x16xf32>
    %468 = arith.addf %466, %467 : vector<1x16xf32>
    %469 = arith.addf %468, %447 : vector<1x16xf32>
    %cst_502 = arith.constant 0.000000e+00 : f32
    %470 = vector.broadcast %cst_502 : f32 to vector<1x16xf32>
    %471 = arith.cmpf oge, %469, %470 : vector<1x16xf32>
    %cst_503 = arith.constant 0.00999999977 : f32
    %472 = vector.broadcast %cst_503 : f32 to vector<1x16xf32>
    %473 = arith.mulf %472, %469 : vector<1x16xf32>
    %474 = arith.select %471, %469, %473 : vector<1x16xi1>, vector<1x16xf32>
    %c1_504 = arith.constant 1 : index
    %c0_505 = arith.constant 0 : index
    %475 = vector.load %arg27[%c1_504, %c0_505] : memref<4x32xf32, #tpu.memory_space<vmem>>, vector<1x16xf32>
    tpu.vector_store %arg27[%c1_504, %c0_505], %474 {strides = array<i32>} : memref<4x32xf32, #tpu.memory_space<vmem>>, vector<1x16xf32>,
    %c0_506 = arith.constant 0 : index
    %c0_507 = arith.constant 0 : index
    %476 = vector.load %arg15[%c0_506, %c0_507] : memref<1x128xf32, #tpu.memory_space<vmem>>, vector<1x128xf32>
    %c0_508 = arith.constant 0 : index
    %c0_509 = arith.constant 0 : index
    %477 = vector.load %arg27[%c0_508, %c0_509] : memref<4x32xf32, #tpu.memory_space<vmem>>, vector<1x16xf32>
    %c0_510 = arith.constant 0 : index
    %c0_511 = arith.constant 0 : index
    %478 = vector.load %arg14[%c0_510, %c0_511] : memref<32x128xf32, #tpu.memory_space<vmem>>, vector<16x128xf32>
    %cst_512 = arith.constant dense<0.000000e+00> : vector<1x128xf32>
    %479 = tpu.matmul %477, %478, %cst_512 {dimension_numbers = #tpu.dot_dimension_numbers<[1], [0], [0], [1], [0, 0, 1, 1], [], []>} : vector<1x16xf32>, vector<16x128xf32>, vector<1x128xf32> -> vector<1x128xf32>
    %480 = arith.addf %476, %479 : vector<1x128xf32>
    %c1_513 = arith.constant 1 : index
    %c0_514 = arith.constant 0 : index
    %481 = vector.load %arg27[%c1_513, %c0_514] : memref<4x32xf32, #tpu.memory_space<vmem>>, vector<1x16xf32>
    %c16_515 = arith.constant 16 : index
    %c0_516 = arith.constant 0 : index
    %482 = vector.load %arg14[%c16_515, %c0_516] : memref<32x128xf32, #tpu.memory_space<vmem>>, vector<16x128xf32>
    %cst_517 = arith.constant dense<0.000000e+00> : vector<1x128xf32>
    %483 = tpu.matmul %481, %482, %cst_517 {dimension_numbers = #tpu.dot_dimension_numbers<[1], [0], [0], [1], [0, 0, 1, 1], [], []>} : vector<1x16xf32>, vector<16x128xf32>, vector<1x128xf32> -> vector<1x128xf32>
    %484 = arith.addf %480, %483 : vector<1x128xf32>
    %c1_518 = arith.constant 1 : index
    %c0_519 = arith.constant 0 : index
    %485 = vector.load %arg29[%c1_518, %c0_519] : memref<2x128xf32, #tpu.memory_space<vmem>>, vector<1x128xf32>
    tpu.vector_store %arg29[%c1_518, %c0_519], %484 {strides = array<i32>} : memref<2x128xf32, #tpu.memory_space<vmem>>, vector<1x128xf32>,
    %c0_520 = arith.constant 0 : index
    %c0_521 = arith.constant 0 : index
    %486 = vector.load %arg29[%c0_520, %c0_521] : memref<2x128xf32, #tpu.memory_space<vmem>>, vector<2x128xf32>
    %c0_522 = arith.constant 0 : index
    %c0_523 = arith.constant 0 : index
    %487 = vector.load %arg16[%c0_522, %c0_523] : memref<128x512xf32, #tpu.memory_space<vmem>>, vector<128x512xf32>
    %cst_524 = arith.constant dense<0.000000e+00> : vector<2x512xf32>
    %488 = tpu.matmul %486, %487, %cst_524 {dimension_numbers = #tpu.dot_dimension_numbers<[1], [0], [0], [1], [0, 0, 1, 1], [], []>} : vector<2x128xf32>, vector<128x512xf32>, vector<2x512xf32> -> vector<2x512xf32>
    %c0_525 = arith.constant 0 : index
    %c0_526 = arith.constant 0 : index
    %489 = vector.load %arg18[%c0_525, %c0_526] : memref<1x512xf32, #tpu.memory_space<vmem>>, vector<1x512xf32>
    %490 = vector.broadcast %489 : vector<1x512xf32> to vector<2x512xf32>
    %491 = arith.addf %488, %490 : vector<2x512xf32>
    %c0_527 = arith.constant 0 : index
    %c0_528 = arith.constant 0 : index
    %492 = vector.load %arg28[%c0_527, %c0_528] : memref<2x512xf32, #tpu.memory_space<vmem>>, vector<2x512xf32>
    tpu.vector_store %arg28[%c0_527, %c0_528], %491 {strides = array<i32>} : memref<2x512xf32, #tpu.memory_space<vmem>>, vector<2x512xf32>,
    %cst_529 = arith.constant 0.000000e+00 : f32
    %493 = vector.broadcast %cst_529 : f32 to vector<1x128xf32>
    %cst_530 = arith.constant 0.000000e+00 : f32
    %494 = vector.broadcast %cst_530 : f32 to vector<1x128xf32>
    %c0_531 = arith.constant 0 : index
    %c0_532 = arith.constant 0 : index
    %495 = vector.load %arg28[%c0_531, %c0_532] : memref<2x512xf32, #tpu.memory_space<vmem>>, vector<1x512xf32>
    %c0_533 = arith.constant 0 : index
    %c0_534 = arith.constant 0 : index
    %496 = vector.load %arg17[%c0_533, %c0_534] : memref<128x512xf32, #tpu.memory_space<vmem>>, vector<128x512xf32>
    %cst_535 = arith.constant dense<0.000000e+00> : vector<1x512xf32>
    %497 = tpu.matmul %493, %496, %cst_535 {dimension_numbers = #tpu.dot_dimension_numbers<[1], [0], [0], [1], [0, 0, 1, 1], [], []>} : vector<1x128xf32>, vector<128x512xf32>, vector<1x512xf32> -> vector<1x512xf32>
    %498 = arith.addf %495, %497 : vector<1x512xf32>
    %499 = vector.extract_strided_slice %498 {offsets = [0, 0], sizes = [1, 128], strides = [1, 1]} : vector<1x512xf32> to vector<1x128xf32>
    %500 = arith.negf %499 : vector<1x128xf32>
    %501 = math.exp %500 : vector<1x128xf32>
    %cst_536 = arith.constant 1.000000e+00 : f32
    %502 = vector.broadcast %cst_536 : f32 to vector<1x128xf32>
    %503 = arith.addf %502, %501 : vector<1x128xf32>
    %504 = arith.divf %502, %503 : vector<1x128xf32>
    %505 = vector.extract_strided_slice %498 {offsets = [0, 128], sizes = [1, 128], strides = [1, 1]} : vector<1x512xf32> to vector<1x128xf32>
    %506 = arith.negf %505 : vector<1x128xf32>
    %507 = math.exp %506 : vector<1x128xf32>
    %cst_537 = arith.constant 1.000000e+00 : f32
    %508 = vector.broadcast %cst_537 : f32 to vector<1x128xf32>
    %509 = arith.addf %508, %507 : vector<1x128xf32>
    %510 = arith.divf %508, %509 : vector<1x128xf32>
    %511 = vector.extract_strided_slice %498 {offsets = [0, 256], sizes = [1, 128], strides = [1, 1]} : vector<1x512xf32> to vector<1x128xf32>
    %512 = math.tanh %511 : vector<1x128xf32>
    %513 = vector.extract_strided_slice %498 {offsets = [0, 384], sizes = [1, 128], strides = [1, 1]} : vector<1x512xf32> to vector<1x128xf32>
    %514 = arith.negf %513 : vector<1x128xf32>
    %515 = math.exp %514 : vector<1x128xf32>
    %cst_538 = arith.constant 1.000000e+00 : f32
    %516 = vector.broadcast %cst_538 : f32 to vector<1x128xf32>
    %517 = arith.addf %516, %515 : vector<1x128xf32>
    %518 = arith.divf %516, %517 : vector<1x128xf32>
    %519 = arith.mulf %510, %494 : vector<1x128xf32>
    %520 = arith.mulf %504, %512 : vector<1x128xf32>
    %521 = arith.addf %519, %520 : vector<1x128xf32>
    %522 = math.tanh %521 : vector<1x128xf32>
    %523 = arith.mulf %518, %522 : vector<1x128xf32>
    %c0_539 = arith.constant 0 : index
    %c0_540 = arith.constant 0 : index
    %524 = vector.load %arg29[%c0_539, %c0_540] : memref<2x128xf32, #tpu.memory_space<vmem>>, vector<1x128xf32>
    %525 = arith.addf %523, %524 : vector<1x128xf32>
    %c0_541 = arith.constant 0 : index
    %c0_542 = arith.constant 0 : index
    %526 = vector.load %arg30[%c0_541, %c0_542] : memref<2x128xf32, #tpu.memory_space<vmem>>, vector<1x128xf32>
    tpu.vector_store %arg30[%c0_541, %c0_542], %525 {strides = array<i32>} : memref<2x128xf32, #tpu.memory_space<vmem>>, vector<1x128xf32>,
    %c1_543 = arith.constant 1 : index
    %c0_544 = arith.constant 0 : index
    %527 = vector.load %arg28[%c1_543, %c0_544] : memref<2x512xf32, #tpu.memory_space<vmem>>, vector<1x512xf32>
    %c0_545 = arith.constant 0 : index
    %c0_546 = arith.constant 0 : index
    %528 = vector.load %arg17[%c0_545, %c0_546] : memref<128x512xf32, #tpu.memory_space<vmem>>, vector<128x512xf32>
    %cst_547 = arith.constant dense<0.000000e+00> : vector<1x512xf32>
    %529 = tpu.matmul %523, %528, %cst_547 {dimension_numbers = #tpu.dot_dimension_numbers<[1], [0], [0], [1], [0, 0, 1, 1], [], []>} : vector<1x128xf32>, vector<128x512xf32>, vector<1x512xf32> -> vector<1x512xf32>
    %530 = arith.addf %527, %529 : vector<1x512xf32>
    %531 = vector.extract_strided_slice %530 {offsets = [0, 0], sizes = [1, 128], strides = [1, 1]} : vector<1x512xf32> to vector<1x128xf32>
    %532 = arith.negf %531 : vector<1x128xf32>
    %533 = math.exp %532 : vector<1x128xf32>
    %cst_548 = arith.constant 1.000000e+00 : f32
    %534 = vector.broadcast %cst_548 : f32 to vector<1x128xf32>
    %535 = arith.addf %534, %533 : vector<1x128xf32>
    %536 = arith.divf %534, %535 : vector<1x128xf32>
    %537 = vector.extract_strided_slice %530 {offsets = [0, 128], sizes = [1, 128], strides = [1, 1]} : vector<1x512xf32> to vector<1x128xf32>
    %538 = arith.negf %537 : vector<1x128xf32>
    %539 = math.exp %538 : vector<1x128xf32>
    %cst_549 = arith.constant 1.000000e+00 : f32
    %540 = vector.broadcast %cst_549 : f32 to vector<1x128xf32>
    %541 = arith.addf %540, %539 : vector<1x128xf32>
    %542 = arith.divf %540, %541 : vector<1x128xf32>
    %543 = vector.extract_strided_slice %530 {offsets = [0, 256], sizes = [1, 128], strides = [1, 1]} : vector<1x512xf32> to vector<1x128xf32>
    %544 = math.tanh %543 : vector<1x128xf32>
    %545 = vector.extract_strided_slice %530 {offsets = [0, 384], sizes = [1, 128], strides = [1, 1]} : vector<1x512xf32> to vector<1x128xf32>
    %546 = arith.negf %545 : vector<1x128xf32>
    %547 = math.exp %546 : vector<1x128xf32>
    %cst_550 = arith.constant 1.000000e+00 : f32
    %548 = vector.broadcast %cst_550 : f32 to vector<1x128xf32>
    %549 = arith.addf %548, %547 : vector<1x128xf32>
    %550 = arith.divf %548, %549 : vector<1x128xf32>
    %551 = arith.mulf %542, %521 : vector<1x128xf32>
    %552 = arith.mulf %536, %544 : vector<1x128xf32>
    %553 = arith.addf %551, %552 : vector<1x128xf32>
    %554 = math.tanh %553 : vector<1x128xf32>
    %555 = arith.mulf %550, %554 : vector<1x128xf32>
    %c1_551 = arith.constant 1 : index
    %c0_552 = arith.constant 0 : index
    %556 = vector.load %arg29[%c1_551, %c0_552] : memref<2x128xf32, #tpu.memory_space<vmem>>, vector<1x128xf32>
    %557 = arith.addf %555, %556 : vector<1x128xf32>
    %c1_553 = arith.constant 1 : index
    %c0_554 = arith.constant 0 : index
    %558 = vector.load %arg30[%c1_553, %c0_554] : memref<2x128xf32, #tpu.memory_space<vmem>>, vector<1x128xf32>
    tpu.vector_store %arg30[%c1_553, %c0_554], %557 {strides = array<i32>} : memref<2x128xf32, #tpu.memory_space<vmem>>, vector<1x128xf32>,
    %c0_555 = arith.constant 0 : index
    %c0_556 = arith.constant 0 : index
    %559 = vector.load %arg30[%c0_555, %c0_556] : memref<2x128xf32, #tpu.memory_space<vmem>>, vector<2x128xf32>
    %c0_557 = arith.constant 0 : index
    %c0_558 = arith.constant 0 : index
    %560 = vector.load %arg19[%c0_557, %c0_558] : memref<128x64xf32, #tpu.memory_space<vmem>>, vector<128x64xf32>
    %cst_559 = arith.constant dense<0.000000e+00> : vector<2x64xf32>
    %561 = tpu.matmul %559, %560, %cst_559 {dimension_numbers = #tpu.dot_dimension_numbers<[1], [0], [0], [1], [0, 0, 1, 1], [], []>} : vector<2x128xf32>, vector<128x64xf32>, vector<2x64xf32> -> vector<2x64xf32>
    %c0_560 = arith.constant 0 : index
    %c0_561 = arith.constant 0 : index
    %562 = vector.load %arg20[%c0_560, %c0_561] : memref<1x64xf32, #tpu.memory_space<vmem>>, vector<1x64xf32>
    %563 = vector.broadcast %562 : vector<1x64xf32> to vector<2x64xf32>
    %564 = arith.addf %561, %563 : vector<2x64xf32>
    %cst_562 = arith.constant 0.000000e+00 : f32
    %565 = vector.broadcast %cst_562 : f32 to vector<2x64xf32>
    %566 = arith.maximumf %564, %565 : vector<2x64xf32>
    %c0_563 = arith.constant 0 : index
    %c0_564 = arith.constant 0 : index
    %567 = vector.load %arg21[%c0_563, %c0_564] : memref<64x3xf32, #tpu.memory_space<vmem>>, vector<64x3xf32>
    %cst_565 = arith.constant dense<0.000000e+00> : vector<2x3xf32>
    %568 = tpu.matmul %566, %567, %cst_565 {dimension_numbers = #tpu.dot_dimension_numbers<[1], [0], [0], [1], [0, 0, 1, 1], [], []>} : vector<2x64xf32>, vector<64x3xf32>, vector<2x3xf32> -> vector<2x3xf32>
    %c0_566 = arith.constant 0 : index
    %c0_567 = arith.constant 0 : index
    %569 = vector.load %arg22[%c0_566, %c0_567] : memref<1x3xf32, #tpu.memory_space<vmem>>, vector<1x3xf32>
    %570 = vector.broadcast %569 : vector<1x3xf32> to vector<2x3xf32>
    %571 = arith.addf %568, %570 : vector<2x3xf32>
    %c0_568 = arith.constant 0 : index
    %c0_569 = arith.constant 0 : index
    %572 = vector.load %arg23[%c0_568, %c0_569] : memref<2x3xf32, #tpu.memory_space<vmem>>, vector<2x3xf32>
    tpu.vector_store %arg23[%c0_568, %c0_569], %571 {strides = array<i32>} : memref<2x3xf32, #tpu.memory_space<vmem>>, vector<2x3xf32>,
    return
  }
  func.func @transform_0(%arg0: i32) -> (i32, i32, i32) {
    %c0_i32 = arith.constant 0 : i32
    %c0_i32_0 = arith.constant 0 : i32
    %c0_i32_1 = arith.constant 0 : i32
    %c0_i32_2 = arith.constant 0 : i32
    return %c0_i32, %c0_i32_0, %c0_i32_1 : i32, i32, i32
  }
  func.func @transform_1(%arg0: i32) -> (i32, i32, i32) {
    %c0_i32 = arith.constant 0 : i32
    %c0_i32_0 = arith.constant 0 : i32
    %c0_i32_1 = arith.constant 0 : i32
    %c0_i32_2 = arith.constant 0 : i32
    return %c0_i32, %c0_i32_0, %c0_i32_1 : i32, i32, i32
  }
  func.func @transform_2(%arg0: i32) -> (i32, i32) {
    %c0_i32 = arith.constant 0 : i32
    %c0_i32_0 = arith.constant 0 : i32
    %c0_i32_1 = arith.constant 0 : i32
    return %c0_i32, %c0_i32_0 : i32, i32
  }
  func.func @transform_3(%arg0: i32) -> (i32, i32, i32) {
    %c0_i32 = arith.constant 0 : i32
    %c0_i32_0 = arith.constant 0 : i32
    %c0_i32_1 = arith.constant 0 : i32
    %c0_i32_2 = arith.constant 0 : i32
    return %c0_i32, %c0_i32_0, %c0_i32_1 : i32, i32, i32
  }
  func.func @transform_4(%arg0: i32) -> (i32, i32, i32) {
    %c0_i32 = arith.constant 0 : i32
    %c0_i32_0 = arith.constant 0 : i32
    %c0_i32_1 = arith.constant 0 : i32
    %c0_i32_2 = arith.constant 0 : i32
    return %c0_i32, %c0_i32_0, %c0_i32_1 : i32, i32, i32
  }
  func.func @transform_5(%arg0: i32) -> (i32, i32) {
    %c0_i32 = arith.constant 0 : i32
    %c0_i32_0 = arith.constant 0 : i32
    %c0_i32_1 = arith.constant 0 : i32
    return %c0_i32, %c0_i32_0 : i32, i32
  }
  func.func @transform_6(%arg0: i32) -> (i32, i32) {
    %c0_i32 = arith.constant 0 : i32
    %c0_i32_0 = arith.constant 0 : i32
    %c0_i32_1 = arith.constant 0 : i32
    return %c0_i32, %c0_i32_0 : i32, i32
  }
  func.func @transform_7(%arg0: i32) -> (i32, i32, i32) {
    %c0_i32 = arith.constant 0 : i32
    %c0_i32_0 = arith.constant 0 : i32
    %c0_i32_1 = arith.constant 0 : i32
    %c0_i32_2 = arith.constant 0 : i32
    return %c0_i32, %c0_i32_0, %c0_i32_1 : i32, i32, i32
  }
  func.func @transform_8(%arg0: i32) -> (i32, i32) {
    %c0_i32 = arith.constant 0 : i32
    %c0_i32_0 = arith.constant 0 : i32
    %c0_i32_1 = arith.constant 0 : i32
    return %c0_i32, %c0_i32_0 : i32, i32
  }
  func.func @transform_9(%arg0: i32) -> (i32, i32, i32) {
    %c0_i32 = arith.constant 0 : i32
    %c0_i32_0 = arith.constant 0 : i32
    %c0_i32_1 = arith.constant 0 : i32
    %c0_i32_2 = arith.constant 0 : i32
    return %c0_i32, %c0_i32_0, %c0_i32_1 : i32, i32, i32
  }
  func.func @transform_10(%arg0: i32) -> (i32, i32, i32) {
    %c0_i32 = arith.constant 0 : i32
    %c0_i32_0 = arith.constant 0 : i32
    %c0_i32_1 = arith.constant 0 : i32
    %c0_i32_2 = arith.constant 0 : i32
    return %c0_i32, %c0_i32_0, %c0_i32_1 : i32, i32, i32
  }
  func.func @transform_11(%arg0: i32) -> (i32, i32) {
    %c0_i32 = arith.constant 0 : i32
    %c0_i32_0 = arith.constant 0 : i32
    %c0_i32_1 = arith.constant 0 : i32
    return %c0_i32, %c0_i32_0 : i32, i32
  }
  func.func @transform_12(%arg0: i32) -> (i32, i32) {
    %c0_i32 = arith.constant 0 : i32
    %c0_i32_0 = arith.constant 0 : i32
    %c0_i32_1 = arith.constant 0 : i32
    return %c0_i32, %c0_i32_0 : i32, i32
  }
  func.func @transform_13(%arg0: i32) -> (i32, i32) {
    %c0_i32 = arith.constant 0 : i32
    %c0_i32_0 = arith.constant 0 : i32
    %c0_i32_1 = arith.constant 0 : i32
    return %c0_i32, %c0_i32_0 : i32, i32
  }
  func.func @transform_14(%arg0: i32) -> (i32, i32) {
    %c0_i32 = arith.constant 0 : i32
    %c0_i32_0 = arith.constant 0 : i32
    %c0_i32_1 = arith.constant 0 : i32
    return %c0_i32, %c0_i32_0 : i32, i32
  }
  func.func @transform_15(%arg0: i32) -> (i32, i32) {
    %c0_i32 = arith.constant 0 : i32
    %c0_i32_0 = arith.constant 0 : i32
    %c0_i32_1 = arith.constant 0 : i32
    return %c0_i32, %c0_i32_0 : i32, i32
  }
  func.func @transform_16(%arg0: i32) -> (i32, i32) {
    %c0_i32 = arith.constant 0 : i32
    %c0_i32_0 = arith.constant 0 : i32
    %c0_i32_1 = arith.constant 0 : i32
    return %c0_i32, %c0_i32_0 : i32, i32
  }
  func.func @transform_17(%arg0: i32) -> (i32, i32) {
    %c0_i32 = arith.constant 0 : i32
    %c0_i32_0 = arith.constant 0 : i32
    %c0_i32_1 = arith.constant 0 : i32
    return %c0_i32, %c0_i32_0 : i32, i32
  }
  func.func @transform_18(%arg0: i32) -> (i32, i32) {
    %c0_i32 = arith.constant 0 : i32
    %c0_i32_0 = arith.constant 0 : i32
    %c0_i32_1 = arith.constant 0 : i32
    return %c0_i32, %c0_i32_0 : i32, i32
  }
  func.func @transform_19(%arg0: i32) -> (i32, i32) {
    %c0_i32 = arith.constant 0 : i32
    %c0_i32_0 = arith.constant 0 : i32
    %c0_i32_1 = arith.constant 0 : i32
    return %c0_i32, %c0_i32_0 : i32, i32
  }
  func.func @transform_20(%arg0: i32) -> (i32, i32) {
    %c0_i32 = arith.constant 0 : i32
    %c0_i32_0 = arith.constant 0 : i32
    %c0_i32_1 = arith.constant 0 : i32
    return %c0_i32, %c0_i32_0 : i32, i32
  }
  func.func @transform_21(%arg0: i32) -> (i32, i32) {
    %c0_i32 = arith.constant 0 : i32
    %c0_i32_0 = arith.constant 0 : i32
    %c0_i32_1 = arith.constant 0 : i32
    return %c0_i32, %c0_i32_0 : i32, i32
  }
  func.func @transform_22(%arg0: i32) -> (i32, i32) {
    %c0_i32 = arith.constant 0 : i32
    %c0_i32_0 = arith.constant 0 : i32
    %c0_i32_1 = arith.constant 0 : i32
    return %c0_i32, %c0_i32_0 : i32, i32
  }
}

</mosaic_0001>

<bundles_post_ra>
// kernel: forward.1
= control target key start
LH: loop header
LB: loop body
LE: loop exit
PB: predicated region body
PF: predicated region fallthrough
CT: control target
= control target key end

     0   :  { %s9468_s0 = inlined_call_operand.vmem [shape: f32[2,8,8], index: 0, kind: input, shape index: {}]   ;;  %s9469_s1 = inlined_call_operand.hbm [shape: f32[4,8,64], index: 1, kind: input, shape index: {}]   ;;  %s9470_s2 = inlined_call_operand.hbm [shape: f32[1,64], index: 2, kind: input, shape index: {}]   ;;  %s9471_s3 = inlined_call_operand.vmem [shape: f32[4,64,32], index: 3, kind: input, shape index: {}]   ;;  %s9472_s4 = inlined_call_operand.vmem [shape: f32[4,64,32], index: 4, kind: input, shape index: {}]   ;;  %s9473_s5 = inlined_call_operand.hbm [shape: f32[8,32], index: 5, kind: input, shape index: {}]   ;;  %s9474_s6 = inlined_call_operand.hbm [shape: f32[1,32], index: 6, kind: input, shape index: {}]   ;;  %s9475_s7 = inlined_call_operand.vmem [shape: f32[4,32,32], index: 7, kind: input, shape index: {}]   ;;  %s9476_s8 = inlined_call_operand.hbm [shape: f32[1,32], index: 8, kind: input, shape index: {}]   ;;  %s9477_s9 = inlined_call_operand.vmem [shape: f32[4,32,16], index: 9, kind: input, shape index: {}]   ;;  %s9478_s10 = inlined_call_operand.vmem [shape: f32[4,32,16], index: 10, kind: input, shape index: {}]   ;;  %s9479_s11 = inlined_call_operand.vmem [shape: f32[32,16], index: 11, kind: input, shape index: {}]   ;;  %s9480_s12 = inlined_call_operand.hbm [shape: f32[1,16], index: 12, kind: input, shape index: {}]   ;;  %s9481_s13 = inlined_call_operand.vmem [shape: f32[32,128], index: 13, kind: input, shape index: {}]   ;;  %s9482_s14 = inlined_call_operand.hbm [shape: f32[1,128], index: 14, kind: input, shape index: {}]   ;;  %s9483_s15 = inlined_call_operand.vmem [shape: f32[128,512], index: 15, kind: input, shape index: {}]   ;;  %s9484_s16 = inlined_call_operand.vmem [shape: f32[128,512], index: 16, kind: input, shape index: {}]   ;;  %s9485_s17 = inlined_call_operand.vmem [shape: f32[1,512], index: 17, kind: input, shape index: {}]   ;;  %s9486_s18 = inlined_call_operand.vmem [shape: f32[128,64], index: 18, kind: input, shape index: {}]   ;;  %s9487_s19 = inlined_call_operand.vmem [shape: f32[1,64], index: 19, kind: input, shape index: {}]   ;;  %s9488_s20 = inlined_call_operand.vmem [shape: f32[64,3], index: 20, kind: input, shape index: {}]   ;;  %s9489_s21 = inlined_call_operand.vmem [shape: f32[1,3], index: 21, kind: input, shape index: {}]   ;;  %s9490_s22 = inlined_call_operand.hbm [shape: f32[2,3], index: 22, kind: output, shape index: {}]  }
   0x1   :  { %9497 = sst [smem:[#allocation28_spill]] %s9468_s0 }
   0x2   :  { %9498 = sst [smem:[#allocation29_spill]] %s9469_s1 }
   0x3   :  { %9499 = sst [smem:[#allocation30_spill]] %s9470_s2 }
   0x4   :  { %9500 = sst [smem:[#allocation31_spill]] %s9471_s3 }
   0x5   :  { %9501 = sst [smem:[#allocation32_spill]] %s9472_s4 }
   0x6   :  { %9502 = sst [smem:[#allocation33_spill]] %s9473_s5 }
   0x7   :  { %9503 = sst [smem:[#allocation34_spill]] %s9474_s6 }
   0x8   :  { %27 = vsyncpa [#allocation10], 0 }
   0x9   :  { %28 = vsyncpa [#allocation13], 0 }
   0xa   :  { %29 = vsyncpa [#allocation16], 0 }
   0xb   :  { %30 = vsyncpa [#allocation19], 0 }
   0xc   :  { %31 = vsyncpa [#allocation11], 0  ;;  %s7279_s3 = smov [#allocation12]   ;;  %s7280_s29 = smov [#allocation15]  }
   0xd   :  { %s52_s28 = sshll.u32 %s7279_s3, 4  ;;  %s76_s30 = sshll.u32 %s7280_s29, 4  ;;  %s53_s28 = int_to_ptr.vmem [resolvable:$true] %s52_s28  ;;  %s77_s30 = int_to_ptr.vmem [resolvable:$true] %s76_s30 }
   0xe   :  { %s7117_s4 = scalar_lea.vmem %s53_s28, 16  ;;  %s7121_s0 = scalar_lea.vmem %s53_s28, 32 }
   0xf   :  { %p7118_p0 = scmp.ne.s32.totalorder %s53_s28, %s7117_s4  ;;  %p7122_p1 = scmp.lt.s32.totalorder %s53_s28, %s53_s28 }
  0x10   :  { %p7123_p2 = scmp.lt.s32.totalorder %s7121_s0, %s7117_s4 }
  0x12   :  { %p7124_p3 = por %p7123_p2, %p7122_p1 }
  0x14   :  { %p7125_p4 = pnand %p7124_p3, %p7118_p0 }
  0x16   :  { %7128 = shalt.err (!%p7125_p4)
}
  0x17   :  { %s9504_s5 = sld [smem:[#allocation30_spill]]  ;;  %s7137_s24 = scalar_lea.vmem %s77_s30, 16 }
  0x18   :  { %p7138_p5 = scmp.ne.s32.totalorder %s77_s30, %s7137_s24  ;;  %s7141_s6 = scalar_lea.vmem %s77_s30, 32 }
  0x19   :  { %p7142_p6 = scmp.lt.s32.totalorder %s77_s30, %s77_s30  ;;  %p7143_p7 = scmp.lt.s32.totalorder %s7141_s6, %s7137_s24 }
  0x1b   :  { %p7144_p8 = por %p7143_p7, %p7142_p6 }
  0x1d   :  { %55 = dma.hbm_to_vmem [thread:$0]  %s9504_s5, 16, %s53_s28, [#allocation13]  }
  0x1e   :  { %p7145_p9 = pnand %p7144_p8, %p7138_p5 }
  0x20   :  { %7148 = shalt.err (!%p7145_p9)
}
  0x21   :  { %s9505_s2 = sld [smem:[#allocation34_spill]]  ;;  %s7281_s27 = smov [#allocation18]  }
  0x22   :  { %s104_s3 = sshll.u32 %s7281_s27, 4  ;;  %s7282_s29 = smov [#allocation9]   ;;  %s105_s3 = int_to_ptr.vmem [resolvable:$true] %s104_s3 }
  0x23   :  { %s39_s4 = sshll.u32 %s7282_s29, 4  ;;  %s7157_s0 = scalar_lea.vmem %s105_s3, 16  ;;  %s40_s4 = int_to_ptr.vmem [resolvable:$true] %s39_s4 }
  0x24   :  { %p7158_p10 = scmp.ne.s32.totalorder %s105_s3, %s7157_s0  ;;  %s7161_s28 = scalar_lea.vmem %s105_s3, 32 }
  0x25   :  { %p7162_p11 = scmp.lt.s32.totalorder %s105_s3, %s105_s3  ;;  %p7163_p12 = scmp.lt.s32.totalorder %s7161_s28, %s7157_s0 }
  0x27   :  { %79 = dma.hbm_to_vmem [thread:$0]  %s9505_s2, 16, %s77_s30, [#allocation16]  }
  0x28   :  { %p7164_p13 = por %p7163_p12, %p7162_p11 }
  0x2a   :  { %p7165_p0 = pnand %p7164_p13, %p7158_p10 }
  0x2c   :  { %7168 = shalt.err (!%p7165_p0)
}
  0x2d   :  { %107 = dma.hbm_to_vmem [thread:$0]  %s9480_s12, 16, %s105_s3, [#allocation19]  }
  0x2e   :  { %s7177_s5 = scalar_lea.vmem %s40_s4, 512  ;;  %p7182_p2 = scmp.lt.s32.totalorder %s40_s4, %s40_s4 }
  0x2f   :  { %p7178_p1 = scmp.ne.s32.totalorder %s40_s4, %s7177_s5  ;;  %p7183_p3 = scmp.lt.s32.totalorder %s7177_s5, %s7177_s5 }
  0x31   :  { %p7184_p4 = por %p7183_p3, %p7182_p2 }
  0x33   :  { %p7185_p5 = pnand %p7184_p4, %p7178_p1 }
  0x35   :  { %7188 = shalt.err (!%p7185_p5)
}
  0x36   :  { %s7283_s30 = smov 128   ;;  %s7284_s24 = smov 8  }
  0x37   :  { %s9506_s26 = sld [smem:[#allocation29_spill]]  ;;  %s7285_s2 = smov [#allocation14]  }
  0x38   :  { %s66_s27 = sshll.u32 %s7285_s2, 4  ;;  %s7286_s29 = smov [#allocation17]   ;;  %s67_s27 = int_to_ptr.vmem [resolvable:$true] %s66_s27 }
  0x39   :  { %s88_s0 = sshll.u32 %s7286_s29, 4  ;;  %s7197_s12 = scalar_lea.vmem %s67_s27, 128  ;;  %s89_s0 = int_to_ptr.vmem [resolvable:$true] %s88_s0 }
  0x3a   :  { %p7198_p6 = scmp.ne.s32.totalorder %s67_s27, %s7197_s12  ;;  %p7202_p7 = scmp.lt.s32.totalorder %s67_s27, %s67_s27 }
  0x3b   :  { %p7203_p8 = scmp.lt.s32.totalorder %s7197_s12, %s7197_s12 }
  0x3d   :  { %45 = dma.hbm_to_vmem [thread:$0]  %s9506_s26, 512, %s40_s4, [#allocation10], %s7283_s30, %s7283_s30, %s7284_s24  }
  0x3e   :  { %p7204_p9 = por %p7203_p8, %p7202_p7 }
  0x40   :  { %p7205_p10 = pnand %p7204_p9, %p7198_p6 }
  0x42   :  { %7208 = shalt.err (!%p7205_p10)
}
  0x43   :  { %s9507_s23 = sld [smem:[#allocation33_spill]]  ;;  %s7217_s1 = scalar_lea.vmem %s89_s0, 16 }
  0x44   :  { %p7218_p11 = scmp.ne.s32.totalorder %s89_s0, %s7217_s1  ;;  %s7221_s4 = scalar_lea.vmem %s89_s0, 32 }
  0x45   :  { %p7222_p12 = scmp.lt.s32.totalorder %s89_s0, %s89_s0  ;;  %p7223_p13 = scmp.lt.s32.totalorder %s7221_s4, %s7217_s1 }
  0x47   :  { %p7224_p0 = por %p7223_p13, %p7222_p12 }
  0x49   :  { %69 = dma.hbm_to_vmem [thread:$0]  %s9507_s23, 128, %s67_s27, [#allocation13]  }
  0x4a   :  { %p7225_p1 = pnand %p7224_p0, %p7218_p11 }
  0x4c   :  { %7228 = shalt.err (!%p7225_p1)
}
  0x4d   :  { %91 = dma.hbm_to_vmem [thread:$0]  %s9476_s8, 16, %s89_s0, [#allocation16]  }
  0x4e   :  { %s7287_s24 = smov [#allocation20]  }
  0x4f   :  { %s116_s6 = sshll.u32 %s7287_s24, 4  ;;  %s117_s6 = int_to_ptr.vmem [resolvable:$true] %s116_s6 }
  0x50   :  { %s7237_s25 = scalar_lea.vmem %s117_s6, 16  ;;  %s7241_s26 = scalar_lea.vmem %s117_s6, 32 }
  0x51   :  { %p7238_p2 = scmp.ne.s32.totalorder %s117_s6, %s7237_s25  ;;  %p7242_p3 = scmp.lt.s32.totalorder %s117_s6, %s117_s6 }
  0x52   :  { %p7243_p4 = scmp.lt.s32.totalorder %s7241_s26, %s7237_s25 }
  0x54   :  { %p7244_p5 = por %p7243_p4, %p7242_p3 }
  0x56   :  { %p7245_p6 = pnand %p7244_p5, %p7238_p2 }
  0x58   :  { %7248 = shalt.err (!%p7245_p6)
}
  0x59   :  { %119 = dma.hbm_to_vmem [thread:$0]  %s9482_s14, 16, %s117_s6, [#allocation19]  }
  0x5a   :  { %7269 = dma.done.wait [#allocation10], 512  }
  0x5b   :  { %7270 = vsyncadd [#allocation10], 4294966784 }
  0x5c   :  { %7271 = dma.done.wait [#allocation13], 144  }
  0x5d   :  { %7272 = vsyncadd [#allocation13], 4294967152 }
  0x5e   :  { %7273 = dma.done.wait [#allocation16], 32  }
  0x5f   :  { %7274 = vsyncadd [#allocation16], 4294967264 }
  0x60   :  { %7275 = dma.done.wait [#allocation19], 32  }
  0x61   :  { %7276 = vsyncadd [#allocation19], 4294967264  ;;  %vm156_vm0 = vcmask 523264   ;;  %vm158_vm1 = vcmask 518144   ;;  %v9494_v0 = vmov 0.0   ;;  %vm7289_vm2 = vmmov 0  }
  0x62   :  { %6341 = vmatprep.subr.mxu0 %v9494_v0  ;;  %6346 = vmatprep.subr.mxu1 %v9494_v0  ;;  %157 = vst.msk [vmem:[#allocation2] sm:$0xff] %vm156_vm0, %v9494_v0  ;;  %vm160_vm3 = vcmask 64512   ;;  %v168_v1 = vld [vmem:[#allocation9 + $0x8] sm:$0xff]  ;;  %v166_v2 = vld [vmem:[#allocation9] sm:$0xff]  ;;  %s9508_s29 = sld [smem:[#allocation28_spill]]  ;;  %v316_v4 = vld [vmem:[#allocation9 + $0x10] sm:$0xff] }
  0x63   :  { %159 = vst.msk [vmem:[#allocation2 + $0x8] sm:$0x7] %vm158_vm1, %v9494_v0  ;;  %6343 = vmatprep.mubr.msk.f32.mxu0 %vm7289_vm2, %v9494_v0  ;;  %6348 = vmatprep.mubr.msk.f32.mxu1 %vm7289_vm2, %v9494_v0  ;;  %v392_v5 = vld [vmem:[#allocation9 + $0x18] sm:$0xff]  ;;  %s9509_s3 = sld [smem:[#allocation31_spill]]  ;;  %v5775_v34 = vld [vmem:[#allocation12] ss:$0 sm:$0xff] }
  0x64   :  { %6342 = vmatpush3.msra.mxu0 %v168_v1  ;;  %6347 = vmatpush3.msra.mxu1 %v166_v2  ;;  %s9510_s28 = sld [smem:[#allocation32_spill]]  ;;  %vm1132_vm5 = vcmask 261120   ;;  %vm1221_vm7 = vcmask 253952   ;;  %vm1262_vm11 = vcmask 257024   ;;  %vm2214_vm13 = vcmask 125952   ;;  %s7292_s23 = smov [#allocation21]  }
  0x65   :  { %6351 = vmatprep.subr.mxu0 %v9494_v0  ;;  %6356 = vmatprep.subr.mxu1 %v9494_v0  ;;  %vm2306_vm14 = vcmask 122880  }
  0x68   :  { %v7442_v3 = vld [vmem:[%s9508_s29] sm:$0xff] }
  0x69   :  { %161 = vst.msk [vmem:[#allocation2 + $0x1] sm:$0xff] %vm160_vm3, %v7442_v3  ;;  %v5783_v10 = vld [vmem:[%s9509_s3 + $0x78] sm:$0xff]  ;;  %v5782_v12 = vld [vmem:[%s9509_s3 + $0x70] sm:$0xff]  ;;  %v5781_v14 = vld [vmem:[%s9509_s3 + $0x68] sm:$0xff] }
  0x6a   :  { %v492_v11 = vld [vmem:[%s9509_s3 + $0x38] sm:$0xff]  ;;  %v491_v13 = vld [vmem:[%s9509_s3 + $0x30] sm:$0xff]  ;;  %v490_v15 = vld [vmem:[%s9509_s3 + $0x28] sm:$0xff] }
  0x6b   :  { %v5780_v16 = vld [vmem:[%s9509_s3 + $0x60] sm:$0xff]  ;;  %v5779_v18 = vld [vmem:[%s9509_s3 + $0x58] sm:$0xff]  ;;  %v5778_v20 = vld [vmem:[%s9509_s3 + $0x50] sm:$0xff] }
  0x6c   :  { %v489_v17 = vld [vmem:[%s9509_s3 + $0x20] sm:$0xff]  ;;  %v488_v19 = vld [vmem:[%s9509_s3 + $0x18] sm:$0xff]  ;;  %v487_v21 = vld [vmem:[%s9509_s3 + $0x10] sm:$0xff] }
  0x6d   :  { %v5777_v22 = vld [vmem:[%s9509_s3 + $0x48] sm:$0xff]  ;;  %v5776_v24 = vld [vmem:[%s9509_s3 + $0x40] sm:$0xff]  ;;  %v5793_v41 = vld [vmem:[%s9509_s3 + $0xb8] sm:$0xff] }
  0x6e   :  { %v486_v23 = vld [vmem:[%s9509_s3 + $0x8] sm:$0xff]  ;;  %v485_v25 = vld [vmem:[%s9509_s3] sm:$0xff]  ;;  %v5802_v42 = vld [vmem:[%s9509_s3 + $0xf8] sm:$0xff] }
  0x6f   :  { %v5792_v47 = vld [vmem:[%s9509_s3 + $0xb0] sm:$0xff]  ;;  %v5791_v49 = vld [vmem:[%s9509_s3 + $0xa8] sm:$0xff]  ;;  %v5790_v51 = vld [vmem:[%s9509_s3 + $0xa0] sm:$0xff] }
  0x70   :  { %v163_v6 = vld [vmem:[#allocation2 + $0x1] sm:$0xff]  ;;  %v5801_v48 = vld [vmem:[%s9509_s3 + $0xf0] sm:$0xff]  ;;  %v5789_v53 = vld [vmem:[%s9509_s3 + $0x98] sm:$0xff] }
  0x71   :  { %v164_v7 = vld [vmem:[#allocation2 + $0x2] sm:$0xff]  ;;  %6344 = vmatmul.mubr.msk.f32.vlgmr.msra.gmra.mxu0 %vm160_vm3, %v163_v6  ;;  %v5798_v54 = vld [vmem:[%s9509_s3 + $0xd8] sm:$0xff]  ;;  %v5788_v55 = vld [vmem:[%s9509_s3 + $0x90] sm:$0xff] }
  0x72   :  { %v165_v8 = vld [vmem:[#allocation2 + $0x3] sm:$0xff]  ;;  %6352 = vmatpush3.msra.mxu0 %v316_v4  ;;  %6353 = vmatprep.mubr.msk.f32.mxu0 %vm7289_vm2, %v9494_v0  ;;  %v5797_v56 = vld [vmem:[%s9509_s3 + $0xd0] sm:$0xff]  ;;  %v5811_v61 = vld [vmem:[%s9510_s28 + $0x78] sm:$0xff] }
  0x73   :  { %479 = vst.msk [vmem:[#allocation2 + $0x8] sm:$0x7] %vm158_vm1, %v9494_v0  ;;  %v162_v9 = vld [vmem:[#allocation2] sm:$0xff]  ;;  %6361 = vmatprep.subr.mxu0 %v9494_v0  ;;  %v5800_v50 = vld [vmem:[%s9509_s3 + $0xe8] sm:$0xff]  ;;  %v821_v62 = vld [vmem:[%s9510_s28 + $0x38] sm:$0xff] }
  0x74   :  { %6349 = vmatmul.mubr.msk.f32.vlgmr.msra.gmra.mxu1 %vm160_vm3, %v162_v9  ;;  %478 = vst.msk [vmem:[#allocation2] sm:$0xff] %vm156_vm0, %v9494_v0  ;;  %v5799_v52 = vld [vmem:[%s9509_s3 + $0xe0] sm:$0xff]  ;;  %v5787_v57 = vld [vmem:[%s9509_s3 + $0x88] sm:$0xff]  ;;  %v5810_v63 = vld [vmem:[%s9510_s28 + $0x70] sm:$0xff] }
  0x75   :  { %6357 = vmatpush3.msra.mxu1 %v392_v5  ;;  %6358 = vmatprep.mubr.msk.f32.mxu1 %vm7289_vm2, %v9494_v0  ;;  %v5796_v58 = vld [vmem:[%s9509_s3 + $0xc8] sm:$0xff]  ;;  %v5786_v59 = vld [vmem:[%s9509_s3 + $0x80] sm:$0xff]  ;;  %v820_v1 = vld [vmem:[%s9510_s28 + $0x30] sm:$0xff] }
  0x76   :  { %6354 = vmatmul.mubr.msk.f32.vlgmr.msra.gmra.mxu0 %vm160_vm3, %v164_v7  ;;  %6380 = vmatprep.subr.mxu1 %v9494_v0  ;;  %v5795_v60 = vld [vmem:[%s9509_s3 + $0xc0] sm:$0xff]  ;;  %v5809_v2 = vld [vmem:[%s9510_s28 + $0x68] sm:$0xff]  ;;  %v5807_v7 = vld [vmem:[%s9510_s28 + $0x58] sm:$0xff] }
  0x77   :  { %6377 = vmatprep.mubr.msk.f32.mxu0 %vm7289_vm2, %v9494_v0  ;;  %6362 = vmatpush3.msra.mxu0 %v5783_v10  ;;  %v819_v4 = vld [vmem:[%s9510_s28 + $0x28] sm:$0xff]  ;;  %v5808_v5 = vld [vmem:[%s9510_s28 + $0x60] sm:$0xff]  ;;  %v5806_v9 = vld [vmem:[%s9510_s28 + $0x50] sm:$0xff] }
  0x78   :  { %6359 = vmatmul.mubr.msk.f32.vlgmr.msra.gmra.mxu1 %vm160_vm3, %v165_v8  ;;  %6363 = vmatprep.subr.mxu0 %v9494_v0  ;;  %v818_v6 = vld [vmem:[%s9510_s28 + $0x20] sm:$0xff]  ;;  %v817_v8 = vld [vmem:[%s9510_s28 + $0x18] sm:$0xff]  ;;  %v816_v10 = vld [vmem:[%s9510_s28 + $0x10] sm:$0xff] }
  0x79   :  { %6396 = vmatprep.mubr.msk.f32.mxu1 %vm7289_vm2, %v9494_v0  ;;  %6381 = vmatpush3.msra.mxu1 %v492_v11  ;;  %v5805_v11 = vld [vmem:[%s9510_s28 + $0x48] sm:$0xff] }
  0x7a   :  { %6382 = vmatprep.subr.mxu1 %v9494_v0  ;;  %6364 = vmatpush3.msra.mxu0 %v5782_v12  ;;  %v815_v12 = vld [vmem:[%s9510_s28 + $0x8] sm:$0xff] }
  0x7b   :  { %6383 = vmatpush3.msra.mxu1 %v491_v13  ;;  %6365 = vmatprep.subr.mxu0 %v9494_v0  ;;  %v5804_v13 = vld [vmem:[%s9510_s28 + $0x40] sm:$0xff] }
  0x7c   :  { %6384 = vmatprep.subr.mxu1 %v9494_v0  ;;  %6366 = vmatpush3.msra.mxu0 %v5781_v14  ;;  %v814_v14 = vld [vmem:[%s9510_s28] sm:$0xff] }
  0x7d   :  { %6385 = vmatpush3.msra.mxu1 %v490_v15  ;;  %6367 = vmatprep.subr.mxu0 %v9494_v0  ;;  %v5821_v15 = vld [vmem:[%s9510_s28 + $0xb8] sm:$0xff] }
  0x7e   :  { %6386 = vmatprep.subr.mxu1 %v9494_v0  ;;  %6368 = vmatpush3.msra.mxu0 %v5780_v16  ;;  %v5830_v16 = vld [vmem:[%s9510_s28 + $0xf8] sm:$0xff] }
  0x7f   :  { %6387 = vmatpush3.msra.mxu1 %v489_v17  ;;  %6369 = vmatprep.subr.mxu0 %v9494_v0  ;;  %v5820_v17 = vld [vmem:[%s9510_s28 + $0xb0] sm:$0xff] }
  0x80   :  { %6388 = vmatprep.subr.mxu1 %v9494_v0  ;;  %6370 = vmatpush3.msra.mxu0 %v5779_v18  ;;  %v5829_v18 = vld [vmem:[%s9510_s28 + $0xf0] sm:$0xff] }
  0x81   :  { %6389 = vmatpush3.msra.mxu1 %v488_v19  ;;  %6371 = vmatprep.subr.mxu0 %v9494_v0  ;;  %v5819_v19 = vld [vmem:[%s9510_s28 + $0xa8] sm:$0xff] }
  0x82   :  { %6390 = vmatprep.subr.mxu1 %v9494_v0  ;;  %6372 = vmatpush3.msra.mxu0 %v5778_v20  ;;  %v5828_v20 = vld [vmem:[%s9510_s28 + $0xe8] sm:$0xff] }
  0x83   :  { %6391 = vmatpush3.msra.mxu1 %v487_v21  ;;  %6373 = vmatprep.subr.mxu0 %v9494_v0  ;;  %v5818_v21 = vld [vmem:[%s9510_s28 + $0xa0] sm:$0xff] }
  0x84   :  { %6392 = vmatprep.subr.mxu1 %v9494_v0  ;;  %6374 = vmatpush3.msra.mxu0 %v5777_v22  ;;  %v5827_v22 = vld [vmem:[%s9510_s28 + $0xe0] sm:$0xff] }
  0x85   :  { %6393 = vmatpush3.msra.mxu1 %v486_v23  ;;  %6375 = vmatprep.subr.mxu0 %v9494_v0  ;;  %v5817_v23 = vld [vmem:[%s9510_s28 + $0x98] sm:$0xff] }
  0x86   :  { %6394 = vmatprep.subr.mxu1 %v9494_v0  ;;  %6376 = vmatpush3.msra.mxu0 %v5776_v24  ;;  %v5826_v24 = vld [vmem:[%s9510_s28 + $0xd8] sm:$0xff] }
  0x87   :  { %6395 = vmatpush3.msra.mxu1 %v485_v25  ;;  %6399 = vmatprep.subr.mxu0 %v9494_v0  ;;  %v5816_v25 = vld [vmem:[%s9510_s28 + $0x90] sm:$0xff] }
  0x88   :  { %6418 = vmatprep.subr.mxu1 %v9494_v0 }
 0x131   :  { %v238_v26 = vpop.f32.mrf.mxu0 }
 0x133   :  { %v6345_v28 = vpop.f32.mrf.mxu0 }
 0x134   :  { %v311_v27 = vpop.f32.mrf.mxu1  ;;  %v5824_v28 = vld [vmem:[%s9510_s28 + $0xc8] sm:$0xff] }
 0x135   :  { %v312_v29 = vadd.f32 %v311_v27, %v238_v26  ;;  %v5825_v26 = vld [vmem:[%s9510_s28 + $0xd0] sm:$0xff]  ;;  %v5815_v27 = vld [vmem:[%s9510_s28 + $0x88] sm:$0xff] }
 0x136   :  { %v6350_v30 = vpop.f32.mrf.mxu1  ;;  %v386_v31 = vpop.f32.mrf.mxu0 }
 0x137   :  { %v390_v32 = vadd.f32 %v386_v31, %v312_v29  ;;  %v5814_v29 = vld [vmem:[%s9510_s28 + $0x80] sm:$0xff]  ;;  %v1134_v31 = vld [vmem:[#allocation14] sm:$0xff] }
 0x138   :  { %v462_v33 = vpop.f32.mrf.mxu1  ;;  %v6355_v35 = vpop.f32.mrf.mxu0  ;;  %v5823_v30 = vld [vmem:[%s9510_s28 + $0xc0] sm:$0xff] }
 0x139   :  { %v466_v36 = vadd.f32 %v462_v33, %v390_v32  ;;  %v5836_v32 = vld [vmem:[%s9475_s7 + $0x38] sm:$0xff]  ;;  %v5834_v35 = vld [vmem:[%s9475_s7 + $0x28] sm:$0xff] }
 0x13a   :  { %v6360_v37 = vpop.f32.mrf.mxu1  ;;  %v5847_v33 = vld [vmem:[%s9475_s7 + $0x78] sm:$0xff] }
 0x13b   :  { %v474_v38 = vadd.f32 %v5775_v34, %v466_v36  ;;  %v5835_v34 = vld [vmem:[%s9475_s7 + $0x30] sm:$0xff]  ;;  %v5845_v36 = vld [vmem:[%s9475_s7 + $0x68] sm:$0xff]  ;;  %v5833_v37 = vld [vmem:[%s9475_s7 + $0x20] sm:$0xff] }
 0x13d   :  { %vm475_vm4 = vcmp.ge.f32.partialorder %v474_v38, 0.0  ;;  %v476_v39 = vmul.f32 0.01, %v474_v38 }
 0x13f   :  { %v477_v40 = vsel %vm475_vm4, %v474_v38, %v476_v39  ;;  %v5844_v38 = vld [vmem:[%s9475_s7 + $0x60] sm:$0xff] }
 0x140   :  { %480 = vst.msk [vmem:[#allocation2 + $0x1] sm:$0xff] %vm156_vm0, %v477_v40 }
 0x147   :  { %v7537_v43 = vld [vmem:[#allocation2 + $0x2] sm:$0xff] }
 0x148   :  { %v7539_v44 = vld [vmem:[#allocation2 + $0x3] sm:$0xff] }
 0x149   :  { %v7541_v45 = vld [vmem:[#allocation2 + $0x1] sm:$0xff] }
 0x14a   :  { %6378 = vmatmul.mubr.msk.f32.vlgmr.msra.gmra.mxu0 %vm156_vm0, %v7541_v45  ;;  %1261 = vst.msk [vmem:[#allocation2 + $0x8] sm:$0x7] %vm158_vm1, %v9494_v0  ;;  %v7547_v46 = vld [vmem:[#allocation2] sm:$0xff] }
 0x14b   :  { %1593 = vst.msk [vmem:[#allocation2 + $0x8] sm:$0x7] %vm158_vm1, %v9494_v0  ;;  %6397 = vmatmul.mubr.msk.f32.vlgmr.msra.gmra.mxu1 %vm156_vm0, %v7547_v46  ;;  %6400 = vmatpush3.msra.mxu0 %v5793_v41 }
 0x14c   :  { %1260 = vst.msk [vmem:[#allocation2] sm:$0xff] %vm156_vm0, %v9494_v0  ;;  %6419 = vmatpush3.msra.mxu1 %v5802_v42  ;;  %6401 = vmatprep.subr.mxu0 %v9494_v0 }
 0x14d   :  { %2480 = vst.msk [vmem:[#allocation2 + $0x8] sm:$0x7] %vm158_vm1, %v9494_v0  ;;  %6420 = vmatprep.subr.mxu1 %v9494_v0  ;;  %6402 = vmatpush3.msra.mxu0 %v5792_v47 }
 0x14e   :  { %6421 = vmatpush3.msra.mxu1 %v5801_v48  ;;  %6403 = vmatprep.subr.mxu0 %v9494_v0 }
 0x14f   :  { %6422 = vmatprep.subr.mxu1 %v9494_v0  ;;  %6404 = vmatpush3.msra.mxu0 %v5791_v49 }
 0x150   :  { %6423 = vmatpush3.msra.mxu1 %v5800_v50  ;;  %6405 = vmatprep.subr.mxu0 %v9494_v0 }
 0x151   :  { %6424 = vmatprep.subr.mxu1 %v9494_v0  ;;  %6406 = vmatpush3.msra.mxu0 %v5790_v51 }
 0x152   :  { %6425 = vmatpush3.msra.mxu1 %v5799_v52  ;;  %6407 = vmatprep.subr.mxu0 %v9494_v0 }
 0x153   :  { %6426 = vmatprep.subr.mxu1 %v9494_v0  ;;  %6408 = vmatpush3.msra.mxu0 %v5789_v53 }
 0x154   :  { %6427 = vmatpush3.msra.mxu1 %v5798_v54  ;;  %6409 = vmatprep.subr.mxu0 %v9494_v0 }
 0x155   :  { %6428 = vmatprep.subr.mxu1 %v9494_v0  ;;  %6410 = vmatpush3.msra.mxu0 %v5788_v55 }
 0x156   :  { %6429 = vmatpush3.msra.mxu1 %v5797_v56  ;;  %6411 = vmatprep.subr.mxu0 %v9494_v0 }
 0x157   :  { %6430 = vmatprep.subr.mxu1 %v9494_v0  ;;  %6412 = vmatpush3.msra.mxu0 %v5787_v57 }
 0x158   :  { %6431 = vmatpush3.msra.mxu1 %v5796_v58  ;;  %6413 = vmatprep.subr.mxu0 %v9494_v0 }
 0x159   :  { %6432 = vmatprep.subr.mxu1 %v9494_v0  ;;  %6414 = vmatpush3.msra.mxu0 %v5786_v59 }
 0x15a   :  { %6415 = vmatprep.mubr.msk.f32.mxu0 %vm7289_vm2, %v9494_v0  ;;  %6433 = vmatpush3.msra.mxu1 %v5795_v60 }
 0x15b   :  { %6434 = vmatprep.mubr.msk.f32.mxu1 %vm7289_vm2, %v9494_v0  ;;  %6416 = vmatmul.mubr.msk.f32.vlgmr.msra.gmra.mxu0 %vm156_vm0, %v7537_v43 }
 0x15c   :  { %6435 = vmatmul.mubr.msk.f32.vlgmr.msra.gmra.mxu1 %vm156_vm0, %v7539_v44  ;;  %6437 = vmatprep.subr.mxu0 %v9494_v0 }
 0x15d   :  { %6456 = vmatprep.subr.mxu1 %v9494_v0  ;;  %6438 = vmatpush3.msra.mxu0 %v5811_v61 }
 0x15e   :  { %6457 = vmatpush3.msra.mxu1 %v821_v62  ;;  %6439 = vmatprep.subr.mxu0 %v9494_v0 }
 0x15f   :  { %6458 = vmatprep.subr.mxu1 %v9494_v0  ;;  %6440 = vmatpush3.msra.mxu0 %v5810_v63 }
 0x160   :  { %6459 = vmatpush3.msra.mxu1 %v820_v1  ;;  %6441 = vmatprep.subr.mxu0 %v9494_v0 }
 0x161   :  { %6460 = vmatprep.subr.mxu1 %v9494_v0  ;;  %6442 = vmatpush3.msra.mxu0 %v5809_v2 }
 0x162   :  { %6461 = vmatpush3.msra.mxu1 %v819_v4  ;;  %6443 = vmatprep.subr.mxu0 %v9494_v0 }
 0x163   :  { %6462 = vmatprep.subr.mxu1 %v9494_v0  ;;  %6444 = vmatpush3.msra.mxu0 %v5808_v5 }
 0x164   :  { %6463 = vmatpush3.msra.mxu1 %v818_v6  ;;  %6445 = vmatprep.subr.mxu0 %v9494_v0 }
 0x165   :  { %6464 = vmatprep.subr.mxu1 %v9494_v0  ;;  %6446 = vmatpush3.msra.mxu0 %v5807_v7 }
 0x166   :  { %6465 = vmatpush3.msra.mxu1 %v817_v8  ;;  %6447 = vmatprep.subr.mxu0 %v9494_v0 }
 0x167   :  { %6466 = vmatprep.subr.mxu1 %v9494_v0  ;;  %6448 = vmatpush3.msra.mxu0 %v5806_v9 }
 0x168   :  { %6467 = vmatpush3.msra.mxu1 %v816_v10  ;;  %6449 = vmatprep.subr.mxu0 %v9494_v0 }
 0x169   :  { %6468 = vmatprep.subr.mxu1 %v9494_v0  ;;  %6450 = vmatpush3.msra.mxu0 %v5805_v11 }
 0x16a   :  { %6469 = vmatpush3.msra.mxu1 %v815_v12  ;;  %6451 = vmatprep.subr.mxu0 %v9494_v0 }
 0x16b   :  { %6470 = vmatprep.subr.mxu1 %v9494_v0  ;;  %6452 = vmatpush3.msra.mxu0 %v5804_v13 }
 0x16c   :  { %6453 = vmatprep.mubr.msk.f32.mxu0 %vm7289_vm2, %v9494_v0  ;;  %6471 = vmatpush3.msra.mxu1 %v814_v14 }
 0x16d   :  { %6472 = vmatprep.mubr.msk.f32.mxu1 %vm7289_vm2, %v9494_v0  ;;  %6454 = vmatmul.mubr.msk.f32.vlgmr.msra.gmra.mxu0 %vm156_vm0, %v7541_v45 }
 0x16e   :  { %6473 = vmatmul.mubr.msk.f32.vlgmr.msra.gmra.mxu1 %vm156_vm0, %v7547_v46  ;;  %6475 = vmatprep.subr.mxu0 %v9494_v0 }
 0x16f   :  { %6494 = vmatprep.subr.mxu1 %v9494_v0  ;;  %6476 = vmatpush3.msra.mxu0 %v5821_v15 }
 0x170   :  { %6495 = vmatpush3.msra.mxu1 %v5830_v16  ;;  %6477 = vmatprep.subr.mxu0 %v9494_v0 }
 0x171   :  { %6496 = vmatprep.subr.mxu1 %v9494_v0  ;;  %6478 = vmatpush3.msra.mxu0 %v5820_v17 }
 0x172   :  { %6497 = vmatpush3.msra.mxu1 %v5829_v18  ;;  %6479 = vmatprep.subr.mxu0 %v9494_v0 }
 0x173   :  { %6498 = vmatprep.subr.mxu1 %v9494_v0  ;;  %6480 = vmatpush3.msra.mxu0 %v5819_v19  ;;  %v1209_v19 = vld [vmem:[#allocation15] sm:$0x1] }
 0x174   :  { %6499 = vmatpush3.msra.mxu1 %v5828_v20  ;;  %6481 = vmatprep.subr.mxu0 %v9494_v0 }
 0x175   :  { %6500 = vmatprep.subr.mxu1 %v9494_v0  ;;  %6482 = vmatpush3.msra.mxu0 %v5818_v21 }
 0x176   :  { %6501 = vmatpush3.msra.mxu1 %v5827_v22  ;;  %6483 = vmatprep.subr.mxu0 %v9494_v0 }
 0x177   :  { %6502 = vmatprep.subr.mxu1 %v9494_v0  ;;  %6484 = vmatpush3.msra.mxu0 %v5817_v23 }
 0x178   :  { %6503 = vmatpush3.msra.mxu1 %v5826_v24  ;;  %6485 = vmatprep.subr.mxu0 %v9494_v0 }
 0x179   :  { %6504 = vmatprep.subr.mxu1 %v9494_v0  ;;  %6486 = vmatpush3.msra.mxu0 %v5816_v25 }
 0x17a   :  { %6505 = vmatpush3.msra.mxu1 %v5825_v26  ;;  %6487 = vmatprep.subr.mxu0 %v9494_v0 }
 0x17b   :  { %6506 = vmatprep.subr.mxu1 %v9494_v0  ;;  %6488 = vmatpush3.msra.mxu0 %v5815_v27 }
 0x17c   :  { %6507 = vmatpush3.msra.mxu1 %v5824_v28  ;;  %6489 = vmatprep.subr.mxu0 %v9494_v0 }
 0x17d   :  { %6508 = vmatprep.subr.mxu1 %v9494_v0  ;;  %6490 = vmatpush3.msra.mxu0 %v5814_v29 }
 0x17e   :  { %6491 = vmatprep.mubr.msk.f32.mxu0 %vm7289_vm2, %v9494_v0  ;;  %6509 = vmatpush3.msra.mxu1 %v5823_v30 }
 0x17f   :  { %6510 = vmatprep.mubr.msk.f32.mxu1 %vm7289_vm2, %v9494_v0  ;;  %6492 = vmatmul.mubr.msk.f32.vlgmr.msra.gmra.mxu0 %vm156_vm0, %v7537_v43 }
 0x180   :  { %6511 = vmatmul.mubr.msk.f32.vlgmr.msra.gmra.mxu1 %vm156_vm0, %v7539_v44  ;;  %6513 = vmatprep.subr.mxu0 %v9494_v0 }
 0x181   :  { %6514 = vmatpush3.msra.mxu0 %v1134_v31  ;;  %6515 = vmatprep.mubr.msk.f32.mxu0 %vm7289_vm2, %v9494_v0 }
 0x182   :  { %6518 = vmatprep.subr.mxu1 %v9494_v0  ;;  %6551 = vmatprep.subr.mxu0 %v9494_v0 }
 0x183   :  { %6516 = vmatmul.mubr.msk.f32.vlgmr.msra.gmra.mxu0 %vm160_vm3, %v7442_v3  ;;  %6526 = vmatprep.mubr.msk.f32.mxu1 %vm7289_vm2, %v9494_v0  ;;  %v5846_v3 = vld [vmem:[%s9475_s7 + $0x70] sm:$0xff] }
 0x184   :  { %6559 = vmatprep.mubr.msk.f32.mxu0 %vm7289_vm2, %v9494_v0  ;;  %6519 = vmatpush3.msra.mxu1 %v5836_v32 }
 0x185   :  { %6552 = vmatpush3.msra.mxu0 %v5847_v33  ;;  %6520 = vmatprep.subr.mxu1 %v9494_v0 }
 0x186   :  { %6553 = vmatprep.subr.mxu0 %v9494_v0  ;;  %6521 = vmatpush3.msra.mxu1 %v5835_v34 }
 0x187   :  { %6554 = vmatpush3.msra.mxu0 %v5846_v3  ;;  %6522 = vmatprep.subr.mxu1 %v9494_v0 }
 0x188   :  { %6555 = vmatprep.subr.mxu0 %v9494_v0  ;;  %6523 = vmatpush3.msra.mxu1 %v5834_v35 }
 0x189   :  { %6556 = vmatpush3.msra.mxu0 %v5845_v36  ;;  %6524 = vmatprep.subr.mxu1 %v9494_v0 }
 0x18a   :  { %6557 = vmatprep.subr.mxu0 %v9494_v0  ;;  %6525 = vmatpush3.msra.mxu1 %v5833_v37 }
 0x18b   :  { %6558 = vmatpush3.msra.mxu0 %v5844_v38  ;;  %6529 = vmatprep.subr.mxu1 %v9494_v0 }
 0x18c   :  { %6573 = vmatprep.subr.mxu0 %v9494_v0 }
 0x20a   :  { %v571_v39 = vpop.f32.mrf.mxu0 }
 0x20b   :  { %v644_v40 = vpop.f32.mrf.mxu1 }
 0x20c   :  { %v6379_v41 = vpop.f32.mrf.mxu0  ;;  %v645_v51 = vadd.f32 %v644_v40, %v571_v39 }
 0x20d   :  { %v6398_v42 = vpop.f32.mrf.mxu1 }
 0x21b   :  { %v726_v43 = vpop.f32.mrf.mxu0 }
 0x21c   :  { %v809_v44 = vpop.f32.mrf.mxu1  ;;  %v730_v52 = vadd.f32 %v726_v43, %v645_v51  ;;  %v1271_v43 = vld [vmem:[%s9475_s7 + $0x18] sm:$0xff] }
 0x21d   :  { %v6417_v45 = vpop.f32.mrf.mxu0  ;;  %v5842_v51 = vld [vmem:[%s9475_s7 + $0x58] sm:$0xff] }
 0x21e   :  { %v6436_v46 = vpop.f32.mrf.mxu1  ;;  %v813_v58 = vadd.f32 %v809_v44, %v730_v52  ;;  %v5841_v52 = vld [vmem:[%s9475_s7 + $0x50] sm:$0xff] }
 0x21f   :  { %v1270_v46 = vld [vmem:[%s9475_s7 + $0x10] sm:$0xff] }
 0x22d   :  { %v897_v47 = vpop.f32.mrf.mxu0 }
 0x22e   :  { %v967_v48 = vpop.f32.mrf.mxu1 }
 0x22f   :  { %v6455_v49 = vpop.f32.mrf.mxu0  ;;  %v968_v53 = vadd.f32 %v967_v48, %v897_v47 }
 0x230   :  { %v6474_v50 = vpop.f32.mrf.mxu1  ;;  %v1269_v49 = vld [vmem:[%s9475_s7 + $0x8] sm:$0xff] }
 0x231   :  { %v1268_v50 = vld [vmem:[%s9475_s7] sm:$0xff] }
 0x23f   :  { %v1046_v54 = vpop.f32.mrf.mxu0 }
 0x240   :  { %v1050_v55 = vadd.f32 %v1046_v54, %v968_v53  ;;  %v1126_v56 = vpop.f32.mrf.mxu1  ;;  %v5840_v53 = vld [vmem:[%s9475_s7 + $0x48] sm:$0xff]  ;;  %v5839_v54 = vld [vmem:[%s9475_s7 + $0x40] sm:$0xff] }
 0x241   :  { %v6493_v57 = vpop.f32.mrf.mxu0 }
 0x242   :  { %v1130_v59 = vadd.f32 %v1126_v56, %v1050_v55  ;;  %v6512_v60 = vpop.f32.mrf.mxu1  ;;  %v5853_v55 = vld [vmem:[%s9477_s9 + $0x38] sm:$0xff]  ;;  %v5852_v57 = vld [vmem:[%s9477_s9 + $0x30] sm:$0xff] }
 0x243   :  { %v1204_v61 = vpop.f32.mrf.mxu0  ;;  %v1602_v56 = vld [vmem:[%s9477_s9 + $0x18] sm:$0xff]  ;;  %v1600_v60 = vld [vmem:[%s9477_s9 + $0x8] sm:$0xff] }
 0x244   :  { %v1131_v62 = vmax.f32 %v813_v58, %v1130_v59  ;;  %1208 = vst.msk [vmem:[#allocation4] sm:$0xff] %vm1132_vm5, %v1204_v61  ;;  %v1601_v58 = vld [vmem:[%s9477_s9 + $0x10] sm:$0xff]  ;;  %v5851_v59 = vld [vmem:[%s9477_s9 + $0x28] sm:$0xff]  ;;  %v5850_v61 = vld [vmem:[%s9477_s9 + $0x20] sm:$0xff] }
 0x245   :  { %v6517_v63 = vpop.f32.mrf.mxu0 }
 0x246   :  { %1133 = vst.msk [vmem:[#allocation3] sm:$0xff] %vm1132_vm5, %v1131_v62  ;;  %v1599_v62 = vld [vmem:[%s9477_s9] sm:$0xff] }
 0x24b   :  { %v1213_v1 = vld [vmem:[#allocation4] sm:$0x1]  ;;  %v1226_v2 = vld [vmem:[#allocation4 + $0x2] sm:$0x1]  ;;  %v1238_v4 = vld [vmem:[#allocation4 + $0x4] sm:$0x1] }
 0x24c   :  { %v1250_v16 = vld [vmem:[#allocation4 + $0x6] sm:$0x1]  ;;  %v1215_v20 = vld [vmem:[#allocation4 + $0x1] sm:$0x1]  ;;  %v1228_v24 = vld [vmem:[#allocation4 + $0x3] sm:$0x1] }
 0x24d   :  { %v1210_v5 = vld [vmem:[#allocation3] sm:$0x1]  ;;  %v1211_v6 = vld [vmem:[#allocation3 + $0x1] sm:$0x1]  ;;  %v1223_v7 = vld [vmem:[#allocation3 + $0x2] sm:$0x1] }
 0x24e   :  { %v1224_v8 = vld [vmem:[#allocation3 + $0x3] sm:$0x1]  ;;  %v1212_v9 = vmax.f32 %v1210_v5, %v1211_v6  ;;  %v1235_v10 = vld [vmem:[#allocation3 + $0x4] sm:$0x1]  ;;  %v1236_v11 = vld [vmem:[#allocation3 + $0x5] sm:$0x1] }
 0x24f   :  { %v1225_v12 = vmax.f32 %v1223_v7, %v1224_v8  ;;  %v1237_v13 = vmax.f32 %v1235_v10, %v1236_v11  ;;  %v1247_v14 = vld [vmem:[#allocation3 + $0x6] sm:$0x1]  ;;  %v1248_v15 = vld [vmem:[#allocation3 + $0x7] sm:$0x1]  ;;  %v1240_v25 = vld [vmem:[#allocation4 + $0x5] sm:$0x1] }
 0x250   :  { %v1214_v17 = vadd.f32 %v1213_v1, %v1212_v9  ;;  %v1249_v18 = vmax.f32 %v1247_v14, %v1248_v15  ;;  %v1252_v29 = vld [vmem:[#allocation4 + $0x7] sm:$0x1]  ;;  %v5849_v10 = vld [vmem:[#allocation17] ss:$0 sm:$0xff] }
 0x251   :  { %v1227_v21 = vadd.f32 %v1226_v2, %v1225_v12  ;;  %v1239_v22 = vadd.f32 %v1238_v4, %v1237_v13 }
 0x252   :  { %v1216_v23 = vadd.f32 %v1215_v20, %v1214_v17  ;;  %v1251_v26 = vadd.f32 %v1250_v16, %v1249_v18  ;;  %v5859_v16 = vld [vmem:[%s9477_s9 + $0x58] sm:$0xff]  ;;  %v5858_v20 = vld [vmem:[%s9477_s9 + $0x50] sm:$0xff] }
 0x253   :  { %v1229_v27 = vadd.f32 %v1228_v24, %v1227_v21  ;;  %v1241_v28 = vadd.f32 %v1240_v25, %v1239_v22  ;;  %v5864_v17 = vld [vmem:[%s9477_s9 + $0x78] sm:$0xff]  ;;  %v5863_v21 = vld [vmem:[%s9477_s9 + $0x70] sm:$0xff]  ;;  %v5857_v24 = vld [vmem:[%s9477_s9 + $0x48] sm:$0xff] }
 0x254   :  { %v1217_v30 = vadd.f32 %v1216_v23, %v1209_v19  ;;  %v1253_v31 = vadd.f32 %v1252_v29, %v1251_v26  ;;  %v5862_v25 = vld [vmem:[%s9477_s9 + $0x68] sm:$0xff]  ;;  %v5856_v26 = vld [vmem:[%s9477_s9 + $0x40] sm:$0xff]  ;;  %v1915_v29 = vld [vmem:[%s9478_s10 + $0x18] sm:$0xff] }
 0x255   :  { %v1230_v32 = vadd.f32 %v1229_v27, %v1209_v19  ;;  %v1242_v33 = vadd.f32 %v1241_v28, %v1209_v19  ;;  %v5861_v27 = vld [vmem:[%s9477_s9 + $0x60] sm:$0xff]  ;;  %v5869_v28 = vld [vmem:[%s9478_s10 + $0x38] sm:$0xff] }
 0x256   :  { %vm1218_vm6 = vcmp.ge.f32.partialorder %v1217_v30, 0.0  ;;  %v1219_v34 = vmul.f32 0.01, %v1217_v30  ;;  %v1254_v3 = vadd.f32 %v1253_v31, %v1209_v19  ;;  %v1914_v31 = vld [vmem:[%s9478_s10 + $0x10] sm:$0xff] }
 0x257   :  { %vm1231_vm8 = vcmp.ge.f32.partialorder %v1230_v32, 0.0  ;;  %v1232_v35 = vmul.f32 0.01, %v1230_v32  ;;  %vm1243_vm9 = vcmp.ge.f32.partialorder %v1242_v33, 0.0  ;;  %v1244_v36 = vmul.f32 0.01, %v1242_v33 }
 0x258   :  { %v1220_v37 = vsel %vm1218_vm6, %v1217_v30, %v1219_v34  ;;  %vm1255_vm10 = vcmp.ge.f32.partialorder %v1254_v3, 0.0  ;;  %v1256_v38 = vmul.f32 0.01, %v1254_v3  ;;  %v5868_v30 = vld [vmem:[%s9478_s10 + $0x30] sm:$0xff]  ;;  %v5866_v34 = vld [vmem:[%s9478_s10 + $0x20] sm:$0xff]  ;;  %vm2324_vm6 = vcmask 130048  }
 0x259   :  { %1222 = vst.msk [vmem:[#allocation5] sm:$0x1] %vm1221_vm7, %v1220_v37  ;;  %v1233_v39 = vsel %vm1231_vm8, %v1230_v32, %v1232_v35  ;;  %v1245_v40 = vsel %vm1243_vm9, %v1242_v33, %v1244_v36  ;;  %v5867_v32 = vld [vmem:[%s9478_s10 + $0x28] sm:$0xff]  ;;  %v5875_v35 = vld [vmem:[%s9478_s10 + $0x58] sm:$0xff]  ;;  %v5874_v37 = vld [vmem:[%s9478_s10 + $0x50] sm:$0xff] }
 0x25a   :  { %1234 = vst.msk [vmem:[#allocation5 + $0x1] sm:$0x1] %vm1221_vm7, %v1233_v39  ;;  %1246 = vst.msk [vmem:[#allocation5 + $0x2] sm:$0x1] %vm1221_vm7, %v1245_v40  ;;  %v1257_v41 = vsel %vm1255_vm10, %v1254_v3, %v1256_v38  ;;  %v1913_v33 = vld [vmem:[%s9478_s10 + $0x8] sm:$0xff]  ;;  %v1912_v3 = vld [vmem:[%s9478_s10] sm:$0xff] }
 0x25b   :  { %1258 = vst.msk [vmem:[#allocation5 + $0x3] sm:$0x1] %vm1221_vm7, %v1257_v41  ;;  %v5880_v36 = vld [vmem:[%s9478_s10 + $0x78] sm:$0xff]  ;;  %v5879_v38 = vld [vmem:[%s9478_s10 + $0x70] sm:$0xff]  ;;  %v5873_v39 = vld [vmem:[%s9478_s10 + $0x48] sm:$0xff] }
 0x25c   :  { %v5878_v40 = vld [vmem:[%s9478_s10 + $0x68] sm:$0xff]  ;;  %v5872_v41 = vld [vmem:[%s9478_s10 + $0x40] sm:$0xff] }
 0x262   :  { %v7814_v42 = vld [vmem:[#allocation5] sm:$0xf] }
 0x263   :  { %1263 = vst.msk [vmem:[#allocation2 + $0x1] sm:$0xf] %vm1262_vm11, %v7814_v42 }
 0x26a   :  { %v1265_v44 = vld [vmem:[#allocation2 + $0x1] sm:$0xf] }
 0x26b   :  { %v1267_v45 = vld [vmem:[#allocation2 + $0x3] sm:$0xf]  ;;  %6527 = vmatmul.mubr.msk.f32.vlgmr.msra.gmra.mxu1 %vm1132_vm5, %v1265_v44  ;;  %v2219_v44 = vld [vmem:[%s9479_s11 + $0x18] sm:$0xff] }
 0x26c   :  { %6560 = vmatmul.mubr.msk.f32.vlgmr.msra.gmra.mxu0 %vm1132_vm5, %v1267_v45  ;;  %v1264_v47 = vld [vmem:[#allocation2] sm:$0xf]  ;;  %6530 = vmatpush3.msra.mxu1 %v1271_v43  ;;  %v2218_v45 = vld [vmem:[%s9479_s11 + $0x10] sm:$0xff] }
 0x26d   :  { %v1266_v48 = vld [vmem:[#allocation2 + $0x2] sm:$0xf]  ;;  %6537 = vmatprep.mubr.msk.f32.mxu1 %vm7289_vm2, %v9494_v0  ;;  %6531 = vmatprep.subr.mxu1 %v9494_v0 }
 0x26e   :  { %1592 = vst.msk [vmem:[#allocation2] sm:$0xff] %vm156_vm0, %v9494_v0  ;;  %6581 = vmatprep.mubr.msk.f32.mxu0 %vm7289_vm2, %v9494_v0  ;;  %6532 = vmatpush3.msra.mxu1 %v1270_v46  ;;  %v5877_v43 = vld [vmem:[%s9478_s10 + $0x60] sm:$0xff]  ;;  %v2217_v46 = vld [vmem:[%s9479_s11 + $0x8] sm:$0xff] }
 0x26f   :  { %6533 = vmatprep.subr.mxu1 %v9494_v0  ;;  %6574 = vmatpush3.msra.mxu0 %v1602_v56 }
 0x270   :  { %6534 = vmatpush3.msra.mxu1 %v1269_v49  ;;  %6575 = vmatprep.subr.mxu0 %v9494_v0  ;;  %v2322_v49 = vld [vmem:[%s9481_s13] sm:$0xff] }
 0x271   :  { %6535 = vmatprep.subr.mxu1 %v9494_v0  ;;  %6576 = vmatpush3.msra.mxu0 %v1601_v58 }
 0x272   :  { %6536 = vmatpush3.msra.mxu1 %v1268_v50  ;;  %6577 = vmatprep.subr.mxu0 %v9494_v0  ;;  %v2487_v50 = vld [vmem:[#allocation9 + $0x8] sm:$0xff] }
 0x273   :  { %6538 = vmatmul.mubr.msk.f32.vlgmr.msra.gmra.mxu1 %vm1132_vm5, %v1264_v47  ;;  %6540 = vmatprep.subr.mxu1 %v9494_v0  ;;  %v2216_v47 = vld [vmem:[%s9479_s11] sm:$0xff] }
 0x274   :  { %6541 = vmatpush3.msra.mxu1 %v5842_v51  ;;  %6548 = vmatprep.mubr.msk.f32.mxu1 %vm7289_vm2, %v9494_v0 }
 0x275   :  { %6542 = vmatprep.subr.mxu1 %v9494_v0  ;;  %6578 = vmatpush3.msra.mxu0 %v1600_v60 }
 0x276   :  { %6543 = vmatpush3.msra.mxu1 %v5841_v52  ;;  %6579 = vmatprep.subr.mxu0 %v9494_v0  ;;  %v2634_v52 = vld [vmem:[#allocation9 + $0x10] sm:$0xff] }
 0x277   :  { %6544 = vmatprep.subr.mxu1 %v9494_v0  ;;  %6580 = vmatpush3.msra.mxu0 %v1599_v62 }
 0x278   :  { %6545 = vmatpush3.msra.mxu1 %v5840_v53  ;;  %6595 = vmatprep.subr.mxu0 %v9494_v0 }
 0x279   :  { %6546 = vmatprep.subr.mxu1 %v9494_v0 }
 0x27a   :  { %6547 = vmatpush3.msra.mxu1 %v5839_v54 }
 0x27b   :  { %6549 = vmatmul.mubr.msk.f32.vlgmr.msra.gmra.mxu1 %vm1132_vm5, %v1266_v48  ;;  %6562 = vmatprep.subr.mxu1 %v9494_v0  ;;  %v2323_v48 = vld [vmem:[%s9481_s13 + $0x8] sm:$0xff] }
 0x27c   :  { %6570 = vmatprep.mubr.msk.f32.mxu1 %vm7289_vm2, %v9494_v0  ;;  %6563 = vmatpush3.msra.mxu1 %v5853_v55 }
 0x27d   :  { %6564 = vmatprep.subr.mxu1 %v9494_v0 }
 0x27e   :  { %6565 = vmatpush3.msra.mxu1 %v5852_v57 }
 0x27f   :  { %6566 = vmatprep.subr.mxu1 %v9494_v0 }
 0x280   :  { %6567 = vmatpush3.msra.mxu1 %v5851_v59 }
 0x281   :  { %6568 = vmatprep.subr.mxu1 %v9494_v0 }
 0x282   :  { %6569 = vmatpush3.msra.mxu1 %v5850_v61 }
 0x283   :  { %6584 = vmatprep.subr.mxu1 %v9494_v0 }
 0x32b   :  { %v1346_v63 = vpop.f32.mrf.mxu1 }
 0x32c   :  { %v1576_v1 = vpop.f32.mrf.mxu0 }
 0x32d   :  { %v6528_v2 = vpop.f32.mrf.mxu1 }
 0x32e   :  { %v6561_v4 = vpop.f32.mrf.mxu0 }
 0x333   :  { %v1419_v5 = vpop.f32.mrf.mxu1 }
 0x334   :  { %v1420_v7 = vadd.f32 %v1419_v5, %v1346_v63 }
 0x335   :  { %v6539_v6 = vpop.f32.mrf.mxu1 }
 0x33b   :  { %v1497_v8 = vpop.f32.mrf.mxu1 }
 0x33c   :  { %v1501_v9 = vadd.f32 %v1497_v8, %v1420_v7 }
 0x33d   :  { %v6550_v11 = vpop.f32.mrf.mxu1 }
 0x33e   :  { %v1580_v12 = vadd.f32 %v1576_v1, %v1501_v9 }
 0x340   :  { %v1588_v13 = vadd.f32 %v5849_v10, %v1580_v12 }
 0x342   :  { %vm1589_vm12 = vcmp.ge.f32.partialorder %v1588_v13, 0.0  ;;  %v1590_v14 = vmul.f32 0.01, %v1588_v13 }
 0x344   :  { %v1591_v15 = vsel %vm1589_vm12, %v1588_v13, %v1590_v14 }
 0x345   :  { %1594 = vst.msk [vmem:[#allocation2 + $0x1] sm:$0xf] %vm1262_vm11, %v1591_v15 }
 0x34c   :  { %v1596_v18 = vld [vmem:[#allocation2 + $0x1] sm:$0xf] }
 0x34d   :  { %v1595_v19 = vld [vmem:[#allocation2] sm:$0xf]  ;;  %6571 = vmatmul.mubr.msk.f32.vlgmr.msra.gmra.mxu1 %vm1132_vm5, %v1596_v18 }
 0x34e   :  { %6582 = vmatmul.mubr.msk.f32.vlgmr.msra.gmra.mxu0 %vm1132_vm5, %v1595_v19  ;;  %v7911_v22 = vld [vmem:[#allocation2 + $0x2] sm:$0xf]  ;;  %6585 = vmatpush3.msra.mxu1 %v5859_v16 }
 0x34f   :  { %v7913_v23 = vld [vmem:[#allocation2 + $0x3] sm:$0xf]  ;;  %6596 = vmatpush3.msra.mxu0 %v5864_v17  ;;  %6586 = vmatprep.subr.mxu1 %v9494_v0 }
 0x350   :  { %2479 = vst.msk [vmem:[#allocation2] sm:$0xff] %vm156_vm0, %v9494_v0  ;;  %6597 = vmatprep.subr.mxu0 %v9494_v0  ;;  %6587 = vmatpush3.msra.mxu1 %v5858_v20 }
 0x351   :  { %6598 = vmatpush3.msra.mxu0 %v5863_v21  ;;  %6588 = vmatprep.subr.mxu1 %v9494_v0 }
 0x352   :  { %6599 = vmatprep.subr.mxu0 %v9494_v0  ;;  %6589 = vmatpush3.msra.mxu1 %v5857_v24 }
 0x353   :  { %6600 = vmatpush3.msra.mxu0 %v5862_v25  ;;  %6590 = vmatprep.subr.mxu1 %v9494_v0 }
 0x354   :  { %6601 = vmatprep.subr.mxu0 %v9494_v0  ;;  %6591 = vmatpush3.msra.mxu1 %v5856_v26 }
 0x355   :  { %6592 = vmatprep.mubr.msk.f32.mxu1 %vm7289_vm2, %v9494_v0  ;;  %6602 = vmatpush3.msra.mxu0 %v5861_v27 }
 0x356   :  { %6603 = vmatprep.mubr.msk.f32.mxu0 %vm7289_vm2, %v9494_v0  ;;  %6593 = vmatmul.mubr.msk.f32.vlgmr.msra.gmra.mxu1 %vm1132_vm5, %v7911_v22 }
 0x357   :  { %6604 = vmatmul.mubr.msk.f32.vlgmr.msra.gmra.mxu0 %vm1132_vm5, %v7913_v23  ;;  %6606 = vmatprep.subr.mxu1 %v9494_v0 }
 0x358   :  { %6617 = vmatprep.subr.mxu0 %v9494_v0  ;;  %6607 = vmatpush3.msra.mxu1 %v5869_v28 }
 0x359   :  { %6618 = vmatpush3.msra.mxu0 %v1915_v29  ;;  %6608 = vmatprep.subr.mxu1 %v9494_v0 }
 0x35a   :  { %6619 = vmatprep.subr.mxu0 %v9494_v0  ;;  %6609 = vmatpush3.msra.mxu1 %v5868_v30 }
 0x35b   :  { %6620 = vmatpush3.msra.mxu0 %v1914_v31  ;;  %6610 = vmatprep.subr.mxu1 %v9494_v0  ;;  %v2294_v31 = vld [vmem:[#allocation18] sm:$0x1] }
 0x35c   :  { %6621 = vmatprep.subr.mxu0 %v9494_v0  ;;  %6611 = vmatpush3.msra.mxu1 %v5867_v32 }
 0x35d   :  { %6622 = vmatpush3.msra.mxu0 %v1913_v33  ;;  %6612 = vmatprep.subr.mxu1 %v9494_v0 }
 0x35e   :  { %6623 = vmatprep.subr.mxu0 %v9494_v0  ;;  %6613 = vmatpush3.msra.mxu1 %v5866_v34 }
 0x35f   :  { %6614 = vmatprep.mubr.msk.f32.mxu1 %vm7289_vm2, %v9494_v0  ;;  %6624 = vmatpush3.msra.mxu0 %v1912_v3 }
 0x360   :  { %6625 = vmatprep.mubr.msk.f32.mxu0 %vm7289_vm2, %v9494_v0  ;;  %6615 = vmatmul.mubr.msk.f32.vlgmr.msra.gmra.mxu1 %vm1132_vm5, %v1596_v18 }
 0x361   :  { %6626 = vmatmul.mubr.msk.f32.vlgmr.msra.gmra.mxu0 %vm1132_vm5, %v1595_v19  ;;  %6628 = vmatprep.subr.mxu1 %v9494_v0 }
 0x362   :  { %6639 = vmatprep.subr.mxu0 %v9494_v0  ;;  %6629 = vmatpush3.msra.mxu1 %v5875_v35 }
 0x363   :  { %6640 = vmatpush3.msra.mxu0 %v5880_v36  ;;  %6630 = vmatprep.subr.mxu1 %v9494_v0 }
 0x364   :  { %6641 = vmatprep.subr.mxu0 %v9494_v0  ;;  %6631 = vmatpush3.msra.mxu1 %v5874_v37 }
 0x365   :  { %6642 = vmatpush3.msra.mxu0 %v5879_v38  ;;  %6632 = vmatprep.subr.mxu1 %v9494_v0 }
 0x366   :  { %6643 = vmatprep.subr.mxu0 %v9494_v0  ;;  %6633 = vmatpush3.msra.mxu1 %v5873_v39  ;;  %v2401_v39 = vld [vmem:[%s9481_s13 + $0x18] sm:$0xff] }
 0x367   :  { %6644 = vmatpush3.msra.mxu0 %v5878_v40  ;;  %6634 = vmatprep.subr.mxu1 %v9494_v0 }
 0x368   :  { %6645 = vmatprep.subr.mxu0 %v9494_v0  ;;  %6635 = vmatpush3.msra.mxu1 %v5872_v41  ;;  %v2400_v41 = vld [vmem:[%s9481_s13 + $0x10] sm:$0xff] }
 0x369   :  { %6636 = vmatprep.mubr.msk.f32.mxu1 %vm7289_vm2, %v9494_v0  ;;  %6646 = vmatpush3.msra.mxu0 %v5877_v43  ;;  %v2486_v43 = vld [vmem:[#allocation9] sm:$0xff] }
 0x36a   :  { %6647 = vmatprep.mubr.msk.f32.mxu0 %vm7289_vm2, %v9494_v0  ;;  %6637 = vmatmul.mubr.msk.f32.vlgmr.msra.gmra.mxu1 %vm1132_vm5, %v7911_v22 }
 0x36b   :  { %6648 = vmatmul.mubr.msk.f32.vlgmr.msra.gmra.mxu0 %vm1132_vm5, %v7913_v23  ;;  %6650 = vmatprep.subr.mxu1 %v9494_v0 }
 0x36c   :  { %6658 = vmatprep.mubr.msk.f32.mxu1 %vm7289_vm2, %v9494_v0  ;;  %6651 = vmatpush3.msra.mxu1 %v2219_v44 }
 0x36d   :  { %6661 = vmatprep.subr.mxu0 %v9494_v0  ;;  %6652 = vmatprep.subr.mxu1 %v9494_v0 }
 0x36e   :  { %6665 = vmatprep.mubr.msk.f32.mxu0 %vm7289_vm2, %v9494_v0  ;;  %6653 = vmatpush3.msra.mxu1 %v2218_v45  ;;  %v2709_v45 = vld [vmem:[#allocation9 + $0x18] sm:$0xff] }
 0x36f   :  { %6654 = vmatprep.subr.mxu1 %v9494_v0  ;;  %6662 = vmatpush3.msra.mxu0 %v2323_v48 }
 0x370   :  { %6655 = vmatpush3.msra.mxu1 %v2217_v46  ;;  %6663 = vmatprep.subr.mxu0 %v9494_v0 }
 0x371   :  { %6656 = vmatprep.subr.mxu1 %v9494_v0  ;;  %6664 = vmatpush3.msra.mxu0 %v2322_v49 }
 0x372   :  { %6657 = vmatpush3.msra.mxu1 %v2216_v47  ;;  %6668 = vmatprep.subr.mxu0 %v9494_v0 }
 0x373   :  { %6659 = vmatmul.mubr.msk.f32.vlgmr.msra.gmra.mxu1 %vm1132_vm5, %v7814_v42  ;;  %6675 = vmatprep.subr.mxu1 %v9494_v0  ;;  %v8058_v42 = vld [vmem:[%s9508_s29 + $0x8] sm:$0xff] }
 0x374   :  { %6677 = vmatprep.mubr.msk.f32.mxu1 %vm7289_vm2, %v9494_v0  ;;  %2481 = vst.msk [vmem:[#allocation2 + $0x1] sm:$0xff] %vm160_vm3, %v8058_v42  ;;  %6676 = vmatpush3.msra.mxu1 %v2487_v50  ;;  %v5898_v50 = vld [vmem:[%s9509_s3 + $0x78] sm:$0xff] }
 0x375   :  { %6685 = vmatprep.subr.mxu1 %v9494_v0 }
 0x37b   :  { %v2483_v51 = vld [vmem:[#allocation2 + $0x1] sm:$0xff] }
 0x37c   :  { %6678 = vmatmul.mubr.msk.f32.vlgmr.msra.gmra.mxu1 %vm160_vm3, %v2483_v51  ;;  %v2484_v53 = vld [vmem:[#allocation2 + $0x2] sm:$0xff]  ;;  %v2809_v51 = vld [vmem:[%s9509_s3 + $0x38] sm:$0xff] }
 0x37d   :  { %6686 = vmatpush3.msra.mxu1 %v2634_v52  ;;  %6687 = vmatprep.mubr.msk.f32.mxu1 %vm7289_vm2, %v9494_v0  ;;  %v8067_v54 = vld [vmem:[#allocation2] sm:$0xff]  ;;  %v5897_v52 = vld [vmem:[%s9509_s3 + $0x70] sm:$0xff] }
 0x37e   :  { %6695 = vmatprep.subr.mxu1 %v9494_v0  ;;  %v8070_v55 = vld [vmem:[#allocation2 + $0x3] sm:$0xff] }
 0x37f   :  { %2795 = vst.msk [vmem:[#allocation2] sm:$0xff] %vm156_vm0, %v9494_v0 }
 0x380   :  { %6688 = vmatmul.mubr.msk.f32.vlgmr.msra.gmra.mxu1 %vm160_vm3, %v2484_v53  ;;  %2796 = vst.msk [vmem:[#allocation2 + $0x8] sm:$0x7] %vm158_vm1, %v9494_v0  ;;  %v2808_v53 = vld [vmem:[%s9509_s3 + $0x30] sm:$0xff] }
 0x381   :  { %6711 = vmatprep.mubr.msk.f32.mxu1 %vm7289_vm2, %v9494_v0  ;;  %6696 = vmatpush3.msra.mxu1 %v5898_v50  ;;  %v5922_v50 = vld [vmem:[%s9510_s28 + $0x58] sm:$0xff] }
 0x382   :  { %6697 = vmatprep.subr.mxu1 %v9494_v0 }
 0x383   :  { %6698 = vmatpush3.msra.mxu1 %v5897_v52  ;;  %v5921_v52 = vld [vmem:[%s9510_s28 + $0x50] sm:$0xff] }
 0x384   :  { %6699 = vmatprep.subr.mxu1 %v9494_v0 }
 0x40d   :  { %v1677_v56 = vpop.f32.mrf.mxu1 }
 0x40e   :  { %v1750_v57 = vpop.f32.mrf.mxu0 }
 0x40f   :  { %v6572_v58 = vpop.f32.mrf.mxu1  ;;  %v1751_v6 = vadd.f32 %v1750_v57, %v1677_v56  ;;  %v5895_v56 = vld [vmem:[%s9509_s3 + $0x60] sm:$0xff] }
 0x410   :  { %v6583_v59 = vpop.f32.mrf.mxu0  ;;  %v2806_v57 = vld [vmem:[%s9509_s3 + $0x20] sm:$0xff]  ;;  %v5894_v58 = vld [vmem:[%s9509_s3 + $0x58] sm:$0xff] }
 0x411   :  { %v2805_v59 = vld [vmem:[%s9509_s3 + $0x18] sm:$0xff] }
 0x416   :  { %v1828_v60 = vpop.f32.mrf.mxu1 }
 0x417   :  { %v1907_v61 = vpop.f32.mrf.mxu0  ;;  %v1832_v7 = vadd.f32 %v1828_v60, %v1751_v6  ;;  %v5893_v60 = vld [vmem:[%s9509_s3 + $0x50] sm:$0xff] }
 0x418   :  { %v6594_v62 = vpop.f32.mrf.mxu1 }
 0x419   :  { %v6605_v63 = vpop.f32.mrf.mxu0  ;;  %v1911_v14 = vadd.f32 %v1907_v61, %v1832_v7  ;;  %v2804_v61 = vld [vmem:[%s9509_s3 + $0x10] sm:$0xff]  ;;  %v5892_v62 = vld [vmem:[%s9509_s3 + $0x48] sm:$0xff] }
 0x41a   :  { %v2803_v63 = vld [vmem:[%s9509_s3 + $0x8] sm:$0xff] }
 0x420   :  { %v1987_v1 = vpop.f32.mrf.mxu1 }
 0x421   :  { %v2057_v2 = vpop.f32.mrf.mxu0 }
 0x422   :  { %v6616_v4 = vpop.f32.mrf.mxu1  ;;  %v2058_v8 = vadd.f32 %v2057_v2, %v1987_v1  ;;  %v5891_v1 = vld [vmem:[%s9509_s3 + $0x40] sm:$0xff] }
 0x423   :  { %v6627_v5 = vpop.f32.mrf.mxu0  ;;  %v2802_v2 = vld [vmem:[%s9509_s3] sm:$0xff] }
 0x424   :  { %v2320_v4 = vld [vmem:[#allocation20] sm:$0x1] }
 0x42a   :  { %v2132_v9 = vpop.f32.mrf.mxu1 }
 0x42b   :  { %v2208_v10 = vpop.f32.mrf.mxu0  ;;  %v2136_v11 = vadd.f32 %v2132_v9, %v2058_v8 }
 0x42c   :  { %v6638_v12 = vpop.f32.mrf.mxu1 }
 0x42d   :  { %v6649_v13 = vpop.f32.mrf.mxu0  ;;  %v2212_v15 = vadd.f32 %v2208_v10, %v2136_v11 }
 0x42f   :  { %v2213_v16 = vmax.f32 %v1911_v14, %v2212_v15 }
 0x431   :  { %2215 = vst.msk [vmem:[#allocation3] sm:$0xf] %vm2214_vm13, %v2213_v16  ;;  %v5890_v16 = vld [vmem:[#allocation12] ss:$0 sm:$0xff] }
 0x433   :  { %v2289_v17 = vpop.f32.mrf.mxu1 }
 0x434   :  { %2293 = vst.msk [vmem:[#allocation4] sm:$0xf] %vm2214_vm13, %v2289_v17 }
 0x435   :  { %v6660_v18 = vpop.f32.mrf.mxu1 }
 0x438   :  { %v2295_v19 = vld [vmem:[#allocation3] sm:$0x1]  ;;  %v2296_v20 = vld [vmem:[#allocation3 + $0x1] sm:$0x1]  ;;  %v2308_v21 = vld [vmem:[#allocation3 + $0x2] sm:$0x1] }
 0x439   :  { %v2297_v22 = vmax.f32 %v2295_v19, %v2296_v20  ;;  %v2309_v23 = vld [vmem:[#allocation3 + $0x3] sm:$0x1] }
 0x43a   :  { %v2310_v24 = vmax.f32 %v2308_v21, %v2309_v23  ;;  %v5917_v23 = vld [vmem:[%s9509_s3 + $0xf8] sm:$0xff] }
 0x43b   :  { %v2298_v25 = vld [vmem:[#allocation4] sm:$0x1]  ;;  %v2311_v26 = vld [vmem:[#allocation4 + $0x2] sm:$0x1]  ;;  %v2300_v29 = vld [vmem:[#allocation4 + $0x1] sm:$0x1] }
 0x43c   :  { %v2299_v27 = vadd.f32 %v2298_v25, %v2297_v22  ;;  %v2312_v28 = vadd.f32 %v2311_v26, %v2310_v24  ;;  %v2313_v30 = vld [vmem:[#allocation4 + $0x3] sm:$0x1]  ;;  %v2557_v46 = vpop.f32.mrf.mxu1  ;;  %v5907_v26 = vld [vmem:[%s9509_s3 + $0xb0] sm:$0xff] }
 0x43d   :  { %v5908_v22 = vld [vmem:[%s9509_s3 + $0xb8] sm:$0xff] }
 0x43e   :  { %v2301_v32 = vadd.f32 %v2300_v29, %v2299_v27  ;;  %v2314_v33 = vadd.f32 %v2313_v30, %v2312_v28  ;;  %v6679_v47 = vpop.f32.mrf.mxu1  ;;  %v5916_v27 = vld [vmem:[%s9509_s3 + $0xf0] sm:$0xff]  ;;  %v5906_v30 = vld [vmem:[%s9509_s3 + $0xa8] sm:$0xff] }
 0x43f   :  { %v3133_v47 = vld [vmem:[%s9510_s28 + $0x28] sm:$0xff] }
 0x440   :  { %v2302_v34 = vadd.f32 %v2301_v32, %v2294_v31  ;;  %v2315_v3 = vadd.f32 %v2314_v33, %v2294_v31  ;;  %v2704_v48 = vpop.f32.mrf.mxu1  ;;  %v5915_v31 = vld [vmem:[%s9509_s3 + $0xe8] sm:$0xff]  ;;  %v5905_v32 = vld [vmem:[%s9509_s3 + $0xa0] sm:$0xff] }
 0x441   :  { %v5914_v33 = vld [vmem:[%s9509_s3 + $0xe0] sm:$0xff] }
 0x442   :  { %vm2303_vm15 = vcmp.ge.f32.partialorder %v2302_v34, 0.0  ;;  %v2304_v35 = vmul.f32 0.01, %v2302_v34  ;;  %vm2316_vm4 = vcmp.ge.f32.partialorder %v2315_v3, 0.0  ;;  %v2317_v36 = vmul.f32 0.01, %v2315_v3  ;;  %v6689_v49 = vpop.f32.mrf.mxu1 }
 0x443   :  { %v3132_v49 = vld [vmem:[%s9510_s28 + $0x20] sm:$0xff] }
 0x444   :  { %v2305_v37 = vsel %vm2303_vm15, %v2302_v34, %v2304_v35  ;;  %v2318_v38 = vsel %vm2316_vm4, %v2315_v3, %v2317_v36  ;;  %v5904_v34 = vld [vmem:[%s9509_s3 + $0x98] sm:$0xff]  ;;  %v5903_v35 = vld [vmem:[%s9509_s3 + $0x90] sm:$0xff] }
 0x445   :  { %2307 = vst.msk [vmem:[#allocation5] sm:$0x1] %vm2306_vm14, %v2305_v37  ;;  %2319 = vst.msk [vmem:[#allocation5 + $0x1] sm:$0x1] %vm2306_vm14, %v2318_v38  ;;  %v5913_v3 = vld [vmem:[%s9509_s3 + $0xd8] sm:$0xff]  ;;  %v5912_v36 = vld [vmem:[%s9509_s3 + $0xd0] sm:$0xff] }
 0x446   :  { %v5902_v37 = vld [vmem:[%s9509_s3 + $0x88] sm:$0xff] }
 0x447   :  { %v5911_v38 = vld [vmem:[%s9509_s3 + $0xc8] sm:$0xff] }
 0x44c   :  { %v2321_v40 = vld [vmem:[#allocation5] sm:$0x1]  ;;  %v2399_v44 = vld [vmem:[#allocation5 + $0x1] sm:$0x1] }
 0x44d   :  { %6666 = vmatmul.mubr.msk.f32.vlgmr.msra.gmra.mxu0 %vm2324_vm6, %v2321_v40  ;;  %v5910_v40 = vld [vmem:[%s9509_s3 + $0xc0] sm:$0xff] }
 0x44e   :  { %6669 = vmatpush3.msra.mxu0 %v2401_v39  ;;  %6672 = vmatprep.mubr.msk.f32.mxu0 %vm7289_vm2, %v9494_v0  ;;  %v5901_v39 = vld [vmem:[%s9509_s3 + $0x80] sm:$0xff] }
 0x44f   :  { %6670 = vmatprep.subr.mxu0 %v9494_v0 }
 0x450   :  { %6671 = vmatpush3.msra.mxu0 %v2400_v41  ;;  %v5926_v41 = vld [vmem:[%s9510_s28 + $0x78] sm:$0xff] }
 0x451   :  { %6680 = vmatprep.subr.mxu0 %v9494_v0  ;;  %6673 = vmatmul.mubr.msk.f32.vlgmr.msra.gmra.mxu0 %vm2324_vm6, %v2399_v44  ;;  %v5925_v44 = vld [vmem:[%s9510_s28 + $0x70] sm:$0xff] }
 0x452   :  { %6681 = vmatpush3.msra.mxu0 %v2486_v43  ;;  %6682 = vmatprep.mubr.msk.f32.mxu0 %vm7289_vm2, %v9494_v0  ;;  %v3135_v43 = vld [vmem:[%s9510_s28 + $0x38] sm:$0xff] }
 0x453   :  { %6690 = vmatprep.subr.mxu0 %v9494_v0 }
 0x455   :  { %6683 = vmatmul.mubr.msk.f32.vlgmr.msra.gmra.mxu0 %vm160_vm3, %v8067_v54  ;;  %v5896_v54 = vld [vmem:[%s9509_s3 + $0x68] sm:$0xff] }
 0x456   :  { %6691 = vmatpush3.msra.mxu0 %v2709_v45  ;;  %6692 = vmatprep.mubr.msk.f32.mxu0 %vm7289_vm2, %v9494_v0  ;;  %v3134_v45 = vld [vmem:[%s9510_s28 + $0x30] sm:$0xff] }
 0x457   :  { %6714 = vmatprep.subr.mxu0 %v9494_v0  ;;  %6700 = vmatpush3.msra.mxu1 %v5896_v54  ;;  %v5920_v54 = vld [vmem:[%s9510_s28 + $0x48] sm:$0xff] }
 0x458   :  { %6701 = vmatprep.subr.mxu1 %v9494_v0 }
 0x459   :  { %6693 = vmatmul.mubr.msk.f32.vlgmr.msra.gmra.mxu0 %vm160_vm3, %v8070_v55  ;;  %v2807_v55 = vld [vmem:[%s9509_s3 + $0x28] sm:$0xff]  ;;  %6702 = vmatpush3.msra.mxu1 %v5895_v56  ;;  %v5919_v56 = vld [vmem:[%s9510_s28 + $0x40] sm:$0xff] }
 0x45a   :  { %6730 = vmatprep.mubr.msk.f32.mxu0 %vm7289_vm2, %v9494_v0  ;;  %6715 = vmatpush3.msra.mxu0 %v2809_v51  ;;  %v3131_v51 = vld [vmem:[%s9510_s28 + $0x18] sm:$0xff] }
 0x45b   :  { %6716 = vmatprep.subr.mxu0 %v9494_v0  ;;  %6703 = vmatprep.subr.mxu1 %v9494_v0 }
 0x45c   :  { %6717 = vmatpush3.msra.mxu0 %v2808_v53  ;;  %6704 = vmatpush3.msra.mxu1 %v5894_v58  ;;  %v3130_v53 = vld [vmem:[%s9510_s28 + $0x10] sm:$0xff]  ;;  %v5936_v58 = vld [vmem:[%s9510_s28 + $0xb8] sm:$0xff] }
 0x45d   :  { %6718 = vmatprep.subr.mxu0 %v9494_v0  ;;  %6705 = vmatprep.subr.mxu1 %v9494_v0 }
 0x45e   :  { %6719 = vmatpush3.msra.mxu0 %v2807_v55  ;;  %6706 = vmatpush3.msra.mxu1 %v5893_v60  ;;  %v3129_v55 = vld [vmem:[%s9510_s28 + $0x8] sm:$0xff]  ;;  %v5935_v60 = vld [vmem:[%s9510_s28 + $0xb0] sm:$0xff] }
 0x45f   :  { %6720 = vmatprep.subr.mxu0 %v9494_v0  ;;  %6707 = vmatprep.subr.mxu1 %v9494_v0 }
 0x460   :  { %6721 = vmatpush3.msra.mxu0 %v2806_v57  ;;  %6708 = vmatpush3.msra.mxu1 %v5892_v62  ;;  %v3128_v57 = vld [vmem:[%s9510_s28] sm:$0xff]  ;;  %v5934_v62 = vld [vmem:[%s9510_s28 + $0xa8] sm:$0xff] }
 0x461   :  { %6722 = vmatprep.subr.mxu0 %v9494_v0  ;;  %6709 = vmatprep.subr.mxu1 %v9494_v0 }
 0x462   :  { %6723 = vmatpush3.msra.mxu0 %v2805_v59  ;;  %6710 = vmatpush3.msra.mxu1 %v5891_v1  ;;  %v5945_v59 = vld [vmem:[%s9510_s28 + $0xf8] sm:$0xff]  ;;  %v5933_v1 = vld [vmem:[%s9510_s28 + $0xa0] sm:$0xff] }
 0x463   :  { %6724 = vmatprep.subr.mxu0 %v9494_v0  ;;  %6733 = vmatprep.subr.mxu1 %v9494_v0 }
 0x464   :  { %6725 = vmatpush3.msra.mxu0 %v2804_v61  ;;  %v5944_v61 = vld [vmem:[%s9510_s28 + $0xf0] sm:$0xff] }
 0x465   :  { %6726 = vmatprep.subr.mxu0 %v9494_v0 }
 0x466   :  { %6727 = vmatpush3.msra.mxu0 %v2803_v63  ;;  %v5943_v63 = vld [vmem:[%s9510_s28 + $0xe8] sm:$0xff] }
 0x467   :  { %6728 = vmatprep.subr.mxu0 %v9494_v0 }
 0x468   :  { %6729 = vmatpush3.msra.mxu0 %v2802_v2  ;;  %v5942_v2 = vld [vmem:[%s9510_s28 + $0xe0] sm:$0xff] }
 0x469   :  { %6752 = vmatprep.subr.mxu0 %v9494_v0 }
 0x50d   :  { %v2394_v5 = vpop.f32.mrf.mxu0 }
 0x50e   :  { %v2398_v7 = vadd.f32 %v2394_v5, %v2320_v4  ;;  %v5932_v4 = vld [vmem:[%s9510_s28 + $0x98] sm:$0xff] }
 0x50f   :  { %v6667_v6 = vpop.f32.mrf.mxu0  ;;  %v5941_v5 = vld [vmem:[%s9510_s28 + $0xd8] sm:$0xff] }
 0x510   :  { %v5931_v6 = vld [vmem:[%s9510_s28 + $0x90] sm:$0xff] }
 0x511   :  { %v2471_v8 = vpop.f32.mrf.mxu0 }
 0x512   :  { %v2475_v9 = vadd.f32 %v2471_v8, %v2398_v7  ;;  %v5940_v7 = vld [vmem:[%s9510_s28 + $0xd0] sm:$0xff]  ;;  %v5930_v8 = vld [vmem:[%s9510_s28 + $0x88] sm:$0xff] }
 0x513   :  { %v6674_v10 = vpop.f32.mrf.mxu0 }
 0x514   :  { %2476 = vst [vmem:[#allocation7] sm:$0x1] %v2475_v9  ;;  %v5939_v9 = vld [vmem:[%s9510_s28 + $0xc8] sm:$0xff]  ;;  %v5929_v10 = vld [vmem:[%s9510_s28 + $0x80] sm:$0xff] }
 0x515   :  { %v2630_v11 = vpop.f32.mrf.mxu0 }
 0x516   :  { %v2631_v12 = vadd.f32 %v2630_v11, %v2557_v46  ;;  %v5924_v46 = vld [vmem:[%s9510_s28 + $0x68] sm:$0xff]  ;;  %v5938_v11 = vld [vmem:[%s9510_s28 + $0xc0] sm:$0xff] }
 0x517   :  { %v6684_v13 = vpop.f32.mrf.mxu0 }
 0x518   :  { %v2708_v14 = vadd.f32 %v2704_v48, %v2631_v12  ;;  %v5923_v48 = vld [vmem:[%s9510_s28 + $0x60] sm:$0xff]  ;;  %v3444_v12 = vld [vmem:[#allocation14] sm:$0xff] }
 0x519   :  { %v2779_v15 = vpop.f32.mrf.mxu0  ;;  %v5951_v13 = vld [vmem:[%s9475_s7 + $0x38] sm:$0xff] }
 0x51a   :  { %v2783_v17 = vadd.f32 %v2779_v15, %v2708_v14  ;;  %v3579_v14 = vld [vmem:[%s9475_s7 + $0x18] sm:$0xff]  ;;  %v5950_v15 = vld [vmem:[%s9475_s7 + $0x30] sm:$0xff] }
 0x51b   :  { %v6694_v18 = vpop.f32.mrf.mxu0 }
 0x51c   :  { %v2791_v19 = vadd.f32 %v5890_v16, %v2783_v17  ;;  %v5949_v16 = vld [vmem:[%s9475_s7 + $0x28] sm:$0xff]  ;;  %v5948_v18 = vld [vmem:[%s9475_s7 + $0x20] sm:$0xff] }
 0x51d   :  { %v3577_v17 = vld [vmem:[%s9475_s7 + $0x8] sm:$0xff] }
 0x51e   :  { %vm2792_vm8 = vcmp.ge.f32.partialorder %v2791_v19, 0.0  ;;  %v2793_v20 = vmul.f32 0.01, %v2791_v19 }
 0x520   :  { %v2794_v21 = vsel %vm2792_vm8, %v2791_v19, %v2793_v20  ;;  %v3576_v19 = vld [vmem:[%s9475_s7] sm:$0xff] }
 0x521   :  { %2797 = vst.msk [vmem:[#allocation2 + $0x1] sm:$0xff] %vm156_vm0, %v2794_v21 }
 0x528   :  { %v8177_v24 = vld [vmem:[#allocation2 + $0x1] sm:$0xff] }
 0x529   :  { %v8179_v25 = vld [vmem:[#allocation2] sm:$0xff]  ;;  %6712 = vmatmul.mubr.msk.f32.vlgmr.msra.gmra.mxu1 %vm156_vm0, %v8177_v24 }
 0x52a   :  { %6731 = vmatmul.mubr.msk.f32.vlgmr.msra.gmra.mxu0 %vm156_vm0, %v8179_v25  ;;  %v8191_v28 = vld [vmem:[#allocation2 + $0x2] sm:$0xff]  ;;  %6734 = vmatpush3.msra.mxu1 %v5908_v22 }
 0x52b   :  { %v8193_v29 = vld [vmem:[#allocation2 + $0x3] sm:$0xff]  ;;  %6753 = vmatpush3.msra.mxu0 %v5917_v23  ;;  %6735 = vmatprep.subr.mxu1 %v9494_v0 }
 0x52c   :  { %3569 = vst.msk [vmem:[#allocation2] sm:$0xff] %vm156_vm0, %v9494_v0  ;;  %6754 = vmatprep.subr.mxu0 %v9494_v0  ;;  %6736 = vmatpush3.msra.mxu1 %v5907_v26 }
 0x52d   :  { %3570 = vst.msk [vmem:[#allocation2 + $0x8] sm:$0x7] %vm158_vm1, %v9494_v0  ;;  %6755 = vmatpush3.msra.mxu0 %v5916_v27  ;;  %6737 = vmatprep.subr.mxu1 %v9494_v0 }
 0x52e   :  { %3898 = vst.msk [vmem:[#allocation2 + $0x8] sm:$0x7] %vm158_vm1, %v9494_v0  ;;  %6756 = vmatprep.subr.mxu0 %v9494_v0  ;;  %6738 = vmatpush3.msra.mxu1 %v5906_v30 }
 0x52f   :  { %6757 = vmatpush3.msra.mxu0 %v5915_v31  ;;  %6739 = vmatprep.subr.mxu1 %v9494_v0 }
 0x530   :  { %6758 = vmatprep.subr.mxu0 %v9494_v0  ;;  %6740 = vmatpush3.msra.mxu1 %v5905_v32 }
 0x531   :  { %6759 = vmatpush3.msra.mxu0 %v5914_v33  ;;  %6741 = vmatprep.subr.mxu1 %v9494_v0 }
 0x532   :  { %6760 = vmatprep.subr.mxu0 %v9494_v0  ;;  %6742 = vmatpush3.msra.mxu1 %v5904_v34 }
 0x533   :  { %6761 = vmatpush3.msra.mxu0 %v5913_v3  ;;  %6743 = vmatprep.subr.mxu1 %v9494_v0 }
 0x534   :  { %6762 = vmatprep.subr.mxu0 %v9494_v0  ;;  %6744 = vmatpush3.msra.mxu1 %v5903_v35 }
 0x535   :  { %6763 = vmatpush3.msra.mxu0 %v5912_v36  ;;  %6745 = vmatprep.subr.mxu1 %v9494_v0 }
 0x536   :  { %6764 = vmatprep.subr.mxu0 %v9494_v0  ;;  %6746 = vmatpush3.msra.mxu1 %v5902_v37 }
 0x537   :  { %6765 = vmatpush3.msra.mxu0 %v5911_v38  ;;  %6747 = vmatprep.subr.mxu1 %v9494_v0 }
 0x538   :  { %6766 = vmatprep.subr.mxu0 %v9494_v0  ;;  %6748 = vmatpush3.msra.mxu1 %v5901_v39 }
 0x539   :  { %6749 = vmatprep.mubr.msk.f32.mxu1 %vm7289_vm2, %v9494_v0  ;;  %6767 = vmatpush3.msra.mxu0 %v5910_v40 }
 0x53a   :  { %6768 = vmatprep.mubr.msk.f32.mxu0 %vm7289_vm2, %v9494_v0  ;;  %6750 = vmatmul.mubr.msk.f32.vlgmr.msra.gmra.mxu1 %vm156_vm0, %v8191_v28 }
 0x53b   :  { %6769 = vmatmul.mubr.msk.f32.vlgmr.msra.gmra.mxu0 %vm156_vm0, %v8193_v29  ;;  %6771 = vmatprep.subr.mxu1 %v9494_v0 }
 0x53c   :  { %6790 = vmatprep.subr.mxu0 %v9494_v0  ;;  %6772 = vmatpush3.msra.mxu1 %v5926_v41 }
 0x53d   :  { %6791 = vmatpush3.msra.mxu0 %v3135_v43  ;;  %6773 = vmatprep.subr.mxu1 %v9494_v0 }
 0x53e   :  { %6792 = vmatprep.subr.mxu0 %v9494_v0  ;;  %6774 = vmatpush3.msra.mxu1 %v5925_v44 }
 0x53f   :  { %6793 = vmatpush3.msra.mxu0 %v3134_v45  ;;  %6775 = vmatprep.subr.mxu1 %v9494_v0 }
 0x540   :  { %6794 = vmatprep.subr.mxu0 %v9494_v0  ;;  %6776 = vmatpush3.msra.mxu1 %v5924_v46 }
 0x541   :  { %6795 = vmatpush3.msra.mxu0 %v3133_v47  ;;  %6777 = vmatprep.subr.mxu1 %v9494_v0 }
 0x542   :  { %6796 = vmatprep.subr.mxu0 %v9494_v0  ;;  %6778 = vmatpush3.msra.mxu1 %v5923_v48 }
 0x543   :  { %6797 = vmatpush3.msra.mxu0 %v3132_v49  ;;  %6779 = vmatprep.subr.mxu1 %v9494_v0 }
 0x544   :  { %6798 = vmatprep.subr.mxu0 %v9494_v0  ;;  %6780 = vmatpush3.msra.mxu1 %v5922_v50 }
 0x545   :  { %6799 = vmatpush3.msra.mxu0 %v3131_v51  ;;  %6781 = vmatprep.subr.mxu1 %v9494_v0 }
 0x546   :  { %6800 = vmatprep.subr.mxu0 %v9494_v0  ;;  %6782 = vmatpush3.msra.mxu1 %v5921_v52 }
 0x547   :  { %6801 = vmatpush3.msra.mxu0 %v3130_v53  ;;  %6783 = vmatprep.subr.mxu1 %v9494_v0 }
 0x548   :  { %6802 = vmatprep.subr.mxu0 %v9494_v0  ;;  %6784 = vmatpush3.msra.mxu1 %v5920_v54 }
 0x549   :  { %6803 = vmatpush3.msra.mxu0 %v3129_v55  ;;  %6785 = vmatprep.subr.mxu1 %v9494_v0 }
 0x54a   :  { %6804 = vmatprep.subr.mxu0 %v9494_v0  ;;  %6786 = vmatpush3.msra.mxu1 %v5919_v56 }
 0x54b   :  { %6787 = vmatprep.mubr.msk.f32.mxu1 %vm7289_vm2, %v9494_v0  ;;  %6805 = vmatpush3.msra.mxu0 %v3128_v57 }
 0x54c   :  { %6806 = vmatprep.mubr.msk.f32.mxu0 %vm7289_vm2, %v9494_v0  ;;  %6788 = vmatmul.mubr.msk.f32.vlgmr.msra.gmra.mxu1 %vm156_vm0, %v8177_v24 }
 0x54d   :  { %6807 = vmatmul.mubr.msk.f32.vlgmr.msra.gmra.mxu0 %vm156_vm0, %v8179_v25  ;;  %6809 = vmatprep.subr.mxu1 %v9494_v0 }
 0x54e   :  { %6828 = vmatprep.subr.mxu0 %v9494_v0  ;;  %6810 = vmatpush3.msra.mxu1 %v5936_v58 }
 0x54f   :  { %6829 = vmatpush3.msra.mxu0 %v5945_v59  ;;  %6811 = vmatprep.subr.mxu1 %v9494_v0 }
 0x550   :  { %6830 = vmatprep.subr.mxu0 %v9494_v0  ;;  %6812 = vmatpush3.msra.mxu1 %v5935_v60 }
 0x551   :  { %6831 = vmatpush3.msra.mxu0 %v5944_v61  ;;  %6813 = vmatprep.subr.mxu1 %v9494_v0 }
 0x552   :  { %6832 = vmatprep.subr.mxu0 %v9494_v0  ;;  %6814 = vmatpush3.msra.mxu1 %v5934_v62  ;;  %v3519_v62 = vld [vmem:[#allocation15] sm:$0x1] }
 0x553   :  { %6833 = vmatpush3.msra.mxu0 %v5943_v63  ;;  %6815 = vmatprep.subr.mxu1 %v9494_v0 }
 0x554   :  { %6834 = vmatprep.subr.mxu0 %v9494_v0  ;;  %6816 = vmatpush3.msra.mxu1 %v5933_v1 }
 0x555   :  { %6835 = vmatpush3.msra.mxu0 %v5942_v2  ;;  %6817 = vmatprep.subr.mxu1 %v9494_v0 }
 0x556   :  { %6836 = vmatprep.subr.mxu0 %v9494_v0  ;;  %6818 = vmatpush3.msra.mxu1 %v5932_v4 }
 0x557   :  { %6837 = vmatpush3.msra.mxu0 %v5941_v5  ;;  %6819 = vmatprep.subr.mxu1 %v9494_v0 }
 0x558   :  { %6838 = vmatprep.subr.mxu0 %v9494_v0  ;;  %6820 = vmatpush3.msra.mxu1 %v5931_v6 }
 0x559   :  { %6839 = vmatpush3.msra.mxu0 %v5940_v7  ;;  %6821 = vmatprep.subr.mxu1 %v9494_v0 }
 0x55a   :  { %6840 = vmatprep.subr.mxu0 %v9494_v0  ;;  %6822 = vmatpush3.msra.mxu1 %v5930_v8 }
 0x55b   :  { %6841 = vmatpush3.msra.mxu0 %v5939_v9  ;;  %6823 = vmatprep.subr.mxu1 %v9494_v0 }
 0x55c   :  { %6842 = vmatprep.subr.mxu0 %v9494_v0  ;;  %6824 = vmatpush3.msra.mxu1 %v5929_v10 }
 0x55d   :  { %6825 = vmatprep.mubr.msk.f32.mxu1 %vm7289_vm2, %v9494_v0  ;;  %6843 = vmatpush3.msra.mxu0 %v5938_v11 }
 0x55e   :  { %6844 = vmatprep.mubr.msk.f32.mxu0 %vm7289_vm2, %v9494_v0  ;;  %6826 = vmatmul.mubr.msk.f32.vlgmr.msra.gmra.mxu1 %vm156_vm0, %v8191_v28 }
 0x55f   :  { %6845 = vmatmul.mubr.msk.f32.vlgmr.msra.gmra.mxu0 %vm156_vm0, %v8193_v29  ;;  %6847 = vmatprep.subr.mxu1 %v9494_v0 }
 0x560   :  { %6849 = vmatprep.mubr.msk.f32.mxu1 %vm7289_vm2, %v9494_v0  ;;  %6848 = vmatpush3.msra.mxu1 %v3444_v12 }
 0x561   :  { %6852 = vmatprep.subr.mxu0 %v9494_v0  ;;  %6863 = vmatprep.subr.mxu1 %v9494_v0 }
 0x562   :  { %6860 = vmatprep.mubr.msk.f32.mxu0 %vm7289_vm2, %v9494_v0  ;;  %6850 = vmatmul.mubr.msk.f32.vlgmr.msra.gmra.mxu1 %vm160_vm3, %v8058_v42  ;;  %v3578_v42 = vld [vmem:[%s9475_s7 + $0x10] sm:$0xff] }
 0x563   :  { %6871 = vmatprep.mubr.msk.f32.mxu1 %vm7289_vm2, %v9494_v0  ;;  %6853 = vmatpush3.msra.mxu0 %v5951_v13 }
 0x564   :  { %6864 = vmatpush3.msra.mxu1 %v3579_v14  ;;  %6854 = vmatprep.subr.mxu0 %v9494_v0 }
 0x565   :  { %6865 = vmatprep.subr.mxu1 %v9494_v0  ;;  %6855 = vmatpush3.msra.mxu0 %v5950_v15 }
 0x566   :  { %6866 = vmatpush3.msra.mxu1 %v3578_v42  ;;  %6856 = vmatprep.subr.mxu0 %v9494_v0 }
 0x567   :  { %6867 = vmatprep.subr.mxu1 %v9494_v0  ;;  %6857 = vmatpush3.msra.mxu0 %v5949_v16 }
 0x568   :  { %6868 = vmatpush3.msra.mxu1 %v3577_v17  ;;  %6858 = vmatprep.subr.mxu0 %v9494_v0 }
 0x569   :  { %6869 = vmatprep.subr.mxu1 %v9494_v0  ;;  %6859 = vmatpush3.msra.mxu0 %v5948_v18 }
 0x56a   :  { %6870 = vmatpush3.msra.mxu1 %v3576_v19  ;;  %6874 = vmatprep.subr.mxu0 %v9494_v0 }
 0x56b   :  { %6885 = vmatprep.subr.mxu1 %v9494_v0 }
 0x5e9   :  { %v2887_v20 = vpop.f32.mrf.mxu1 }
 0x5ea   :  { %v2960_v21 = vpop.f32.mrf.mxu0 }
 0x5eb   :  { %v6713_v22 = vpop.f32.mrf.mxu1  ;;  %v2961_v32 = vadd.f32 %v2960_v21, %v2887_v20 }
 0x5ec   :  { %v6732_v23 = vpop.f32.mrf.mxu0 }
 0x5fa   :  { %v3041_v24 = vpop.f32.mrf.mxu1 }
 0x5fb   :  { %v3123_v25 = vpop.f32.mrf.mxu0  ;;  %v3045_v33 = vadd.f32 %v3041_v24, %v2961_v32  ;;  %v5957_v24 = vld [vmem:[%s9475_s7 + $0x58] sm:$0xff]  ;;  %v5955_v32 = vld [vmem:[%s9475_s7 + $0x48] sm:$0xff] }
 0x5fc   :  { %v6751_v26 = vpop.f32.mrf.mxu1 }
 0x5fd   :  { %v6770_v27 = vpop.f32.mrf.mxu0  ;;  %v3127_v39 = vadd.f32 %v3123_v25, %v3045_v33  ;;  %v5962_v25 = vld [vmem:[%s9475_s7 + $0x78] sm:$0xff]  ;;  %v5960_v33 = vld [vmem:[%s9475_s7 + $0x68] sm:$0xff] }
 0x60c   :  { %v3210_v28 = vpop.f32.mrf.mxu1 }
 0x60d   :  { %v3280_v29 = vpop.f32.mrf.mxu0 }
 0x60e   :  { %v6789_v30 = vpop.f32.mrf.mxu1  ;;  %v3281_v34 = vadd.f32 %v3280_v29, %v3210_v28  ;;  %v5956_v28 = vld [vmem:[%s9475_s7 + $0x50] sm:$0xff] }
 0x60f   :  { %v6808_v31 = vpop.f32.mrf.mxu0  ;;  %v5961_v29 = vld [vmem:[%s9475_s7 + $0x70] sm:$0xff] }
 0x61e   :  { %v3358_v3 = vpop.f32.mrf.mxu1 }
 0x61f   :  { %v3437_v35 = vpop.f32.mrf.mxu0  ;;  %v3362_v36 = vadd.f32 %v3358_v3, %v3281_v34  ;;  %v5954_v34 = vld [vmem:[%s9475_s7 + $0x40] sm:$0xff] }
 0x620   :  { %v6827_v37 = vpop.f32.mrf.mxu1  ;;  %v5959_v3 = vld [vmem:[%s9475_s7 + $0x60] sm:$0xff] }
 0x621   :  { %v6846_v38 = vpop.f32.mrf.mxu0  ;;  %v3441_v40 = vadd.f32 %v3437_v35, %v3362_v36  ;;  %v5968_v35 = vld [vmem:[%s9477_s9 + $0x38] sm:$0xff]  ;;  %v5967_v37 = vld [vmem:[%s9477_s9 + $0x30] sm:$0xff] }
 0x622   :  { %v3514_v41 = vpop.f32.mrf.mxu1  ;;  %v3907_v36 = vld [vmem:[%s9477_s9 + $0x18] sm:$0xff]  ;;  %v3906_v38 = vld [vmem:[%s9477_s9 + $0x10] sm:$0xff] }
 0x623   :  { %v3442_v43 = vmax.f32 %v3127_v39, %v3441_v40  ;;  %3518 = vst.msk [vmem:[#allocation4] sm:$0xff] %vm1132_vm5, %v3514_v41  ;;  %v5966_v39 = vld [vmem:[%s9477_s9 + $0x28] sm:$0xff]  ;;  %v5965_v41 = vld [vmem:[%s9477_s9 + $0x20] sm:$0xff] }
 0x624   :  { %v6851_v44 = vpop.f32.mrf.mxu1  ;;  %v3905_v40 = vld [vmem:[%s9477_s9 + $0x8] sm:$0xff] }
 0x625   :  { %3443 = vst.msk [vmem:[#allocation3] sm:$0xff] %vm1132_vm5, %v3442_v43  ;;  %v3904_v43 = vld [vmem:[%s9477_s9] sm:$0xff] }
 0x62a   :  { %v3523_v45 = vld [vmem:[#allocation4] sm:$0x1]  ;;  %v3535_v46 = vld [vmem:[#allocation4 + $0x2] sm:$0x1]  ;;  %v3547_v47 = vld [vmem:[#allocation4 + $0x4] sm:$0x1] }
 0x62b   :  { %v3559_v59 = vld [vmem:[#allocation4 + $0x6] sm:$0x1]  ;;  %v3525_v63 = vld [vmem:[#allocation4 + $0x1] sm:$0x1]  ;;  %v3537_v5 = vld [vmem:[#allocation4 + $0x3] sm:$0x1] }
 0x62c   :  { %v3520_v48 = vld [vmem:[#allocation3] sm:$0x1]  ;;  %v3521_v49 = vld [vmem:[#allocation3 + $0x1] sm:$0x1]  ;;  %v3532_v50 = vld [vmem:[#allocation3 + $0x2] sm:$0x1] }
 0x62d   :  { %v3522_v51 = vmax.f32 %v3520_v48, %v3521_v49  ;;  %v3533_v52 = vld [vmem:[#allocation3 + $0x3] sm:$0x1]  ;;  %v3544_v53 = vld [vmem:[#allocation3 + $0x4] sm:$0x1]  ;;  %v3545_v54 = vld [vmem:[#allocation3 + $0x5] sm:$0x1] }
 0x62e   :  { %v3534_v55 = vmax.f32 %v3532_v50, %v3533_v52  ;;  %v3546_v56 = vmax.f32 %v3544_v53, %v3545_v54  ;;  %v3556_v57 = vld [vmem:[#allocation3 + $0x6] sm:$0x1]  ;;  %v3557_v58 = vld [vmem:[#allocation3 + $0x7] sm:$0x1]  ;;  %v3549_v6 = vld [vmem:[#allocation4 + $0x5] sm:$0x1] }
 0x62f   :  { %v3524_v60 = vadd.f32 %v3523_v45, %v3522_v51  ;;  %v3558_v61 = vmax.f32 %v3556_v57, %v3557_v58  ;;  %v3561_v10 = vld [vmem:[#allocation4 + $0x7] sm:$0x1]  ;;  %v5964_v52 = vld [vmem:[#allocation17] ss:$0 sm:$0xff] }
 0x630   :  { %v3536_v1 = vadd.f32 %v3535_v46, %v3534_v55  ;;  %v3548_v2 = vadd.f32 %v3547_v47, %v3546_v56 }
 0x631   :  { %v3526_v4 = vadd.f32 %v3525_v63, %v3524_v60  ;;  %v3560_v7 = vadd.f32 %v3559_v59, %v3558_v61  ;;  %v5974_v59 = vld [vmem:[%s9477_s9 + $0x58] sm:$0xff]  ;;  %v5973_v63 = vld [vmem:[%s9477_s9 + $0x50] sm:$0xff] }
 0x632   :  { %v3538_v8 = vadd.f32 %v3537_v5, %v3536_v1  ;;  %v3550_v9 = vadd.f32 %v3549_v6, %v3548_v2  ;;  %v5979_v60 = vld [vmem:[%s9477_s9 + $0x78] sm:$0xff]  ;;  %v5978_v1 = vld [vmem:[%s9477_s9 + $0x70] sm:$0xff]  ;;  %v5972_v2 = vld [vmem:[%s9477_s9 + $0x48] sm:$0xff] }
 0x633   :  { %v3527_v11 = vadd.f32 %v3526_v4, %v3519_v62  ;;  %v3562_v12 = vadd.f32 %v3561_v10, %v3560_v7  ;;  %v5977_v4 = vld [vmem:[%s9477_s9 + $0x68] sm:$0xff]  ;;  %v5971_v5 = vld [vmem:[%s9477_s9 + $0x40] sm:$0xff]  ;;  %v5984_v7 = vld [vmem:[%s9478_s10 + $0x38] sm:$0xff] }
 0x634   :  { %v3539_v13 = vadd.f32 %v3538_v8, %v3519_v62  ;;  %v3551_v14 = vadd.f32 %v3550_v9, %v3519_v62  ;;  %v5976_v6 = vld [vmem:[%s9477_s9 + $0x60] sm:$0xff]  ;;  %v4217_v10 = vld [vmem:[%s9478_s10 + $0x18] sm:$0xff] }
 0x635   :  { %vm3528_vm1 = vcmp.ge.f32.partialorder %v3527_v11, 0.0  ;;  %v3529_v15 = vmul.f32 0.01, %v3527_v11  ;;  %v3563_v42 = vadd.f32 %v3562_v12, %v3519_v62  ;;  %v4216_v12 = vld [vmem:[%s9478_s10 + $0x10] sm:$0xff] }
 0x636   :  { %vm3540_vm3 = vcmp.ge.f32.partialorder %v3539_v13, 0.0  ;;  %v3541_v16 = vmul.f32 0.01, %v3539_v13  ;;  %vm3552_vm9 = vcmp.ge.f32.partialorder %v3551_v14, 0.0  ;;  %v3553_v17 = vmul.f32 0.01, %v3551_v14 }
 0x637   :  { %v3530_v18 = vsel %vm3528_vm1, %v3527_v11, %v3529_v15  ;;  %vm3564_vm10 = vcmp.ge.f32.partialorder %v3563_v42, 0.0  ;;  %v3565_v19 = vmul.f32 0.01, %v3563_v42  ;;  %v5983_v11 = vld [vmem:[%s9478_s10 + $0x30] sm:$0xff]  ;;  %v5981_v15 = vld [vmem:[%s9478_s10 + $0x20] sm:$0xff] }
 0x638   :  { %3531 = vst.msk [vmem:[#allocation5] sm:$0x1] %vm1221_vm7, %v3530_v18  ;;  %v3542_v20 = vsel %vm3540_vm3, %v3539_v13, %v3541_v16  ;;  %v3554_v21 = vsel %vm3552_vm9, %v3551_v14, %v3553_v17  ;;  %v5982_v13 = vld [vmem:[%s9478_s10 + $0x28] sm:$0xff]  ;;  %v5990_v16 = vld [vmem:[%s9478_s10 + $0x58] sm:$0xff]  ;;  %v5989_v18 = vld [vmem:[%s9478_s10 + $0x50] sm:$0xff] }
 0x639   :  { %3543 = vst.msk [vmem:[#allocation5 + $0x1] sm:$0x1] %vm1221_vm7, %v3542_v20  ;;  %3555 = vst.msk [vmem:[#allocation5 + $0x2] sm:$0x1] %vm1221_vm7, %v3554_v21  ;;  %v3566_v22 = vsel %vm3564_vm10, %v3563_v42, %v3565_v19  ;;  %v4215_v14 = vld [vmem:[%s9478_s10 + $0x8] sm:$0xff]  ;;  %v4214_v42 = vld [vmem:[%s9478_s10] sm:$0xff] }
 0x63a   :  { %3567 = vst.msk [vmem:[#allocation5 + $0x3] sm:$0x1] %vm1221_vm7, %v3566_v22  ;;  %v5995_v17 = vld [vmem:[%s9478_s10 + $0x78] sm:$0xff]  ;;  %v5994_v19 = vld [vmem:[%s9478_s10 + $0x70] sm:$0xff]  ;;  %v5988_v20 = vld [vmem:[%s9478_s10 + $0x48] sm:$0xff] }
 0x63b   :  { %v5993_v21 = vld [vmem:[%s9478_s10 + $0x68] sm:$0xff]  ;;  %v5987_v22 = vld [vmem:[%s9478_s10 + $0x40] sm:$0xff] }
 0x641   :  { %v8452_v23 = vld [vmem:[#allocation5] sm:$0xf] }
 0x642   :  { %3571 = vst.msk [vmem:[#allocation2 + $0x1] sm:$0xf] %vm1262_vm11, %v8452_v23 }
 0x649   :  { %v3573_v26 = vld [vmem:[#allocation2 + $0x1] sm:$0xf] }
 0x64a   :  { %v3572_v27 = vld [vmem:[#allocation2] sm:$0xf]  ;;  %6861 = vmatmul.mubr.msk.f32.vlgmr.msra.gmra.mxu0 %vm1132_vm5, %v3573_v26  ;;  %v4516_v26 = vld [vmem:[%s9479_s11 + $0x10] sm:$0xff] }
 0x64b   :  { %6872 = vmatmul.mubr.msk.f32.vlgmr.msra.gmra.mxu1 %vm1132_vm5, %v3572_v27  ;;  %v3574_v30 = vld [vmem:[#allocation2 + $0x2] sm:$0xf]  ;;  %6875 = vmatpush3.msra.mxu0 %v5957_v24  ;;  %v4515_v27 = vld [vmem:[%s9479_s11 + $0x8] sm:$0xff] }
 0x64c   :  { %v3575_v31 = vld [vmem:[#allocation2 + $0x3] sm:$0xf]  ;;  %6886 = vmatpush3.msra.mxu1 %v5962_v25  ;;  %6876 = vmatprep.subr.mxu0 %v9494_v0  ;;  %v4517_v25 = vld [vmem:[%s9479_s11 + $0x18] sm:$0xff] }
 0x64d   :  { %3897 = vst.msk [vmem:[#allocation2] sm:$0xff] %vm156_vm0, %v9494_v0  ;;  %6887 = vmatprep.subr.mxu1 %v9494_v0  ;;  %6877 = vmatpush3.msra.mxu0 %v5956_v28  ;;  %v5992_v24 = vld [vmem:[%s9478_s10 + $0x60] sm:$0xff] }
 0x64e   :  { %6888 = vmatpush3.msra.mxu1 %v5961_v29  ;;  %6878 = vmatprep.subr.mxu0 %v9494_v0  ;;  %v4514_v28 = vld [vmem:[%s9479_s11] sm:$0xff]  ;;  %v4620_v29 = vld [vmem:[%s9481_s13 + $0x8] sm:$0xff] }
 0x64f   :  { %6889 = vmatprep.subr.mxu1 %v9494_v0  ;;  %6879 = vmatpush3.msra.mxu0 %v5955_v32  ;;  %v4831_v32 = vld [vmem:[%s9483_s15 + $0x1c8] sm:$0xff] }
 0x650   :  { %6890 = vmatpush3.msra.mxu1 %v5960_v33  ;;  %6880 = vmatprep.subr.mxu0 %v9494_v0  ;;  %v4830_v33 = vld [vmem:[%s9483_s15 + $0x1c0] sm:$0xff] }
 0x651   :  { %6891 = vmatprep.subr.mxu1 %v9494_v0  ;;  %6881 = vmatpush3.msra.mxu0 %v5954_v34  ;;  %v4827_v34 = vld [vmem:[%s9483_s15 + $0x1a8] sm:$0xff] }
 0x652   :  { %6882 = vmatprep.mubr.msk.f32.mxu0 %vm7289_vm2, %v9494_v0  ;;  %6892 = vmatpush3.msra.mxu1 %v5959_v3  ;;  %v4826_v3 = vld [vmem:[%s9483_s15 + $0x1a0] sm:$0xff] }
 0x653   :  { %6893 = vmatprep.mubr.msk.f32.mxu1 %vm7289_vm2, %v9494_v0  ;;  %6883 = vmatmul.mubr.msk.f32.vlgmr.msra.gmra.mxu0 %vm1132_vm5, %v3574_v30  ;;  %v4619_v30 = vld [vmem:[%s9481_s13] sm:$0xff] }
 0x654   :  { %6894 = vmatmul.mubr.msk.f32.vlgmr.msra.gmra.mxu1 %vm1132_vm5, %v3575_v31  ;;  %6896 = vmatprep.subr.mxu0 %v9494_v0  ;;  %v4834_v31 = vld [vmem:[%s9483_s15 + $0x1e0] sm:$0xff] }
 0x655   :  { %6907 = vmatprep.subr.mxu1 %v9494_v0  ;;  %6904 = vmatprep.mubr.msk.f32.mxu0 %vm7289_vm2, %v9494_v0 }
 0x656   :  { %6915 = vmatprep.mubr.msk.f32.mxu1 %vm7289_vm2, %v9494_v0  ;;  %6897 = vmatpush3.msra.mxu0 %v5968_v35  ;;  %v4823_v35 = vld [vmem:[%s9483_s15 + $0x188] sm:$0xff] }
 0x657   :  { %6908 = vmatpush3.msra.mxu1 %v3907_v36  ;;  %6898 = vmatprep.subr.mxu0 %v9494_v0  ;;  %v4822_v36 = vld [vmem:[%s9483_s15 + $0x180] sm:$0xff] }
 0x658   :  { %6909 = vmatprep.subr.mxu1 %v9494_v0  ;;  %6899 = vmatpush3.msra.mxu0 %v5967_v37  ;;  %v4819_v37 = vld [vmem:[%s9483_s15 + $0x168] sm:$0xff] }
 0x659   :  { %6910 = vmatpush3.msra.mxu1 %v3906_v38  ;;  %6900 = vmatprep.subr.mxu0 %v9494_v0  ;;  %v4818_v38 = vld [vmem:[%s9483_s15 + $0x160] sm:$0xff] }
 0x65a   :  { %6911 = vmatprep.subr.mxu1 %v9494_v0  ;;  %6901 = vmatpush3.msra.mxu0 %v5966_v39  ;;  %v4815_v39 = vld [vmem:[%s9483_s15 + $0x148] sm:$0xff] }
 0x65b   :  { %6912 = vmatpush3.msra.mxu1 %v3905_v40  ;;  %6902 = vmatprep.subr.mxu0 %v9494_v0  ;;  %v4814_v40 = vld [vmem:[%s9483_s15 + $0x140] sm:$0xff] }
 0x65c   :  { %6913 = vmatprep.subr.mxu1 %v9494_v0  ;;  %6903 = vmatpush3.msra.mxu0 %v5965_v41  ;;  %v4811_v41 = vld [vmem:[%s9483_s15 + $0x128] sm:$0xff] }
 0x65d   :  { %6914 = vmatpush3.msra.mxu1 %v3904_v43  ;;  %6918 = vmatprep.subr.mxu0 %v9494_v0  ;;  %v4810_v43 = vld [vmem:[%s9483_s15 + $0x120] sm:$0xff] }
 0x65e   :  { %6929 = vmatprep.subr.mxu1 %v9494_v0 }
 0x70a   :  { %v3653_v44 = vpop.f32.mrf.mxu0 }
 0x70b   :  { %v3726_v45 = vpop.f32.mrf.mxu1 }
 0x70c   :  { %v6862_v46 = vpop.f32.mrf.mxu0  ;;  %v3727_v48 = vadd.f32 %v3726_v45, %v3653_v44  ;;  %v4807_v44 = vld [vmem:[%s9483_s15 + $0x108] sm:$0xff]  ;;  %v4806_v45 = vld [vmem:[%s9483_s15 + $0x100] sm:$0xff] }
 0x70d   :  { %v6873_v47 = vpop.f32.mrf.mxu1  ;;  %v4803_v46 = vld [vmem:[%s9483_s15 + $0xe8] sm:$0xff] }
 0x70e   :  { %v4802_v47 = vld [vmem:[%s9483_s15 + $0xe0] sm:$0xff] }
 0x713   :  { %v3803_v49 = vpop.f32.mrf.mxu0 }
 0x714   :  { %v3881_v50 = vpop.f32.mrf.mxu1  ;;  %v3807_v51 = vadd.f32 %v3803_v49, %v3727_v48 }
 0x715   :  { %v6884_v53 = vpop.f32.mrf.mxu0 }
 0x716   :  { %v6895_v54 = vpop.f32.mrf.mxu1  ;;  %v3885_v55 = vadd.f32 %v3881_v50, %v3807_v51 }
 0x718   :  { %v3893_v56 = vadd.f32 %v5964_v52, %v3885_v55 }
 0x71a   :  { %vm3894_vm7 = vcmp.ge.f32.partialorder %v3893_v56, 0.0  ;;  %v3895_v57 = vmul.f32 0.01, %v3893_v56 }
 0x71c   :  { %v3896_v58 = vsel %vm3894_vm7, %v3893_v56, %v3895_v57 }
 0x71d   :  { %3899 = vst.msk [vmem:[#allocation2 + $0x1] sm:$0xf] %vm1262_vm11, %v3896_v58 }
 0x724   :  { %v3901_v61 = vld [vmem:[#allocation2 + $0x1] sm:$0xf] }
 0x725   :  { %v3900_v62 = vld [vmem:[#allocation2] sm:$0xf]  ;;  %6905 = vmatmul.mubr.msk.f32.vlgmr.msra.gmra.mxu0 %vm1132_vm5, %v3901_v61 }
 0x726   :  { %6916 = vmatmul.mubr.msk.f32.vlgmr.msra.gmra.mxu1 %vm1132_vm5, %v3900_v62  ;;  %6919 = vmatpush3.msra.mxu0 %v5974_v59  ;;  %v3902_v8 = vld [vmem:[#allocation2 + $0x2] sm:$0xf] }
 0x727   :  { %6930 = vmatpush3.msra.mxu1 %v5979_v60  ;;  %6920 = vmatprep.subr.mxu0 %v9494_v0  ;;  %v3903_v9 = vld [vmem:[#allocation2 + $0x3] sm:$0xf] }
 0x728   :  { %6931 = vmatprep.subr.mxu1 %v9494_v0  ;;  %6921 = vmatpush3.msra.mxu0 %v5973_v63 }
 0x729   :  { %6932 = vmatpush3.msra.mxu1 %v5978_v1  ;;  %6922 = vmatprep.subr.mxu0 %v9494_v0 }
 0x72a   :  { %6933 = vmatprep.subr.mxu1 %v9494_v0  ;;  %6923 = vmatpush3.msra.mxu0 %v5972_v2 }
 0x72b   :  { %6934 = vmatpush3.msra.mxu1 %v5977_v4  ;;  %6924 = vmatprep.subr.mxu0 %v9494_v0 }
 0x72c   :  { %6935 = vmatprep.subr.mxu1 %v9494_v0  ;;  %6925 = vmatpush3.msra.mxu0 %v5971_v5 }
 0x72d   :  { %6926 = vmatprep.mubr.msk.f32.mxu0 %vm7289_vm2, %v9494_v0  ;;  %6936 = vmatpush3.msra.mxu1 %v5976_v6 }
 0x72e   :  { %6937 = vmatprep.mubr.msk.f32.mxu1 %vm7289_vm2, %v9494_v0  ;;  %6927 = vmatmul.mubr.msk.f32.vlgmr.msra.gmra.mxu0 %vm1132_vm5, %v3902_v8 }
 0x72f   :  { %6938 = vmatmul.mubr.msk.f32.vlgmr.msra.gmra.mxu1 %vm1132_vm5, %v3903_v9  ;;  %6940 = vmatprep.subr.mxu0 %v9494_v0 }
 0x730   :  { %6951 = vmatprep.subr.mxu1 %v9494_v0  ;;  %6941 = vmatpush3.msra.mxu0 %v5984_v7 }
 0x731   :  { %6952 = vmatpush3.msra.mxu1 %v4217_v10  ;;  %6942 = vmatprep.subr.mxu0 %v9494_v0 }
 0x732   :  { %6953 = vmatprep.subr.mxu1 %v9494_v0  ;;  %6943 = vmatpush3.msra.mxu0 %v5983_v11 }
 0x733   :  { %6954 = vmatpush3.msra.mxu1 %v4216_v12  ;;  %6944 = vmatprep.subr.mxu0 %v9494_v0 }
 0x734   :  { %6955 = vmatprep.subr.mxu1 %v9494_v0  ;;  %6945 = vmatpush3.msra.mxu0 %v5982_v13 }
 0x735   :  { %6956 = vmatpush3.msra.mxu1 %v4215_v14  ;;  %6946 = vmatprep.subr.mxu0 %v9494_v0 }
 0x736   :  { %6957 = vmatprep.subr.mxu1 %v9494_v0  ;;  %6947 = vmatpush3.msra.mxu0 %v5981_v15 }
 0x737   :  { %6948 = vmatprep.mubr.msk.f32.mxu0 %vm7289_vm2, %v9494_v0  ;;  %6958 = vmatpush3.msra.mxu1 %v4214_v42 }
 0x738   :  { %6959 = vmatprep.mubr.msk.f32.mxu1 %vm7289_vm2, %v9494_v0  ;;  %6949 = vmatmul.mubr.msk.f32.vlgmr.msra.gmra.mxu0 %vm1132_vm5, %v3901_v61 }
 0x739   :  { %6960 = vmatmul.mubr.msk.f32.vlgmr.msra.gmra.mxu1 %vm1132_vm5, %v3900_v62  ;;  %6962 = vmatprep.subr.mxu0 %v9494_v0 }
 0x73a   :  { %6973 = vmatprep.subr.mxu1 %v9494_v0  ;;  %6963 = vmatpush3.msra.mxu0 %v5990_v16 }
 0x73b   :  { %6974 = vmatpush3.msra.mxu1 %v5995_v17  ;;  %6964 = vmatprep.subr.mxu0 %v9494_v0 }
 0x73c   :  { %6975 = vmatprep.subr.mxu1 %v9494_v0  ;;  %6965 = vmatpush3.msra.mxu0 %v5989_v18 }
 0x73d   :  { %6976 = vmatpush3.msra.mxu1 %v5994_v19  ;;  %6966 = vmatprep.subr.mxu0 %v9494_v0 }
 0x73e   :  { %6977 = vmatprep.subr.mxu1 %v9494_v0  ;;  %6967 = vmatpush3.msra.mxu0 %v5988_v20  ;;  %v4592_v20 = vld [vmem:[#allocation18] sm:$0x1] }
 0x73f   :  { %6978 = vmatpush3.msra.mxu1 %v5993_v21  ;;  %6968 = vmatprep.subr.mxu0 %v9494_v0 }
 0x740   :  { %6979 = vmatprep.subr.mxu1 %v9494_v0  ;;  %6969 = vmatpush3.msra.mxu0 %v5987_v22 }
 0x741   :  { %6970 = vmatprep.mubr.msk.f32.mxu0 %vm7289_vm2, %v9494_v0  ;;  %6980 = vmatpush3.msra.mxu1 %v5992_v24 }
 0x742   :  { %6981 = vmatprep.mubr.msk.f32.mxu1 %vm7289_vm2, %v9494_v0  ;;  %6971 = vmatmul.mubr.msk.f32.vlgmr.msra.gmra.mxu0 %vm1132_vm5, %v3902_v8 }
 0x743   :  { %6982 = vmatmul.mubr.msk.f32.vlgmr.msra.gmra.mxu1 %vm1132_vm5, %v3903_v9  ;;  %6984 = vmatprep.subr.mxu0 %v9494_v0 }
 0x744   :  { %6992 = vmatprep.mubr.msk.f32.mxu0 %vm7289_vm2, %v9494_v0  ;;  %6985 = vmatpush3.msra.mxu0 %v4517_v25 }
 0x745   :  { %6995 = vmatprep.subr.mxu1 %v9494_v0  ;;  %6986 = vmatprep.subr.mxu0 %v9494_v0 }
 0x746   :  { %6999 = vmatprep.mubr.msk.f32.mxu1 %vm7289_vm2, %v9494_v0  ;;  %6987 = vmatpush3.msra.mxu0 %v4516_v26 }
 0x747   :  { %6988 = vmatprep.subr.mxu0 %v9494_v0  ;;  %6996 = vmatpush3.msra.mxu1 %v4620_v29 }
 0x748   :  { %6989 = vmatpush3.msra.mxu0 %v4515_v27  ;;  %6997 = vmatprep.subr.mxu1 %v9494_v0 }
 0x749   :  { %6990 = vmatprep.subr.mxu0 %v9494_v0  ;;  %6998 = vmatpush3.msra.mxu1 %v4619_v30 }
 0x74a   :  { %6991 = vmatpush3.msra.mxu0 %v4514_v28  ;;  %7002 = vmatprep.subr.mxu1 %v9494_v0 }
 0x74b   :  { %6993 = vmatmul.mubr.msk.f32.vlgmr.msra.gmra.mxu0 %vm1132_vm5, %v8452_v23  ;;  %v4835_v23 = vld [vmem:[%s9483_s15 + $0x1e8] sm:$0xff] }
 0x74c   :  { %4924 = vmatprep.mubr.f32.mxu0 %v9494_v0  ;;  %4860 = vmatprep.subr.mxu0 %v4835_v23 }
 0x74d   :  { %4861 = vmatpush1.msra.mxu0 %v4834_v31  ;;  %v4697_v31 = vld [vmem:[%s9481_s13 + $0x18] sm:$0xff] }
 0x74e   :  { %4862 = vmatprep.subr.mxu0 %v4831_v32 }
 0x74f   :  { %4863 = vmatpush1.msra.mxu0 %v4830_v33  ;;  %v4696_v33 = vld [vmem:[%s9481_s13 + $0x10] sm:$0xff] }
 0x750   :  { %4864 = vmatprep.subr.mxu0 %v4827_v34  ;;  %v4837_v34 = vld [vmem:[%s9483_s15 + $0x1f8] sm:$0xff] }
 0x751   :  { %4865 = vmatpush1.msra.mxu0 %v4826_v3  ;;  %v4836_v3 = vld [vmem:[%s9483_s15 + $0x1f0] sm:$0xff] }
 0x752   :  { %4866 = vmatprep.subr.mxu0 %v4823_v35 }
 0x753   :  { %4867 = vmatpush1.msra.mxu0 %v4822_v36  ;;  %v4833_v36 = vld [vmem:[%s9483_s15 + $0x1d8] sm:$0xff] }
 0x754   :  { %4868 = vmatprep.subr.mxu0 %v4819_v37  ;;  %v4832_v37 = vld [vmem:[%s9483_s15 + $0x1d0] sm:$0xff] }
 0x755   :  { %4869 = vmatpush1.msra.mxu0 %v4818_v38  ;;  %v4829_v38 = vld [vmem:[%s9483_s15 + $0x1b8] sm:$0xff] }
 0x756   :  { %4870 = vmatprep.subr.mxu0 %v4815_v39  ;;  %v4828_v39 = vld [vmem:[%s9483_s15 + $0x1b0] sm:$0xff] }
 0x757   :  { %4871 = vmatpush1.msra.mxu0 %v4814_v40  ;;  %v4825_v40 = vld [vmem:[%s9483_s15 + $0x198] sm:$0xff] }
 0x758   :  { %4872 = vmatprep.subr.mxu0 %v4811_v41  ;;  %v4824_v41 = vld [vmem:[%s9483_s15 + $0x190] sm:$0xff] }
 0x759   :  { %4873 = vmatpush1.msra.mxu0 %v4810_v43  ;;  %v4821_v43 = vld [vmem:[%s9483_s15 + $0x178] sm:$0xff] }
 0x75a   :  { %4874 = vmatprep.subr.mxu0 %v4807_v44  ;;  %v4820_v44 = vld [vmem:[%s9483_s15 + $0x170] sm:$0xff] }
 0x75b   :  { %4875 = vmatpush1.msra.mxu0 %v4806_v45  ;;  %v4817_v45 = vld [vmem:[%s9483_s15 + $0x158] sm:$0xff] }
 0x75c   :  { %4876 = vmatprep.subr.mxu0 %v4803_v46  ;;  %v4816_v46 = vld [vmem:[%s9483_s15 + $0x150] sm:$0xff] }
 0x75d   :  { %4877 = vmatpush1.msra.mxu0 %v4802_v47  ;;  %v4813_v47 = vld [vmem:[%s9483_s15 + $0x138] sm:$0xff] }
 0x7e5   :  { %v3981_v48 = vpop.f32.mrf.mxu0 }
 0x7e6   :  { %v4054_v49 = vpop.f32.mrf.mxu1 }
 0x7e7   :  { %v6906_v50 = vpop.f32.mrf.mxu0  ;;  %v4055_v60 = vadd.f32 %v4054_v49, %v3981_v48  ;;  %v4812_v48 = vld [vmem:[%s9483_s15 + $0x130] sm:$0xff]  ;;  %v4809_v49 = vld [vmem:[%s9483_s15 + $0x118] sm:$0xff] }
 0x7e8   :  { %v6917_v51 = vpop.f32.mrf.mxu1  ;;  %v4808_v50 = vld [vmem:[%s9483_s15 + $0x110] sm:$0xff] }
 0x7e9   :  { %v4805_v51 = vld [vmem:[%s9483_s15 + $0xf8] sm:$0xff] }
 0x7ee   :  { %v4131_v52 = vpop.f32.mrf.mxu0 }
 0x7ef   :  { %v4209_v53 = vpop.f32.mrf.mxu1  ;;  %v4135_v61 = vadd.f32 %v4131_v52, %v4055_v60  ;;  %v4804_v52 = vld [vmem:[%s9483_s15 + $0xf0] sm:$0xff] }
 0x7f0   :  { %v6928_v54 = vpop.f32.mrf.mxu0  ;;  %v4796_v60 = vld [vmem:[%s9483_s15 + $0xb0] sm:$0xff] }
 0x7f1   :  { %v6939_v55 = vpop.f32.mrf.mxu1  ;;  %v4213_v6 = vadd.f32 %v4209_v53, %v4135_v61  ;;  %v4799_v53 = vld [vmem:[%s9483_s15 + $0xc8] sm:$0xff]  ;;  %v4801_v54 = vld [vmem:[%s9483_s15 + $0xd8] sm:$0xff] }
 0x7f2   :  { %4878 = vmatprep.subr.mxu0 %v4799_v53  ;;  %v4798_v55 = vld [vmem:[%s9483_s15 + $0xc0] sm:$0xff]  ;;  %v4791_v61 = vld [vmem:[%s9483_s15 + $0x88] sm:$0xff]  ;;  %v9049_v53 = vld [vmem:[%s9484_s16 + $0x130] sm:$0xff] }
 0x7f3   :  { %4879 = vmatpush1.msra.mxu0 %v4798_v55  ;;  %v9061_v55 = vld [vmem:[%s9484_s16 + $0x118] sm:$0xff] }
 0x7f8   :  { %v4288_v56 = vpop.f32.mrf.mxu0 }
 0x7f9   :  { %v4358_v57 = vpop.f32.mrf.mxu1 }
 0x7fa   :  { %v6950_v58 = vpop.f32.mrf.mxu0  ;;  %v4359_v62 = vadd.f32 %v4358_v57, %v4288_v56  ;;  %v4800_v56 = vld [vmem:[%s9483_s15 + $0xd0] sm:$0xff]  ;;  %v4795_v57 = vld [vmem:[%s9483_s15 + $0xa8] sm:$0xff] }
 0x7fb   :  { %v6961_v59 = vpop.f32.mrf.mxu1  ;;  %v4797_v58 = vld [vmem:[%s9483_s15 + $0xb8] sm:$0xff]  ;;  %4880 = vmatprep.subr.mxu0 %v4795_v57  ;;  %v9073_v57 = vld [vmem:[%s9484_s16 + $0x110] sm:$0xff] }
 0x7fc   :  { %v4794_v59 = vld [vmem:[%s9483_s15 + $0xa0] sm:$0xff] }
 0x7fd   :  { %4881 = vmatpush1.msra.mxu0 %v4794_v59  ;;  %v9085_v59 = vld [vmem:[%s9484_s16 + $0xf8] sm:$0xff] }
 0x7fe   :  { %4882 = vmatprep.subr.mxu0 %v4791_v61  ;;  %v9097_v61 = vld [vmem:[%s9484_s16 + $0xf0] sm:$0xff] }
 0x802   :  { %v4432_v63 = vpop.f32.mrf.mxu0 }
 0x803   :  { %v4507_v1 = vpop.f32.mrf.mxu1  ;;  %v4436_v2 = vadd.f32 %v4432_v63, %v4359_v62  ;;  %v4793_v62 = vld [vmem:[%s9483_s15 + $0x98] sm:$0xff]  ;;  %v4790_v63 = vld [vmem:[%s9483_s15 + $0x80] sm:$0xff] }
 0x804   :  { %v6972_v4 = vpop.f32.mrf.mxu0  ;;  %4883 = vmatpush1.msra.mxu0 %v4790_v63  ;;  %v9109_v63 = vld [vmem:[%s9484_s16 + $0xd8] sm:$0xff] }
 0x805   :  { %v6983_v5 = vpop.f32.mrf.mxu1  ;;  %v4511_v7 = vadd.f32 %v4507_v1, %v4436_v2  ;;  %v4792_v1 = vld [vmem:[%s9483_s15 + $0x90] sm:$0xff]  ;;  %v4787_v2 = vld [vmem:[%s9483_s15 + $0x68] sm:$0xff]  ;;  %v4789_v4 = vld [vmem:[%s9483_s15 + $0x78] sm:$0xff] }
 0x806   :  { %4884 = vmatprep.subr.mxu0 %v4787_v2  ;;  %v4786_v5 = vld [vmem:[%s9483_s15 + $0x60] sm:$0xff]  ;;  %v9121_v2 = vld [vmem:[%s9484_s16 + $0xd0] sm:$0xff] }
 0x807   :  { %v4512_v8 = vmax.f32 %v4213_v6, %v4511_v7  ;;  %v4788_v6 = vld [vmem:[%s9483_s15 + $0x70] sm:$0xff]  ;;  %4885 = vmatpush1.msra.mxu0 %v4786_v5  ;;  %v4783_v7 = vld [vmem:[%s9483_s15 + $0x48] sm:$0xff]  ;;  %v9133_v5 = vld [vmem:[%s9484_s16 + $0xb8] sm:$0xff] }
 0x808   :  { %4886 = vmatprep.subr.mxu0 %v4783_v7  ;;  %v9145_v7 = vld [vmem:[%s9484_s16 + $0xb0] sm:$0xff] }
 0x809   :  { %4513 = vst.msk [vmem:[#allocation3] sm:$0xf] %vm2214_vm13, %v4512_v8  ;;  %v4785_v8 = vld [vmem:[%s9483_s15 + $0x58] sm:$0xff] }
 0x80b   :  { %v4587_v9 = vpop.f32.mrf.mxu0 }
 0x80c   :  { %4591 = vst.msk [vmem:[#allocation4] sm:$0xf] %vm2214_vm13, %v4587_v9  ;;  %v4782_v9 = vld [vmem:[%s9483_s15 + $0x40] sm:$0xff] }
 0x80d   :  { %v6994_v10 = vpop.f32.mrf.mxu0  ;;  %4887 = vmatpush1.msra.mxu0 %v4782_v9  ;;  %v9157_v9 = vld [vmem:[%s9484_s16 + $0x98] sm:$0xff] }
 0x80e   :  { %v4784_v10 = vld [vmem:[%s9483_s15 + $0x50] sm:$0xff] }
 0x810   :  { %v4593_v11 = vld [vmem:[#allocation3] sm:$0x1]  ;;  %v4594_v12 = vld [vmem:[#allocation3 + $0x1] sm:$0x1]  ;;  %v4605_v13 = vld [vmem:[#allocation3 + $0x2] sm:$0x1] }
 0x811   :  { %v4595_v14 = vmax.f32 %v4593_v11, %v4594_v12  ;;  %v4606_v15 = vld [vmem:[#allocation3 + $0x3] sm:$0x1]  ;;  %v4779_v11 = vld [vmem:[%s9483_s15 + $0x28] sm:$0xff]  ;;  %v4781_v12 = vld [vmem:[%s9483_s15 + $0x38] sm:$0xff] }
 0x812   :  { %v4607_v42 = vmax.f32 %v4605_v13, %v4606_v15  ;;  %4888 = vmatprep.subr.mxu0 %v4779_v11  ;;  %v4778_v13 = vld [vmem:[%s9483_s15 + $0x20] sm:$0xff]  ;;  %v4775_v15 = vld [vmem:[%s9483_s15 + $0x8] sm:$0xff]  ;;  %v9169_v11 = vld [vmem:[%s9484_s16 + $0x90] sm:$0xff] }
 0x813   :  { %v4596_v16 = vld [vmem:[#allocation4] sm:$0x1]  ;;  %v4608_v17 = vld [vmem:[#allocation4 + $0x2] sm:$0x1]  ;;  %v4598_v21 = vld [vmem:[#allocation4 + $0x1] sm:$0x1]  ;;  %4889 = vmatpush1.msra.mxu0 %v4778_v13 }
 0x814   :  { %v4597_v18 = vadd.f32 %v4596_v16, %v4595_v14  ;;  %v4609_v19 = vadd.f32 %v4608_v17, %v4607_v42  ;;  %v4610_v22 = vld [vmem:[#allocation4 + $0x3] sm:$0x1]  ;;  %v4780_v14 = vld [vmem:[%s9483_s15 + $0x30] sm:$0xff]  ;;  %4890 = vmatprep.subr.mxu0 %v4775_v15  ;;  %v4774_v16 = vld [vmem:[%s9483_s15] sm:$0xff] }
 0x815   :  { %v4777_v42 = vld [vmem:[%s9483_s15 + $0x18] sm:$0xff]  ;;  %v4776_v17 = vld [vmem:[%s9483_s15 + $0x10] sm:$0xff]  ;;  %4891 = vmatpush1.msra.mxu0 %v4774_v16 }
 0x816   :  { %v4599_v24 = vadd.f32 %v4598_v21, %v4597_v18  ;;  %v4611_v25 = vadd.f32 %v4610_v22, %v4609_v19  ;;  %v8892_v18 = vld [vmem:[%s9484_s16 + $0x1e8] sm:$0xff]  ;;  %v8897_v19 = vld [vmem:[%s9484_s16 + $0x1f8] sm:$0xff]  ;;  %v9193_v15 = vld [vmem:[%s9484_s16 + $0x70] sm:$0xff] }
 0x817   :  { %5090 = vmatprep.subr.mxu0 %v8892_v18  ;;  %v9181_v13 = vld [vmem:[%s9484_s16 + $0x78] sm:$0xff] }
 0x818   :  { %v4600_v26 = vadd.f32 %v4599_v24, %v4592_v20  ;;  %v4612_v27 = vadd.f32 %v4611_v25, %v4592_v20  ;;  %v4617_v20 = vld [vmem:[#allocation20] sm:$0x1]  ;;  %v9205_v16 = vld [vmem:[%s9484_s16 + $0x58] sm:$0xff] }
 0x81a   :  { %vm4601_vm5 = vcmp.ge.f32.partialorder %v4600_v26, 0.0  ;;  %v4602_v28 = vmul.f32 0.01, %v4600_v26  ;;  %vm4613_vm11 = vcmp.ge.f32.partialorder %v4612_v27, 0.0  ;;  %v4614_v29 = vmul.f32 0.01, %v4612_v27 }
 0x81c   :  { %v4603_v30 = vsel %vm4601_vm5, %v4600_v26, %v4602_v28  ;;  %v4615_v23 = vsel %vm4613_vm11, %v4612_v27, %v4614_v29  ;;  %v8904_v28 = vld [vmem:[%s9484_s16 + $0x1e0] sm:$0xff]  ;;  %v8909_v29 = vld [vmem:[%s9484_s16 + $0x1f0] sm:$0xff] }
 0x81d   :  { %4604 = vst.msk [vmem:[#allocation5] sm:$0x1] %vm2306_vm14, %v4603_v30  ;;  %4616 = vst.msk [vmem:[#allocation5 + $0x1] sm:$0x1] %vm2306_vm14, %v4615_v23  ;;  %v8914_v23 = vld [vmem:[%s9484_s16 + $0x1c8] sm:$0xff] }
 0x824   :  { %v4618_v32 = vld [vmem:[#allocation5] sm:$0x1]  ;;  %v4695_v35 = vld [vmem:[#allocation5 + $0x1] sm:$0x1] }
 0x825   :  { %7000 = vmatmul.mubr.msk.f32.vlgmr.msra.gmra.mxu1 %vm2324_vm6, %v4618_v32  ;;  %v8924_v32 = vld [vmem:[%s9484_s16 + $0x1c0] sm:$0xff] }
 0x826   :  { %7003 = vmatpush3.msra.mxu1 %v4697_v31  ;;  %7006 = vmatprep.mubr.msk.f32.mxu1 %vm7289_vm2, %v9494_v0  ;;  %v8919_v31 = vld [vmem:[%s9484_s16 + $0x1d8] sm:$0xff] }
 0x827   :  { %7004 = vmatprep.subr.mxu1 %v9494_v0 }
 0x828   :  { %7005 = vmatpush3.msra.mxu1 %v4696_v33  ;;  %v8929_v33 = vld [vmem:[%s9484_s16 + $0x1d0] sm:$0xff] }
 0x829   :  { %7007 = vmatmul.mubr.msk.f32.vlgmr.msra.gmra.mxu1 %vm2324_vm6, %v4695_v35  ;;  %4931 = vmatprep.subr.mxu1 %v4837_v34  ;;  %v8936_v34 = vld [vmem:[%s9484_s16 + $0x1a8] sm:$0xff]  ;;  %v8948_v35 = vld [vmem:[%s9484_s16 + $0x1a0] sm:$0xff] }
 0x82a   :  { %4932 = vmatpush1.msra.mxu1 %v4836_v3  ;;  %4995 = vmatprep.mubr.f32.mxu1 %v9494_v0  ;;  %v8941_v3 = vld [vmem:[%s9484_s16 + $0x1b8] sm:$0xff]  ;;  %v9267_v0 = vld [vmem:[%s9484_s16 + $0x10] sm:$0xff] }
 0x82b   :  { %4933 = vmatprep.subr.mxu1 %v4833_v36  ;;  %v8953_v36 = vld [vmem:[%s9484_s16 + $0x1b0] sm:$0xff] }
 0x82c   :  { %4934 = vmatpush1.msra.mxu1 %v4832_v37  ;;  %v8960_v37 = vld [vmem:[%s9484_s16 + $0x188] sm:$0xff] }
 0x82d   :  { %4935 = vmatprep.subr.mxu1 %v4829_v38  ;;  %v8965_v38 = vld [vmem:[%s9484_s16 + $0x198] sm:$0xff] }
 0x82e   :  { %4936 = vmatpush1.msra.mxu1 %v4828_v39  ;;  %v8972_v39 = vld [vmem:[%s9484_s16 + $0x180] sm:$0xff] }
 0x82f   :  { %4937 = vmatprep.subr.mxu1 %v4825_v40  ;;  %v8977_v40 = vld [vmem:[%s9484_s16 + $0x190] sm:$0xff] }
 0x830   :  { %4938 = vmatpush1.msra.mxu1 %v4824_v41  ;;  %v8984_v41 = vld [vmem:[%s9484_s16 + $0x168] sm:$0xff] }
 0x831   :  { %4939 = vmatprep.subr.mxu1 %v4821_v43  ;;  %v8989_v43 = vld [vmem:[%s9484_s16 + $0x178] sm:$0xff] }
 0x832   :  { %4940 = vmatpush1.msra.mxu1 %v4820_v44  ;;  %v8996_v44 = vld [vmem:[%s9484_s16 + $0x160] sm:$0xff] }
 0x833   :  { %4941 = vmatprep.subr.mxu1 %v4817_v45  ;;  %v9001_v45 = vld [vmem:[%s9484_s16 + $0x170] sm:$0xff] }
 0x834   :  { %4942 = vmatpush1.msra.mxu1 %v4816_v46  ;;  %v9008_v46 = vld [vmem:[%s9484_s16 + $0x148] sm:$0xff] }
 0x835   :  { %4943 = vmatprep.subr.mxu1 %v4813_v47  ;;  %v9013_v47 = vld [vmem:[%s9484_s16 + $0x158] sm:$0xff] }
 0x836   :  { %4944 = vmatpush1.msra.mxu1 %v4812_v48  ;;  %v9020_v48 = vld [vmem:[%s9484_s16 + $0x140] sm:$0xff] }
 0x837   :  { %4945 = vmatprep.subr.mxu1 %v4809_v49  ;;  %v9025_v49 = vld [vmem:[%s9484_s16 + $0x150] sm:$0xff] }
 0x838   :  { %4946 = vmatpush1.msra.mxu1 %v4808_v50  ;;  %v9032_v50 = vld [vmem:[%s9484_s16 + $0x128] sm:$0xff] }
 0x839   :  { %4947 = vmatprep.subr.mxu1 %v4805_v51  ;;  %v9037_v51 = vld [vmem:[%s9484_s16 + $0x138] sm:$0xff] }
 0x83a   :  { %4948 = vmatpush1.msra.mxu1 %v4804_v52  ;;  %v9044_v52 = vld [vmem:[%s9484_s16 + $0x120] sm:$0xff] }
 0x83b   :  { %4949 = vmatprep.subr.mxu1 %v4801_v54  ;;  %v9056_v54 = vld [vmem:[%s9484_s16 + $0x108] sm:$0xff] }
 0x83c   :  { %4950 = vmatpush1.msra.mxu1 %v4800_v56  ;;  %v9068_v56 = vld [vmem:[%s9484_s16 + $0x100] sm:$0xff] }
 0x83d   :  { %4951 = vmatprep.subr.mxu1 %v4797_v58  ;;  %v9080_v58 = vld [vmem:[%s9484_s16 + $0xe8] sm:$0xff] }
 0x83e   :  { %4952 = vmatpush1.msra.mxu1 %v4796_v60  ;;  %v9092_v60 = vld [vmem:[%s9484_s16 + $0xe0] sm:$0xff] }
 0x83f   :  { %4953 = vmatprep.subr.mxu1 %v4793_v62  ;;  %v9104_v62 = vld [vmem:[%s9484_s16 + $0xc8] sm:$0xff] }
 0x840   :  { %4954 = vmatpush1.msra.mxu1 %v4792_v1  ;;  %v9116_v1 = vld [vmem:[%s9484_s16 + $0xc0] sm:$0xff] }
 0x841   :  { %4955 = vmatprep.subr.mxu1 %v4789_v4  ;;  %v9128_v4 = vld [vmem:[%s9484_s16 + $0xa8] sm:$0xff] }
 0x842   :  { %4956 = vmatpush1.msra.mxu1 %v4788_v6  ;;  %v9140_v6 = vld [vmem:[%s9484_s16 + $0xa0] sm:$0xff] }
 0x843   :  { %4957 = vmatprep.subr.mxu1 %v4785_v8  ;;  %v9152_v8 = vld [vmem:[%s9484_s16 + $0x88] sm:$0xff] }
 0x844   :  { %4958 = vmatpush1.msra.mxu1 %v4784_v10  ;;  %v9164_v10 = vld [vmem:[%s9484_s16 + $0x80] sm:$0xff] }
 0x845   :  { %4959 = vmatprep.subr.mxu1 %v4781_v12  ;;  %v9176_v12 = vld [vmem:[%s9484_s16 + $0x68] sm:$0xff] }
 0x846   :  { %4960 = vmatpush1.msra.mxu1 %v4780_v14  ;;  %v9188_v14 = vld [vmem:[%s9484_s16 + $0x60] sm:$0xff] }
 0x847   :  { %4961 = vmatprep.subr.mxu1 %v4777_v42  ;;  %v9200_v42 = vld [vmem:[%s9484_s16 + $0x48] sm:$0xff] }
 0x848   :  { %4962 = vmatpush1.msra.mxu1 %v4776_v17  ;;  %v9212_v17 = vld [vmem:[%s9484_s16 + $0x40] sm:$0xff] }
 0x849   :  { %5161 = vmatprep.subr.mxu1 %v8897_v19 }
 0x8e5   :  { %v4690_v21 = vpop.f32.mrf.mxu1 }
 0x8e6   :  { %v4694_v24 = vadd.f32 %v4690_v21, %v4617_v20  ;;  %v9217_v20 = vld [vmem:[%s9484_s16 + $0x50] sm:$0xff]  ;;  %v9224_v21 = vld [vmem:[%s9484_s16 + $0x28] sm:$0xff] }
 0x8e7   :  { %v7001_v22 = vpop.f32.mrf.mxu1 }
 0x8e8   :  { %v9229_v22 = vld [vmem:[%s9484_s16 + $0x38] sm:$0xff] }
 0x8e9   :  { %v4767_v25 = vpop.f32.mrf.mxu1  ;;  %9511 = vst [vmem:[#allocation27_spill] sm:$0xff] %v9229_v22 }
 0x8ea   :  { %v4771_v26 = vadd.f32 %v4767_v25, %v4694_v24  ;;  %v9236_v24 = vld [vmem:[%s9484_s16 + $0x20] sm:$0xff]  ;;  %v9241_v25 = vld [vmem:[%s9484_s16 + $0x30] sm:$0xff] }
 0x8eb   :  { %v7008_v27 = vpop.f32.mrf.mxu1 }
 0x8ec   :  { %4772 = vst [vmem:[#allocation7 + $0x1] sm:$0x1] %v4771_v26  ;;  %v9248_v26 = vld [vmem:[%s9484_s16 + $0x8] sm:$0xff]  ;;  %v9253_v27 = vld [vmem:[%s9484_s16 + $0x18] sm:$0xff] }
 0x8f3   :  { %v4773_v30 = vld [vmem:[#allocation7] sm:$0x3] }
 0x8f4   :  { %4925 = vmatmul.mubr.f32.vlgmr.msra.gmra.mxu0 %v4773_v30  ;;  %4996 = vmatmul.mubr.f32.vlgmr.msra.gmra.mxu1 %v4773_v30  ;;  %v9260_v30 = vld [vmem:[%s9484_s16] sm:$0xff] }
 0x8f5   :  { %5091 = vmatpush1.msra.mxu0 %v8904_v28  ;;  %5162 = vmatpush1.msra.mxu1 %v8909_v29 }
 0x8f6   :  { %5092 = vmatprep.subr.mxu0 %v8914_v23  ;;  %5163 = vmatprep.subr.mxu1 %v8919_v31 }
 0x8f7   :  { %5093 = vmatpush1.msra.mxu0 %v8924_v32  ;;  %5164 = vmatpush1.msra.mxu1 %v8929_v33 }
 0x8f8   :  { %5094 = vmatprep.subr.mxu0 %v8936_v34  ;;  %5165 = vmatprep.subr.mxu1 %v8941_v3 }
 0x8f9   :  { %5095 = vmatpush1.msra.mxu0 %v8948_v35  ;;  %5166 = vmatpush1.msra.mxu1 %v8953_v36 }
 0x8fa   :  { %5096 = vmatprep.subr.mxu0 %v8960_v37  ;;  %5167 = vmatprep.subr.mxu1 %v8965_v38 }
 0x8fb   :  { %5097 = vmatpush1.msra.mxu0 %v8972_v39  ;;  %5168 = vmatpush1.msra.mxu1 %v8977_v40 }
 0x8fc   :  { %5098 = vmatprep.subr.mxu0 %v8984_v41  ;;  %5169 = vmatprep.subr.mxu1 %v8989_v43 }
 0x8fd   :  { %5099 = vmatpush1.msra.mxu0 %v8996_v44  ;;  %5170 = vmatpush1.msra.mxu1 %v9001_v45 }
 0x8fe   :  { %5100 = vmatprep.subr.mxu0 %v9008_v46  ;;  %5171 = vmatprep.subr.mxu1 %v9013_v47 }
 0x8ff   :  { %5101 = vmatpush1.msra.mxu0 %v9020_v48  ;;  %5172 = vmatpush1.msra.mxu1 %v9025_v49 }
 0x900   :  { %5102 = vmatprep.subr.mxu0 %v9032_v50  ;;  %5173 = vmatprep.subr.mxu1 %v9037_v51 }
 0x901   :  { %5103 = vmatpush1.msra.mxu0 %v9044_v52  ;;  %5174 = vmatpush1.msra.mxu1 %v9049_v53 }
 0x902   :  { %5104 = vmatprep.subr.mxu0 %v9056_v54  ;;  %5175 = vmatprep.subr.mxu1 %v9061_v55 }
 0x903   :  { %5105 = vmatpush1.msra.mxu0 %v9068_v56  ;;  %5176 = vmatpush1.msra.mxu1 %v9073_v57 }
 0x904   :  { %5106 = vmatprep.subr.mxu0 %v9080_v58  ;;  %5177 = vmatprep.subr.mxu1 %v9085_v59 }
 0x905   :  { %5107 = vmatpush1.msra.mxu0 %v9092_v60  ;;  %5178 = vmatpush1.msra.mxu1 %v9097_v61 }
 0x906   :  { %5108 = vmatprep.subr.mxu0 %v9104_v62  ;;  %5179 = vmatprep.subr.mxu1 %v9109_v63 }
 0x907   :  { %5109 = vmatpush1.msra.mxu0 %v9116_v1  ;;  %5180 = vmatpush1.msra.mxu1 %v9121_v2 }
 0x908   :  { %5110 = vmatprep.subr.mxu0 %v9128_v4  ;;  %5181 = vmatprep.subr.mxu1 %v9133_v5 }
 0x909   :  { %5111 = vmatpush1.msra.mxu0 %v9140_v6  ;;  %5182 = vmatpush1.msra.mxu1 %v9145_v7 }
 0x90a   :  { %5112 = vmatprep.subr.mxu0 %v9152_v8  ;;  %5183 = vmatprep.subr.mxu1 %v9157_v9 }
 0x90b   :  { %5113 = vmatpush1.msra.mxu0 %v9164_v10  ;;  %5184 = vmatpush1.msra.mxu1 %v9169_v11 }
 0x90c   :  { %5114 = vmatprep.subr.mxu0 %v9176_v12  ;;  %5185 = vmatprep.subr.mxu1 %v9181_v13 }
 0x90d   :  { %5115 = vmatpush1.msra.mxu0 %v9188_v14  ;;  %5186 = vmatpush1.msra.mxu1 %v9193_v15 }
 0x90e   :  { %5116 = vmatprep.subr.mxu0 %v9200_v42  ;;  %5187 = vmatprep.subr.mxu1 %v9205_v16 }
 0x90f   :  { %5117 = vmatpush1.msra.mxu0 %v9212_v17  ;;  %5188 = vmatpush1.msra.mxu1 %v9217_v20 }
 0x910   :  { %5118 = vmatprep.subr.mxu0 %v9224_v21  ;;  %5189 = vmatprep.subr.mxu1 %v9229_v22  ;;  %v9512_v22 = vmov 0.0  }
 0x911   :  { %5119 = vmatpush1.msra.mxu0 %v9236_v24  ;;  %5190 = vmatpush1.msra.mxu1 %v9241_v25 }
 0x912   :  { %5120 = vmatprep.subr.mxu0 %v9248_v26  ;;  %5191 = vmatprep.subr.mxu1 %v9253_v27 }
 0x913   :  { %5121 = vmatpush1.msra.mxu0 %v9260_v30  ;;  %5154 = vmatprep.mubr.f32.mxu0 %v9512_v22 }
 0x914   :  { %5192 = vmatpush1.msra.mxu1 %v9267_v0  ;;  %5225 = vmatprep.mubr.f32.mxu1 %v9512_v22 }
 0x915   :  { %5155 = vmatmul.mubr.f32.vlgmr.msra.gmra.mxu0 %v9512_v22  ;;  %5226 = vmatmul.mubr.f32.vlgmr.msra.gmra.mxu1 %v9512_v22 }
 0x916   :  { %5362 = vmatprep.subr.mxu0 %v8892_v18  ;;  %5433 = vmatprep.subr.mxu1 %v8897_v19  ;;  %v9513_v18 = vld [vmem:[#allocation27_spill] sm:$0xff]  ;;  %v4840_v19 = vlaneseq }
 0x917   :  { %5363 = vmatpush1.msra.mxu0 %v8904_v28  ;;  %5434 = vmatpush1.msra.mxu1 %v8909_v29  ;;  %v7290_v29 = vmov 1983009808  }
 0x918   :  { %5364 = vmatprep.subr.mxu0 %v8914_v23  ;;  %5435 = vmatprep.subr.mxu1 %v8919_v31  ;;  %v4841_v28 = vshrl.u32 %v4840_v19, 7  ;;  %v5009_v23 = vunpack.c.l.s4 %v7290_v29  ;;  %v5293_v29 = vld [vmem:[#allocation7] sm:$0x1] }
 0x919   :  { %5365 = vmatpush1.msra.mxu0 %v8924_v32  ;;  %5436 = vmatpush1.msra.mxu1 %v8929_v33 }
 0x91a   :  { %5366 = vmatprep.subr.mxu0 %v8936_v34  ;;  %5437 = vmatprep.subr.mxu1 %v8941_v3  ;;  %v4842_v31 = vsub.s32 0, %v4841_v28  ;;  %v4850_v32 = vsub.s32 2, %v4841_v28  ;;  %v4846_v33 = vsub.s32 1, %v4841_v28  ;;  %v4854_v34 = vsub.s32 3, %v4841_v28  ;;  %v4838_v3 = vld [vmem:[%s9485_s17] sm:$0xf] }
 0x91b   :  { %5367 = vmatpush1.msra.mxu0 %v8948_v35  ;;  %5438 = vmatpush1.msra.mxu1 %v8953_v36  ;;  %v5010_v35 = vunpack.c.0.s8 %v5009_v23  ;;  %s5759_s17 = sshll.u32 %s7292_s23, 4  ;;  %s5760_s17 = int_to_ptr.vmem [resolvable:$true] %s5759_s17 }
 0x91c   :  { %5368 = vmatprep.subr.mxu0 %v8960_v37  ;;  %5439 = vmatprep.subr.mxu1 %v8965_v38  ;;  %v4851_v36 = vrot.slane %v4838_v3, %v4850_v32  ;;  %v4847_v37 = vrot.slane %v4838_v3, %v4846_v33  ;;  %v4855_v38 = vrot.slane %v4838_v3, %v4854_v34  ;;  %v5583_v32 = vld [vmem:[%s9486_s18 + $0x70] sm:$0xff]  ;;  %v5582_v33 = vld [vmem:[%s9486_s18 + $0x68] sm:$0xff]  ;;  %v5581_v34 = vld [vmem:[%s9486_s18 + $0x60] sm:$0xff]  ;;  %p7254_p8 = scmp.lt.s32.totalorder %s5760_s17, %s5760_s17 }
 0x91d   :  { %5369 = vmatpush1.msra.mxu0 %v8972_v39  ;;  %5440 = vmatpush1.msra.mxu1 %v8977_v40 }
 0x91e   :  { %5370 = vmatprep.subr.mxu0 %v8984_v41  ;;  %5441 = vmatprep.subr.mxu1 %v8989_v43  ;;  %v5013_v43 = vsub.s32 %v5010_v35, %v4841_v28  ;;  %v5579_v35 = vld [vmem:[%s9486_s18 + $0x50] sm:$0xff] }
 0x91f   :  { %5371 = vmatpush1.msra.mxu0 %v8996_v44  ;;  %5442 = vmatpush1.msra.mxu1 %v9001_v45 }
 0x920   :  { %5372 = vmatprep.subr.mxu0 %v9008_v46  ;;  %5443 = vmatprep.subr.mxu1 %v9013_v47 }
 0x921   :  { %5373 = vmatpush1.msra.mxu0 %v9020_v48  ;;  %5444 = vmatpush1.msra.mxu1 %v9025_v49 }
 0x922   :  { %5374 = vmatprep.subr.mxu0 %v9032_v50  ;;  %5445 = vmatprep.subr.mxu1 %v9037_v51 }
 0x923   :  { %5375 = vmatpush1.msra.mxu0 %v9044_v52  ;;  %5446 = vmatpush1.msra.mxu1 %v9049_v53 }
 0x924   :  { %5376 = vmatprep.subr.mxu0 %v9056_v54  ;;  %5447 = vmatprep.subr.mxu1 %v9061_v55  ;;  %v7291_v54 = vmov 1966171168  }
 0x925   :  { %5377 = vmatpush1.msra.mxu0 %v9068_v56  ;;  %5448 = vmatpush1.msra.mxu1 %v9073_v57  ;;  %v5239_v55 = vunpack.c.l.s4 %v7291_v54 }
 0x926   :  { %5378 = vmatprep.subr.mxu0 %v9080_v58  ;;  %5449 = vmatprep.subr.mxu1 %v9085_v59 }
 0x927   :  { %5379 = vmatpush1.msra.mxu0 %v9092_v60  ;;  %5450 = vmatpush1.msra.mxu1 %v9097_v61  ;;  %v5240_v56 = vunpack.c.0.s8 %v5239_v55 }
 0x928   :  { %5380 = vmatprep.subr.mxu0 %v9104_v62  ;;  %5451 = vmatprep.subr.mxu1 %v9109_v63 }
 0x929   :  { %5381 = vmatpush1.msra.mxu0 %v9116_v1  ;;  %5452 = vmatpush1.msra.mxu1 %v9121_v2  ;;  %v9348_v59 = vsub.s32 %v5240_v56, %v4841_v28 }
 0x92a   :  { %5382 = vmatprep.subr.mxu0 %v9128_v4  ;;  %5453 = vmatprep.subr.mxu1 %v9133_v5 }
 0x92b   :  { %5383 = vmatpush1.msra.mxu0 %v9140_v6  ;;  %5454 = vmatpush1.msra.mxu1 %v9145_v7 }
 0x92c   :  { %5384 = vmatprep.subr.mxu0 %v9152_v8  ;;  %5455 = vmatprep.subr.mxu1 %v9157_v9 }
 0x92d   :  { %5385 = vmatpush1.msra.mxu0 %v9164_v10  ;;  %5456 = vmatpush1.msra.mxu1 %v9169_v11 }
 0x92e   :  { %5386 = vmatprep.subr.mxu0 %v9176_v12  ;;  %5457 = vmatprep.subr.mxu1 %v9181_v13 }
 0x92f   :  { %5387 = vmatpush1.msra.mxu0 %v9188_v14  ;;  %5458 = vmatpush1.msra.mxu1 %v9193_v15 }
 0x930   :  { %5388 = vmatprep.subr.mxu0 %v9200_v42  ;;  %5459 = vmatprep.subr.mxu1 %v9205_v16 }
 0x931   :  { %5389 = vmatpush1.msra.mxu0 %v9212_v17  ;;  %5460 = vmatpush1.msra.mxu1 %v9217_v20 }
 0x932   :  { %5390 = vmatprep.subr.mxu0 %v9224_v21  ;;  %5461 = vmatprep.subr.mxu1 %v9513_v18 }
 0x933   :  { %5391 = vmatpush1.msra.mxu0 %v9236_v24  ;;  %5462 = vmatpush1.msra.mxu1 %v9241_v25 }
 0x934   :  { %5392 = vmatprep.subr.mxu0 %v9248_v26  ;;  %5463 = vmatprep.subr.mxu1 %v9253_v27 }
 0x935   :  { %5393 = vmatpush1.msra.mxu0 %v9260_v30  ;;  %5426 = vmatprep.mubr.f32.mxu0 %v9512_v22 }
 0x936   :  { %5464 = vmatpush1.msra.mxu1 %v9267_v0  ;;  %5497 = vmatprep.mubr.f32.mxu1 %v9512_v22  ;;  %v4843_v0 = vrot.slane %v4838_v3, %v4842_v31  ;;  %v5584_v31 = vld [vmem:[%s9486_s18 + $0x78] sm:$0xff] }
 0x937   :  { %7009 = vmatprep.subr.mxu0 %v9512_v22  ;;  %7044 = vmatprep.subr.mxu1 %v9512_v22  ;;  %v5580_v3 = vld [vmem:[%s9486_s18 + $0x58] sm:$0xff] }
 0x9b4   :  { %v4926_v39 = vpop.f32.mrf.mxu0  ;;  %v4997_v40 = vpop.f32.mrf.mxu1 }
 0x9b5   :  { %v4927_v45 = vadd.f32 %v4926_v39, %v4843_v0  ;;  %v4998_v46 = vadd.f32 %v4997_v40, %v4851_v36  ;;  %v5578_v0 = vld [vmem:[%s9486_s18 + $0x48] sm:$0xff]  ;;  %v5577_v36 = vld [vmem:[%s9486_s18 + $0x40] sm:$0xff] }
 0x9b6   :  { %v4928_v41 = vpop.f32.mrf.mxu0  ;;  %v4999_v44 = vpop.f32.mrf.mxu1  ;;  %v5574_v39 = vld [vmem:[%s9486_s18 + $0x28] sm:$0xff]  ;;  %v5573_v40 = vld [vmem:[%s9486_s18 + $0x20] sm:$0xff] }
 0x9b7   :  { %v4929_v47 = vadd.f32 %v4928_v41, %v4847_v37  ;;  %v5000_v48 = vadd.f32 %v4999_v44, %v4855_v38  ;;  %v5576_v37 = vld [vmem:[%s9486_s18 + $0x38] sm:$0xff]  ;;  %v5575_v38 = vld [vmem:[%s9486_s18 + $0x30] sm:$0xff]  ;;  %v5570_v44 = vld [vmem:[%s9486_s18 + $0x8] sm:$0xff] }
 0x9b8   :  { %v5572_v41 = vld [vmem:[%s9486_s18 + $0x18] sm:$0xff] }
 0x9b9   :  { %v5006_v49 = vcombine.low %v4927_v45, %v4929_v47  ;;  %v5007_v50 = vcombine.low %v4998_v46, %v5000_v48  ;;  %v5569_v45 = vld [vmem:[%s9486_s18] sm:$0xff]  ;;  %v5670_v46 = vld [vmem:[%s9488_s20 + $0x38] sm:$0xff]  ;;  %v5669_v47 = vld [vmem:[%s9488_s20 + $0x30] sm:$0xff] }
 0x9ba   :  { %v5668_v48 = vld [vmem:[%s9488_s20 + $0x28] sm:$0xff] }
 0x9bb   :  { %v5014_v51 = vrot.slane %v5006_v49, %v5013_v43  ;;  %v5021_v52 = vrot.slane %v5007_v50, %v5013_v43  ;;  %v5571_v43 = vld [vmem:[%s9486_s18 + $0x10] sm:$0xff]  ;;  %v5667_v49 = vld [vmem:[%s9488_s20 + $0x20] sm:$0xff]  ;;  %v5666_v50 = vld [vmem:[%s9488_s20 + $0x18] sm:$0xff] }
 0x9bd   :  { %v5022_v53 = vcombine.low %v5014_v51, %v5021_v52 }
 0x9bf   :  { %5024 = vst [vmem:[#allocation6] sm:$0xff] %v5022_v53 }
 0x9c6   :  { %v5025_v6 = vld [vmem:[#allocation6] ss:$2 sm:$0xf] }
 0x9d5   :  { %v5156_v57 = vpop.f32.mrf.mxu0  ;;  %v5227_v58 = vpop.f32.mrf.mxu1 }
 0x9d7   :  { %v5158_v60 = vpop.f32.mrf.mxu0  ;;  %v5229_v61 = vpop.f32.mrf.mxu1 }
 0x9d8   :  { %v5236_v62 = vcombine.low %v5156_v57, %v5158_v60  ;;  %v5237_v63 = vcombine.low %v5227_v58, %v5229_v61 }
 0x9da   :  { %v5244_v1 = vrot.slane %v5236_v62, %v9348_v59  ;;  %v5251_v2 = vrot.slane %v5237_v63, %v9348_v59  ;;  %v5297_v62 = vld [vmem:[#allocation6 + $0x1] ss:$2 sm:$0xf] }
 0x9dc   :  { %v5252_v4 = vcombine.low %v5244_v1, %v5251_v2 }
 0x9de   :  { %v5259_v5 = vrot.slane %v5252_v4, %v9348_v59 }
 0x9e0   :  { %v5261_v7 = vadd.f32 %v5259_v5, %v5025_v6 }
 0x9e2   :  { %v6000_v8 = vmul.f32 -1.442695, %v5261_v7  ;;  %v5269_v9 = vrot.slane %v5261_v7, 1  ;;  %v5280_v11 = vrot.slane %v5261_v7, 3  ;;  %v5277_v14 = vrot.slane %v5261_v7, 2 }
 0x9e4   :  { %7077 = vpow2.f32 %v6000_v8  ;;  %v6001_v10 = vmul.f32 -1.442695, %v5269_v9  ;;  %v6002_v12 = vmul.f32 -1.442695, %v5280_v11 }
 0x9e6   :  { %7079 = vpow2.f32 %v6001_v10 }
 0x9e7   :  { %7081 = vpow2.f32 %v6002_v12 }
 0x9f1   :  { %v7078_v13 = vpop.eup %7077 }
 0x9f2   :  { %v5265_v15 = vadd.f32 1.0, %v7078_v13 }
 0x9f3   :  { %v7080_v42 = vpop.eup %7079 }
 0x9f4   :  { %7083 = vrcp.f32 %v5265_v15  ;;  %v5274_v16 = vadd.f32 1.0, %v7080_v42  ;;  %v7082_v17 = vpop.eup %7081 }
 0x9f5   :  { %7085 = vtanh.f32 %v5277_v14  ;;  %v5285_v25 = vadd.f32 1.0, %v7082_v17 }
 0x9f6   :  { %7087 = vrcp.f32 %v5274_v16 }
 0x9f7   :  { %7089 = vrcp.f32 %v5285_v25  ;;  %v5565_v25 = vld [vmem:[#allocation7 + $0x1] sm:$0x1] }
 0xa01   :  { %v7084_v20 = vpop.eup %7083 }
 0xa02   :  { %v7086_v21 = vpop.eup %7085 }
 0xa03   :  { %v7088_v24 = vpop.eup %7087  ;;  %v5289_v27 = vmul.f32 %v7086_v21, %v7084_v20 }
 0xa04   :  { %v5288_v26 = vmul.f32 0.0, %v7088_v24  ;;  %v7090_v18 = vpop.eup %7089 }
 0xa06   :  { %v9353_v30 = vadd.f32 %v5289_v27, %v5288_v26 }
 0xa08   :  { %7091 = vtanh.f32 %v9353_v30 }
 0xa15   :  { %v7092_v19 = vpop.eup %7091 }
 0xa16   :  { %v5292_v28 = vmul.f32 %v7092_v19, %v7090_v18  ;;  %v5665_v18 = vld [vmem:[%s9488_s20 + $0x10] sm:$0xff]  ;;  %v5663_v19 = vld [vmem:[%s9488_s20] sm:$0xff] }
 0xa18   :  { %v5294_v23 = vadd.f32 %v5293_v29, %v5292_v28  ;;  %5427 = vmatmul.mubr.f32.vlgmr.msra.gmra.mxu0 %v5292_v28  ;;  %5498 = vmatmul.mubr.f32.vlgmr.msra.gmra.mxu1 %v5292_v28  ;;  %v6006_v28 = vld [vmem:[%s9487_s19] ss:$0 sm:$0xff] }
 0xa19   :  { %7041 = vmatprep.mubr.msk.f32.mxu0 %vm7289_vm2, %v9512_v22  ;;  %7060 = vmatprep.mubr.msk.f32.mxu1 %vm7289_vm2, %v9512_v22  ;;  %vm5751_vm2 = vcmask 17408  }
 0xa1a   :  { %5295 = vst [vmem:[#allocation8] sm:$0x1] %v5294_v23  ;;  %7010 = vmatpush3.msra.mxu0 %v5584_v31  ;;  %7045 = vmatpush3.msra.mxu1 %v5670_v46 }
 0xa1b   :  { %7011 = vmatprep.subr.mxu0 %v9512_v22  ;;  %7046 = vmatprep.subr.mxu1 %v9512_v22 }
 0xa1c   :  { %7012 = vmatpush3.msra.mxu0 %v5583_v32  ;;  %7047 = vmatpush3.msra.mxu1 %v5669_v47 }
 0xa1d   :  { %7013 = vmatprep.subr.mxu0 %v9512_v22  ;;  %7048 = vmatprep.subr.mxu1 %v9512_v22 }
 0xa1e   :  { %7014 = vmatpush3.msra.mxu0 %v5582_v33  ;;  %7049 = vmatpush3.msra.mxu1 %v5668_v48  ;;  %v6007_v33 = vld [vmem:[%s9489_s21] ss:$0 sm:$0xff] }
 0xa1f   :  { %7015 = vmatprep.subr.mxu0 %v9512_v22  ;;  %7050 = vmatprep.subr.mxu1 %v9512_v22 }
 0xa20   :  { %7016 = vmatpush3.msra.mxu0 %v5581_v34  ;;  %7051 = vmatpush3.msra.mxu1 %v5667_v49 }
 0xa21   :  { %7017 = vmatprep.subr.mxu0 %v9512_v22  ;;  %7052 = vmatprep.subr.mxu1 %v9512_v22 }
 0xa22   :  { %7018 = vmatpush3.msra.mxu0 %v5580_v3  ;;  %7053 = vmatpush3.msra.mxu1 %v5666_v50 }
 0xa23   :  { %7019 = vmatprep.subr.mxu0 %v9512_v22  ;;  %7054 = vmatprep.subr.mxu1 %v9512_v22 }
 0xa24   :  { %7020 = vmatpush3.msra.mxu0 %v5579_v35  ;;  %7055 = vmatpush3.msra.mxu1 %v5665_v18 }
 0xa25   :  { %7021 = vmatprep.subr.mxu0 %v9512_v22  ;;  %7056 = vmatprep.subr.mxu1 %v9512_v22 }
 0xa26   :  { %7022 = vmatpush3.msra.mxu0 %v5578_v0 }
 0xa27   :  { %7023 = vmatprep.subr.mxu0 %v9512_v22 }
 0xa28   :  { %7024 = vmatpush3.msra.mxu0 %v5577_v36 }
 0xa29   :  { %7025 = vmatprep.subr.mxu0 %v9512_v22 }
 0xa2a   :  { %7026 = vmatpush3.msra.mxu0 %v5576_v37 }
 0xa2b   :  { %7027 = vmatprep.subr.mxu0 %v9512_v22 }
 0xa2c   :  { %7028 = vmatpush3.msra.mxu0 %v5575_v38 }
 0xa2d   :  { %7029 = vmatprep.subr.mxu0 %v9512_v22 }
 0xa2e   :  { %7030 = vmatpush3.msra.mxu0 %v5574_v39 }
 0xa2f   :  { %7031 = vmatprep.subr.mxu0 %v9512_v22 }
 0xa30   :  { %7032 = vmatpush3.msra.mxu0 %v5573_v40 }
 0xa31   :  { %7033 = vmatprep.subr.mxu0 %v9512_v22 }
 0xa32   :  { %7034 = vmatpush3.msra.mxu0 %v5572_v41 }
 0xa33   :  { %7035 = vmatprep.subr.mxu0 %v9512_v22 }
 0xa34   :  { %7036 = vmatpush3.msra.mxu0 %v5571_v43 }
 0xa35   :  { %7037 = vmatprep.subr.mxu0 %v9512_v22 }
 0xa36   :  { %7038 = vmatpush3.msra.mxu0 %v5570_v44 }
 0xa37   :  { %7039 = vmatprep.subr.mxu0 %v9512_v22 }
 0xa38   :  { %7040 = vmatpush3.msra.mxu0 %v5569_v45 }
 0xad8   :  { %v5428_v51 = vpop.f32.mrf.mxu0  ;;  %v5499_v52 = vpop.f32.mrf.mxu1 }
 0xada   :  { %v5430_v53 = vpop.f32.mrf.mxu0  ;;  %v5501_v54 = vpop.f32.mrf.mxu1 }
 0xadb   :  { %v5508_v55 = vcombine.low %v5428_v51, %v5430_v53  ;;  %v5509_v56 = vcombine.low %v5499_v52, %v5501_v54 }
 0xadd   :  { %v5516_v57 = vrot.slane %v5508_v55, %v9348_v59  ;;  %v5523_v58 = vrot.slane %v5509_v56, %v9348_v59 }
 0xadf   :  { %v5524_v60 = vcombine.low %v5516_v57, %v5523_v58 }
 0xae1   :  { %v5531_v61 = vrot.slane %v5524_v60, %v9348_v59 }
 0xae3   :  { %v5533_v63 = vadd.f32 %v5531_v61, %v5297_v62 }
 0xae5   :  { %v6003_v1 = vmul.f32 -1.442695, %v5533_v63  ;;  %v5541_v2 = vrot.slane %v5533_v63, 1  ;;  %v5552_v5 = vrot.slane %v5533_v63, 3  ;;  %v5549_v8 = vrot.slane %v5533_v63, 2 }
 0xae7   :  { %7093 = vpow2.f32 %v6003_v1  ;;  %v6004_v4 = vmul.f32 -1.442695, %v5541_v2  ;;  %v6005_v6 = vmul.f32 -1.442695, %v5552_v5 }
 0xae9   :  { %7095 = vpow2.f32 %v6004_v4 }
 0xaea   :  { %7097 = vpow2.f32 %v6005_v6 }
 0xaf4   :  { %v7094_v7 = vpop.eup %7093 }
 0xaf5   :  { %v5537_v9 = vadd.f32 1.0, %v7094_v7 }
 0xaf6   :  { %v7096_v10 = vpop.eup %7095 }
 0xaf7   :  { %7099 = vrcp.f32 %v5537_v9  ;;  %v5546_v11 = vadd.f32 1.0, %v7096_v10  ;;  %v7098_v12 = vpop.eup %7097 }
 0xaf8   :  { %7101 = vtanh.f32 %v5549_v8  ;;  %v5557_v15 = vadd.f32 1.0, %v7098_v12 }
 0xaf9   :  { %7103 = vrcp.f32 %v5546_v11 }
 0xafa   :  { %7105 = vrcp.f32 %v5557_v15 }
 0xb04   :  { %v7100_v59 = vpop.eup %7099 }
 0xb05   :  { %v7102_v13 = vpop.eup %7101 }
 0xb06   :  { %v7104_v14 = vpop.eup %7103  ;;  %v5561_v16 = vmul.f32 %v7102_v13, %v7100_v59 }
 0xb07   :  { %v5560_v42 = vmul.f32 %v7104_v14, %v9353_v30  ;;  %v7106_v20 = vpop.eup %7105  ;;  %v5664_v30 = vld [vmem:[%s9488_s20 + $0x8] sm:$0xff]  ;;  %s7249_s20 = scalar_lea.vmem %s5760_s17, 32 }
 0xb08   :  { %7057 = vmatpush3.msra.mxu1 %v5664_v30  ;;  %p7250_p7 = scmp.ne.s32.totalorder %s5760_s17, %s7249_s20  ;;  %p7255_p9 = scmp.lt.s32.totalorder %s7249_s20, %s7249_s20 }
 0xb09   :  { %v5562_v17 = vadd.f32 %v5561_v16, %v5560_v42  ;;  %7058 = vmatprep.subr.mxu1 %v9512_v22 }
 0xb0a   :  { %7059 = vmatpush3.msra.mxu1 %v5663_v19  ;;  %p7256_p10 = por %p7255_p9, %p7254_p8 }
 0xb0b   :  { %7107 = vtanh.f32 %v5562_v17 }
 0xb0c   :  { %p7257_p11 = pnand %p7256_p10, %p7250_p7 }
 0xb18   :  { %v7108_v21 = vpop.eup %7107 }
 0xb19   :  { %v5564_v24 = vmul.f32 %v7108_v21, %v7106_v20 }
 0xb1b   :  { %v5566_v26 = vadd.f32 %v5565_v25, %v5564_v24 }
 0xb1d   :  { %5567 = vst [vmem:[#allocation8 + $0x1] sm:$0x1] %v5566_v26 }
 0xb24   :  { %v5568_v27 = vld [vmem:[#allocation8] sm:$0x3] }
 0xb25   :  { %7042 = vmatmul.mubr.f32.vlgmr.msra.gmra.mxu0 %v5568_v27 }
 0xbe5   :  { %v5658_v29 = vpop.f32.mrf.mxu0 }
 0xbe6   :  { %v5659_v23 = vadd.f32 %v6006_v28, %v5658_v29 }
 0xbe7   :  { %v7043_v31 = vpop.f32.mrf.mxu0 }
 0xbe8   :  { %v5662_v32 = vmax.f32 %v5659_v23, 0.0 }
 0xbea   :  { %7061 = vmatmul.mubr.msk.f32.vlgmr.msra.gmra.mxu1 %vm156_vm0, %v5662_v32 }
 0xcaa   :  { %v5747_v34 = vpop.f32.mrf.mxu1 }
 0xcab   :  { %v5748_v22 = vadd.f32 %v6007_v33, %v5747_v34 }
 0xcac   :  { %v7062_v3 = vpop.f32.mrf.mxu1 }
 0xcad   :  { %5752 = vst.msk [vmem:[#allocation21] sm:$0x3] %vm5751_vm2, %v5748_v22 }
 0xcae   :  { %7260 = shalt.err (!%p7257_p11)
}
 0xcaf   :  { %5762 = dma.vmem_to_hbm [thread:$0]  %s5760_s17, 32, %s9490_s22, [#allocation11]  }
 0xcb0   :  { %7277 = dma.done.wait [#allocation11], 32  }
 0xcb1   :  { %7278 = vsyncadd [#allocation11], 4294967264 }
 0xcb2   :  { %5766 = vsyncpa [#allocation10], 1 }
 0xcb3   :  { %5767 = vsyncpa [#allocation13], 1 }
 0xcb4   :  { %5768 = vsyncpa [#allocation16], 1 }
 0xcb5   :  { %5769 = vsyncpa [#allocation19], 1 }
 0xcb6   :  { %5770 = vsyncpa [#allocation11], 1 }

</bundles_post_ra>
